<compile_context>
chip_gen: v7x
topology: tpu7x:2x2x1
jax: 0.10.0
libtpu: 0.0.40
codegen_flags: <defaults>
</compile_context>

<pallas_src>
import functools

import jax
import jax.numpy as jnp
from jax import lax
from jax.experimental import pallas as pl
from jax.experimental.pallas import tpu as pltpu


def _additive_attention_kernel(s_tile, score_dtype,
                               q_ref, s_ref, mask_ref,
                               w1t_ref, b1_ref, w2t_ref, b2_ref,
                               v_ref, bv_ref, wot_ref, bo_ref,
                               attn_w_ref, attn_out_ref):
    TB, q_len, q_dim = q_ref.shape
    _, s_len, s_dim = s_ref.shape
    h = w1t_ref.shape[1]
    out_dim = wot_ref.shape[1]
    n_s_tiles = s_len // s_tile

    # Query projection: fold batch into the MXU M dimension.
    q2 = q_ref[...].reshape(TB * q_len, q_dim)
    qp = jnp.dot(q2, w1t_ref[...], preferred_element_type=jnp.float32) + b1_ref[...]
    qp = qp.reshape(TB, q_len, h).astype(score_dtype)

    v_row = v_ref[...]            # [1, h] f32 score-projection vector
    bv = bv_ref[0, 0]             # SMEM scalar bias

    def score_tile(t, carry):
        off = pl.multiple_of(t * s_tile, s_tile)
        s_blk = s_ref[:, pl.ds(off, s_tile), :]                       # [TB, s_tile, s_dim]
        sp = jnp.dot(s_blk.reshape(TB * s_tile, s_dim), w2t_ref[...],
                     preferred_element_type=jnp.float32) + b2_ref[...]
        sp = sp.reshape(TB, s_tile, h).astype(score_dtype)
        # tanh runs on the EUP; score_dtype=bfloat16 roughly doubles its
        # throughput on v6e/v7x (keep f32 on v5e — no bf16 EUP there).
        tnh = jnp.tanh(qp[:, :, None, :] + sp[:, None, :, :])         # [TB, q, s_tile, h]
        sc = jnp.sum(tnh.astype(jnp.float32) * v_row, axis=-1) + bv   # [TB, q, s_tile]
        # Stage raw scores into the attn_w output VMEM buffer (reused as the
        # score scratch; it is fully overwritten with softmax values below).
        attn_w_ref[:, :, pl.ds(off, s_tile)] = sc
        return carry

    lax.fori_loop(0, n_s_tiles, score_tile, 0, unroll=n_s_tiles <= 8)

    # masked_fill(mask == 0, -1e10) + softmax over the full source length.
    # NOTE: any nonzero mask value means "keep" (matches 0/1 masks exactly).
    scores = attn_w_ref[...]
    scores = jnp.where(mask_ref[...] == 0.0, jnp.float32(-10000000000.0), scores)
    m = jnp.max(scores, axis=-1, keepdims=True)
    e = jnp.exp(scores - m)
    # Exact division: attn_w is a returned output, so no approx reciprocal.
    attn_w = e / jnp.sum(e, axis=-1, keepdims=True)

    # context = attn_w @ s, then the output projection (batch folded into M).
    ctx = jnp.einsum('bqs,bsd->bqd', attn_w, s_ref[...],
                     preferred_element_type=jnp.float32)               # [TB, q, s_dim]
    out = jnp.dot(ctx.reshape(TB * q_len, s_dim), wot_ref[...],
                  preferred_element_type=jnp.float32) + bo_ref[...]

    attn_w_ref[...] = attn_w.astype(attn_w_ref.dtype)
    attn_out_ref[...] = out.reshape(TB, q_len, out_dim).astype(attn_out_ref.dtype)


def additive_attention(q, s, mask, w1, b1, w2, b2, v, bv, wo, bo, *,
                       batch_tile=None, s_tile=None, score_dtype=jnp.float32):
    """q: [B,q_len,q_dim], s: [B,s_len,s_dim], mask: [B,1,s_len].
    Weights in PyTorch nn.Linear layout ([out_feat, in_feat]); biases as
    [1, out_feat] rows; v/bv implement the h_dim -> 1 score projection.
    score_dtype=jnp.bfloat16 is recommended on v6e/v7x; keep f32 on v5e."""
    B, q_len, q_dim = q.shape
    _, s_len, s_dim = s.shape
    h_dim = w1.shape[0]
    out_dim = wo.shape[0]

    # --- s_len tiling: bounds the [TB, q, s_tile, h] tanh block in VMEM ---
    if s_tile is None:
        s_tile = s_len
        for cand in (512, 256, 128):
            if s_len % cand == 0:
                s_tile = cand
                break
    assert s_len % s_tile == 0, "s_tile must divide s_len"

    # --- batch tiling: amortize grid-step overhead, stay within VMEM budget,
    # and keep >= 2 grid steps so "parallel" shards across v7x's 2 TCs. ---
    if batch_tile is None:
        tanh_bytes_per_batch = q_len * s_tile * h_dim * 4
        cap = max(1, (8 * 1024 * 1024) // max(tanh_bytes_per_batch, 1))
        cap = min(cap, 8)
        if B >= 2:
            cap = min(cap, B // 2)
        batch_tile = max(1, cap)
        while B % batch_tile:
            batch_tile -= 1
    TB = batch_tile
    assert B % TB == 0, "batch_tile must divide B"
    grid = (B // TB,)

    # Pre-transpose weights once on the host -> [in_feat, out_feat]; the
    # kernel then issues no per-step XLU transposes.
    w1t = jnp.transpose(w1)          # [q_dim, h]
    w2t = jnp.transpose(w2)          # [s_dim, h]
    wot = jnp.transpose(wo)          # [s_dim, out_dim]

    def replicated(shape):
        n = len(shape)
        return pl.BlockSpec(shape, lambda b, n=n: (0,) * n)

    # --- explicit VMEM budget (default scoped limit is only 16-32 MiB) ---
    def nbytes(*shapes, itemsize=4):
        tot = 0
        for sh in shapes:
            p = 1
            for d in sh:
                p *= int(d)
            tot += p * itemsize
        return tot

    io_bytes = 2 * nbytes((TB, q_len, q_dim), (TB, s_len, s_dim), (TB, 1, s_len),
                          (TB, q_len, s_len), (TB, q_len, out_dim))      # double-buffered
    w_bytes = 2 * nbytes(w1t.shape, b1.shape, w2t.shape, b2.shape,
                         v.shape, wot.shape, bo.shape)
    work_bytes = 3 * nbytes((TB, q_len, s_tile, h_dim)) + 3 * nbytes((TB, q_len, s_len))
    vmem_limit = int(min(64 * 1024 * 1024,
                         max(16 * 1024 * 1024, 2 * (io_bytes + w_bytes + work_bytes))))

    # Advisory cost estimate (transcendental-heavy kernel).
    flops = 2 * B * (q_len * q_dim * h_dim + s_len * s_dim * h_dim
                     + q_len * s_len * h_dim + q_len * s_len * s_dim
                     + q_len * s_dim * out_dim)
    transcendentals = B * q_len * s_len * (h_dim + 1)     # tanh + exp
    bytes_accessed = 4 * (int(q.size) + int(s.size) + int(mask.size)
                          + int(w1t.size) + int(w2t.size) + int(wot.size)
                          + int(b1.size) + int(b2.size) + int(v.size) + int(bo.size)
                          + int(bv.size) + B * q_len * s_len + B * q_len * out_dim)

    grid_spec = pltpu.PrefetchScalarGridSpec(
        num_scalar_prefetch=0,
        grid=grid,
        in_specs=[
            pl.BlockSpec((TB, q_len, q_dim), lambda b: (b, 0, 0)),
            pl.BlockSpec((TB, s_len, s_dim), lambda b: (b, 0, 0)),
            pl.BlockSpec((TB, 1, s_len), lambda b: (b, 0, 0)),
            replicated(w1t.shape), replicated(b1.shape),
            replicated(w2t.shape), replicated(b2.shape),
            replicated(v.shape),
            pl.BlockSpec(memory_space=pltpu.MemorySpace.SMEM),   # bv scalar
            replicated(wot.shape), replicated(bo.shape),
        ],
        out_specs=[
            pl.BlockSpec((TB, q_len, s_len), lambda b: (b, 0, 0)),
            pl.BlockSpec((TB, q_len, out_dim), lambda b: (b, 0, 0)),
        ],
    )

    kernel = functools.partial(_additive_attention_kernel, s_tile, score_dtype)

    return pl.pallas_call(
        kernel,
        out_shape=(jax.ShapeDtypeStruct((B, q_len, s_len), jnp.float32),
                   jax.ShapeDtypeStruct((B, q_len, out_dim), jnp.float32)),
        grid_spec=grid_spec,
        compiler_params=pltpu.CompilerParams(
            dimension_semantics=("parallel",),
            vmem_limit_bytes=vmem_limit),
        cost_estimate=pl.CostEstimate(flops=flops,
                                      transcendentals=transcendentals,
                                      bytes_accessed=bytes_accessed),
    )(q, s, mask, w1t, b1, w2t, b2, v, bv, wot, bo)


def reference(q, s, mask, w1, b1, w2, b2, v, bv, wo, bo):
    qp = q @ w1.T + b1[0]                       # [B, q_len, h]
    sp = s @ w2.T + b2[0]                       # [B, s_len, h]
    t = jnp.tanh(qp[:, :, None, :] + sp[:, None, :, :])
    score = jnp.einsum("bqsh,h->bqs", t, v[0]) + bv[0, 0]
    score = jnp.where(mask == 0.0, -10000000000.0, score)
    attn_w = jax.nn.softmax(score, axis=-1)
    ctx = attn_w @ s
    out = ctx @ wo.T + bo[0]
    return attn_w, out


if __name__ == "__main__":
    B, q_len, s_len = 2, 8, 256
    q_dim, s_dim, h_dim, out_dim = 16, 16, 32, 16

    key = jax.random.PRNGKey(0)
    ks = jax.random.split(key, 12)

    q = jax.random.normal(ks[0], (B, q_len, q_dim), jnp.float32)
    s = jax.random.normal(ks[1], (B, s_len, s_dim), jnp.float32)
    mask = (jax.random.uniform(ks[2], (B, 1, s_len)) > 0.3).astype(jnp.float32)
    mask = mask.at[:, :, 0].set(1.0)  # keep at least one valid source position

    # Deterministic synthetic parameters (PyTorch nn.Linear weight shapes).
    w1 = 0.1 * jax.random.normal(ks[3], (h_dim, q_dim), jnp.float32)
    b1 = 0.1 * jax.random.normal(ks[4], (1, h_dim), jnp.float32)
    w2 = 0.1 * jax.random.normal(ks[5], (h_dim, s_dim), jnp.float32)
    b2 = 0.1 * jax.random.normal(ks[6], (1, h_dim), jnp.float32)
    v = 0.1 * jax.random.normal(ks[7], (1, h_dim), jnp.float32)     # linear: h_dim -> 1
    bv = 0.1 * jax.random.normal(ks[8], (1, 1), jnp.float32)
    wo = 0.1 * jax.random.normal(ks[9], (out_dim, s_dim), jnp.float32)
    bo = 0.1 * jax.random.normal(ks[10], (1, out_dim), jnp.float32)

    ref_w, ref_out = reference(q, s, mask, w1, b1, w2, b2, v, bv, wo, bo)

    # f32 score path; explicit s_tile=128 exercises the in-kernel s-tiling loop.
    attn_w, attn_out = additive_attention(q, s, mask, w1, b1, w2, b2, v, bv, wo, bo,
                                          s_tile=128)
    attn_w, attn_out = jax.block_until_ready((attn_w, attn_out))
    assert attn_w.shape == (B, q_len, s_len)
    assert attn_out.shape == (B, q_len, out_dim)
    # Tolerance covers TPU MXU f32 matmul pass differences vs. the XLA reference.
    assert jnp.allclose(attn_w, ref_w, atol=2e-3, rtol=2e-3)
    assert jnp.allclose(attn_out, ref_out, atol=2e-3, rtol=2e-3)

    # Optional bf16 tanh path (EUP throughput on v6e/v7x); looser tolerance.
    attn_w_bf, attn_out_bf = additive_attention(q, s, mask, w1, b1, w2, b2, v, bv, wo, bo,
                                                s_tile=128, score_dtype=jnp.bfloat16)
    attn_w_bf, attn_out_bf = jax.block_until_ready((attn_w_bf, attn_out_bf))
    assert jnp.allclose(attn_w_bf, ref_w, atol=5e-2, rtol=5e-2)
    assert jnp.allclose(attn_out_bf, ref_out, atol=5e-2, rtol=5e-2)

    print("KERNEL_OK")
</pallas_src>

<mosaic_0001>
module attributes {stable_mosaic.version = 11 : i64} {
  func.func @_additive_attention_kernel(%arg0: i32, %arg1: memref<1x8x16xf32, #tpu.memory_space<vmem>>, %arg2: memref<1x256x16xf32, #tpu.memory_space<vmem>>, %arg3: memref<1x1x256xf32, #tpu.memory_space<vmem>>, %arg4: memref<16x32xf32, #tpu.memory_space<vmem>>, %arg5: memref<1x32xf32, #tpu.memory_space<vmem>>, %arg6: memref<16x32xf32, #tpu.memory_space<vmem>>, %arg7: memref<1x32xf32, #tpu.memory_space<vmem>>, %arg8: memref<1x32xf32, #tpu.memory_space<vmem>>, %arg9: memref<1x1xf32, #tpu.memory_space<smem>>, %arg10: memref<16x16xf32, #tpu.memory_space<vmem>>, %arg11: memref<1x16xf32, #tpu.memory_space<vmem>>, %arg12: memref<1x8x256xf32, #tpu.memory_space<vmem>>, %arg13: memref<1x8x16xf32, #tpu.memory_space<vmem>>) attributes {dimension_semantics = [#tpu.dimension_semantics<parallel>], iteration_bounds = array<i64: 2>, scalar_prefetch = 0 : i64, scratch_operands = 0 : i64, tpu.core_type = #tpu.core_type<tc>, window_params = [{transform_indices = @transform_0, window_bounds = array<i64: 1, 8, 16>}, {transform_indices = @transform_1, window_bounds = array<i64: 1, 256, 16>}, {transform_indices = @transform_2, window_bounds = array<i64: 1, 1, 256>}, {pipeline_mode = #tpu.pipeline_mode<synchronous>, transform_indices = @transform_3, window_bounds = array<i64: 16, 32>}, {pipeline_mode = #tpu.pipeline_mode<synchronous>, transform_indices = @transform_4, window_bounds = array<i64: 1, 32>}, {pipeline_mode = #tpu.pipeline_mode<synchronous>, transform_indices = @transform_5, window_bounds = array<i64: 16, 32>}, {pipeline_mode = #tpu.pipeline_mode<synchronous>, transform_indices = @transform_6, window_bounds = array<i64: 1, 32>}, {pipeline_mode = #tpu.pipeline_mode<synchronous>, transform_indices = @transform_7, window_bounds = array<i64: 1, 32>}, {transform_indices = @transform_8, window_bounds = array<i64: 1, 1>}, {pipeline_mode = #tpu.pipeline_mode<synchronous>, transform_indices = @transform_9, window_bounds = array<i64: 16, 16>}, {pipeline_mode = #tpu.pipeline_mode<synchronous>, transform_indices = @transform_10, window_bounds = array<i64: 1, 16>}, {transform_indices = @transform_11, window_bounds = array<i64: 1, 8, 256>}, {transform_indices = @transform_12, window_bounds = array<i64: 1, 8, 16>}]} {
    %c0 = arith.constant 0 : index
    %c0_0 = arith.constant 0 : index
    %c0_1 = arith.constant 0 : index
    %0 = vector.load %arg1[%c0, %c0_0, %c0_1] : memref<1x8x16xf32, #tpu.memory_space<vmem>>, vector<1x8x16xf32>
    %1 = vector.shape_cast %0 : vector<1x8x16xf32> to vector<8x16xf32>
    %c0_2 = arith.constant 0 : index
    %c0_3 = arith.constant 0 : index
    %2 = vector.load %arg4[%c0_2, %c0_3] : memref<16x32xf32, #tpu.memory_space<vmem>>, vector<16x32xf32>
    %cst = arith.constant dense<0.000000e+00> : vector<8x32xf32>
    %3 = tpu.matmul %1, %2, %cst {dimension_numbers = #tpu.dot_dimension_numbers<[1], [0], [0], [1], [0, 0, 1, 1], [], []>} : vector<8x16xf32>, vector<16x32xf32>, vector<8x32xf32> -> vector<8x32xf32>
    %c0_4 = arith.constant 0 : index
    %c0_5 = arith.constant 0 : index
    %4 = vector.load %arg5[%c0_4, %c0_5] : memref<1x32xf32, #tpu.memory_space<vmem>>, vector<1x32xf32>
    %5 = vector.broadcast %4 : vector<1x32xf32> to vector<8x32xf32>
    %6 = arith.addf %3, %5 : vector<8x32xf32>
    %7 = vector.shape_cast %6 : vector<8x32xf32> to vector<1x8x32xf32>
    %c0_6 = arith.constant 0 : index
    %c0_7 = arith.constant 0 : index
    %8 = vector.load %arg8[%c0_6, %c0_7] : memref<1x32xf32, #tpu.memory_space<vmem>>, vector<1x32xf32>
    %c0_8 = arith.constant 0 : index
    %c0_9 = arith.constant 0 : index
    %9 = memref.load %arg9[%c0_8, %c0_9] : memref<1x1xf32, #tpu.memory_space<smem>>
    %c0_i32 = arith.constant 0 : i32
    %c128_i32 = arith.constant 128 : i32
    %10 = arith.muli %c0_i32, %c128_i32 : i32
    %11 = tpu.assume_multiple %10, 128 : i32
    %c0_10 = arith.constant 0 : index
    %12 = arith.index_cast %11 : i32 to index
    %c0_11 = arith.constant 0 : index
    %13 = vector.load %arg2[%c0_10, %12, %c0_11] : memref<1x256x16xf32, #tpu.memory_space<vmem>>, vector<1x128x16xf32>
    %14 = vector.shape_cast %13 : vector<1x128x16xf32> to vector<128x16xf32>
    %c0_12 = arith.constant 0 : index
    %c0_13 = arith.constant 0 : index
    %15 = vector.load %arg6[%c0_12, %c0_13] : memref<16x32xf32, #tpu.memory_space<vmem>>, vector<16x32xf32>
    %cst_14 = arith.constant dense<0.000000e+00> : vector<128x32xf32>
    %16 = tpu.matmul %14, %15, %cst_14 {dimension_numbers = #tpu.dot_dimension_numbers<[1], [0], [0], [1], [0, 0, 1, 1], [], []>} : vector<128x16xf32>, vector<16x32xf32>, vector<128x32xf32> -> vector<128x32xf32>
    %c0_15 = arith.constant 0 : index
    %c0_16 = arith.constant 0 : index
    %17 = vector.load %arg7[%c0_15, %c0_16] : memref<1x32xf32, #tpu.memory_space<vmem>>, vector<1x32xf32>
    %18 = vector.broadcast %17 : vector<1x32xf32> to vector<128x32xf32>
    %19 = arith.addf %16, %18 : vector<128x32xf32>
    %20 = vector.shape_cast %19 : vector<128x32xf32> to vector<1x128x32xf32>
    %21 = vector.shape_cast %7 : vector<1x8x32xf32> to vector<1x8x1x32xf32>
    %22 = vector.shape_cast %20 : vector<1x128x32xf32> to vector<1x1x128x32xf32>
    %23 = vector.broadcast %21 : vector<1x8x1x32xf32> to vector<1x8x128x32xf32>
    %24 = vector.broadcast %22 : vector<1x1x128x32xf32> to vector<1x8x128x32xf32>
    %25 = arith.addf %23, %24 : vector<1x8x128x32xf32>
    %26 = math.tanh %25 : vector<1x8x128x32xf32>
    %27 = vector.shape_cast %8 : vector<1x32xf32> to vector<1x1x1x32xf32>
    %28 = vector.broadcast %27 : vector<1x1x1x32xf32> to vector<1x8x128x32xf32>
    %29 = arith.mulf %26, %28 : vector<1x8x128x32xf32>
    %cst_17 = arith.constant dense<0.000000e+00> : vector<1x8x128xf32>
    %30 = vector.multi_reduction <add>, %29, %cst_17 [3] : vector<1x8x128x32xf32> to vector<1x8x128xf32>
    %31 = vector.broadcast %9 : f32 to vector<1x8x128xf32>
    %32 = arith.addf %30, %31 : vector<1x8x128xf32>
    %c0_18 = arith.constant 0 : index
    %c0_19 = arith.constant 0 : index
    %33 = arith.index_cast %11 : i32 to index
    %34 = vector.load %arg12[%c0_18, %c0_19, %33] : memref<1x8x256xf32, #tpu.memory_space<vmem>>, vector<1x8x128xf32>
    tpu.vector_store %arg12[%c0_18, %c0_19, %33], %32 {strides = array<i32>} : memref<1x8x256xf32, #tpu.memory_space<vmem>>, vector<1x8x128xf32>,
    %c1_i32 = arith.constant 1 : i32
    %c128_i32_20 = arith.constant 128 : i32
    %35 = arith.muli %c1_i32, %c128_i32_20 : i32
    %36 = tpu.assume_multiple %35, 128 : i32
    %c0_21 = arith.constant 0 : index
    %37 = arith.index_cast %36 : i32 to index
    %c0_22 = arith.constant 0 : index
    %38 = vector.load %arg2[%c0_21, %37, %c0_22] : memref<1x256x16xf32, #tpu.memory_space<vmem>>, vector<1x128x16xf32>
    %39 = vector.shape_cast %38 : vector<1x128x16xf32> to vector<128x16xf32>
    %c0_23 = arith.constant 0 : index
    %c0_24 = arith.constant 0 : index
    %40 = vector.load %arg6[%c0_23, %c0_24] : memref<16x32xf32, #tpu.memory_space<vmem>>, vector<16x32xf32>
    %cst_25 = arith.constant dense<0.000000e+00> : vector<128x32xf32>
    %41 = tpu.matmul %39, %40, %cst_25 {dimension_numbers = #tpu.dot_dimension_numbers<[1], [0], [0], [1], [0, 0, 1, 1], [], []>} : vector<128x16xf32>, vector<16x32xf32>, vector<128x32xf32> -> vector<128x32xf32>
    %c0_26 = arith.constant 0 : index
    %c0_27 = arith.constant 0 : index
    %42 = vector.load %arg7[%c0_26, %c0_27] : memref<1x32xf32, #tpu.memory_space<vmem>>, vector<1x32xf32>
    %43 = vector.broadcast %42 : vector<1x32xf32> to vector<128x32xf32>
    %44 = arith.addf %41, %43 : vector<128x32xf32>
    %45 = vector.shape_cast %44 : vector<128x32xf32> to vector<1x128x32xf32>
    %46 = vector.shape_cast %7 : vector<1x8x32xf32> to vector<1x8x1x32xf32>
    %47 = vector.shape_cast %45 : vector<1x128x32xf32> to vector<1x1x128x32xf32>
    %48 = vector.broadcast %46 : vector<1x8x1x32xf32> to vector<1x8x128x32xf32>
    %49 = vector.broadcast %47 : vector<1x1x128x32xf32> to vector<1x8x128x32xf32>
    %50 = arith.addf %48, %49 : vector<1x8x128x32xf32>
    %51 = math.tanh %50 : vector<1x8x128x32xf32>
    %52 = vector.shape_cast %8 : vector<1x32xf32> to vector<1x1x1x32xf32>
    %53 = vector.broadcast %52 : vector<1x1x1x32xf32> to vector<1x8x128x32xf32>
    %54 = arith.mulf %51, %53 : vector<1x8x128x32xf32>
    %cst_28 = arith.constant dense<0.000000e+00> : vector<1x8x128xf32>
    %55 = vector.multi_reduction <add>, %54, %cst_28 [3] : vector<1x8x128x32xf32> to vector<1x8x128xf32>
    %56 = vector.broadcast %9 : f32 to vector<1x8x128xf32>
    %57 = arith.addf %55, %56 : vector<1x8x128xf32>
    %c0_29 = arith.constant 0 : index
    %c0_30 = arith.constant 0 : index
    %58 = arith.index_cast %36 : i32 to index
    %59 = vector.load %arg12[%c0_29, %c0_30, %58] : memref<1x8x256xf32, #tpu.memory_space<vmem>>, vector<1x8x128xf32>
    tpu.vector_store %arg12[%c0_29, %c0_30, %58], %57 {strides = array<i32>} : memref<1x8x256xf32, #tpu.memory_space<vmem>>, vector<1x8x128xf32>,
    %c2_i32 = arith.constant 2 : i32
    %c0_31 = arith.constant 0 : index
    %c0_32 = arith.constant 0 : index
    %c0_33 = arith.constant 0 : index
    %60 = vector.load %arg12[%c0_31, %c0_32, %c0_33] : memref<1x8x256xf32, #tpu.memory_space<vmem>>, vector<1x8x256xf32>
    %c0_34 = arith.constant 0 : index
    %c0_35 = arith.constant 0 : index
    %c0_36 = arith.constant 0 : index
    %61 = vector.load %arg3[%c0_34, %c0_35, %c0_36] : memref<1x1x256xf32, #tpu.memory_space<vmem>>, vector<1x1x256xf32>
    %cst_37 = arith.constant 0.000000e+00 : f32
    %62 = vector.broadcast %cst_37 : f32 to vector<1x1x256xf32>
    %63 = arith.cmpf oeq, %61, %62 : vector<1x1x256xf32>
    %cst_38 = arith.constant -1.000000e+10 : f32
    %64 = vector.shape_cast %63 : vector<1x1x256xi1> to vector<1x1x256xi1>
    %65 = vector.broadcast %64 : vector<1x1x256xi1> to vector<1x8x256xi1>
    %66 = vector.broadcast %cst_38 : f32 to vector<1x8x256xf32>
    %67 = arith.select %65, %66, %60 : vector<1x8x256xi1>, vector<1x8x256xf32>
    %cst_39 = arith.constant dense<0xFF800000> : vector<1x8xf32>
    %68 = vector.multi_reduction <maximumf>, %67, %cst_39 [2] : vector<1x8x256xf32> to vector<1x8xf32>
    %69 = vector.shape_cast %68 : vector<1x8xf32> to vector<1x8x1xf32>
    %70 = vector.broadcast %69 : vector<1x8x1xf32> to vector<1x8x256xf32>
    %71 = arith.subf %67, %70 : vector<1x8x256xf32>
    %72 = math.exp %71 : vector<1x8x256xf32>
    %cst_40 = arith.constant dense<0.000000e+00> : vector<1x8xf32>
    %73 = vector.multi_reduction <add>, %72, %cst_40 [2] : vector<1x8x256xf32> to vector<1x8xf32>
    %74 = vector.shape_cast %73 : vector<1x8xf32> to vector<1x8x1xf32>
    %75 = vector.broadcast %74 : vector<1x8x1xf32> to vector<1x8x256xf32>
    %76 = arith.divf %72, %75 : vector<1x8x256xf32>
    %c0_41 = arith.constant 0 : index
    %c0_42 = arith.constant 0 : index
    %c0_43 = arith.constant 0 : index
    %77 = vector.load %arg2[%c0_41, %c0_42, %c0_43] : memref<1x256x16xf32, #tpu.memory_space<vmem>>, vector<1x256x16xf32>
    "tpu.trace_start"() <{level = 10 : i32, message = "bqs,bsd->bqd"}> : () -> ()
    %cst_44 = arith.constant dense<0.000000e+00> : vector<1x8x16xf32>
    %78 = tpu.matmul %76, %77, %cst_44 {dimension_numbers = #tpu.dot_dimension_numbers<[2], [1], [1], [2], [0, 0, 0, 1, 1, 2], [0], [0]>} : vector<1x8x256xf32>, vector<1x256x16xf32>, vector<1x8x16xf32> -> vector<1x8x16xf32>
    "tpu.trace_stop"() : () -> ()
    %79 = vector.shape_cast %78 : vector<1x8x16xf32> to vector<8x16xf32>
    %c0_45 = arith.constant 0 : index
    %c0_46 = arith.constant 0 : index
    %80 = vector.load %arg10[%c0_45, %c0_46] : memref<16x16xf32, #tpu.memory_space<vmem>>, vector<16x16xf32>
    %cst_47 = arith.constant dense<0.000000e+00> : vector<8x16xf32>
    %81 = tpu.matmul %79, %80, %cst_47 {dimension_numbers = #tpu.dot_dimension_numbers<[1], [0], [0], [1], [0, 0, 1, 1], [], []>} : vector<8x16xf32>, vector<16x16xf32>, vector<8x16xf32> -> vector<8x16xf32>
    %c0_48 = arith.constant 0 : index
    %c0_49 = arith.constant 0 : index
    %82 = vector.load %arg11[%c0_48, %c0_49] : memref<1x16xf32, #tpu.memory_space<vmem>>, vector<1x16xf32>
    %83 = vector.broadcast %82 : vector<1x16xf32> to vector<8x16xf32>
    %84 = arith.addf %81, %83 : vector<8x16xf32>
    %c0_50 = arith.constant 0 : index
    %c0_51 = arith.constant 0 : index
    %c0_52 = arith.constant 0 : index
    %85 = vector.load %arg12[%c0_50, %c0_51, %c0_52] : memref<1x8x256xf32, #tpu.memory_space<vmem>>, vector<1x8x256xf32>
    tpu.vector_store %arg12[%c0_50, %c0_51, %c0_52], %76 {strides = array<i32>} : memref<1x8x256xf32, #tpu.memory_space<vmem>>, vector<1x8x256xf32>,
    %86 = vector.shape_cast %84 : vector<8x16xf32> to vector<1x8x16xf32>
    %c0_53 = arith.constant 0 : index
    %c0_54 = arith.constant 0 : index
    %c0_55 = arith.constant 0 : index
    %87 = vector.load %arg13[%c0_53, %c0_54, %c0_55] : memref<1x8x16xf32, #tpu.memory_space<vmem>>, vector<1x8x16xf32>
    tpu.vector_store %arg13[%c0_53, %c0_54, %c0_55], %86 {strides = array<i32>} : memref<1x8x16xf32, #tpu.memory_space<vmem>>, vector<1x8x16xf32>,
    return
  }
  func.func @transform_0(%arg0: i32) -> (i32, i32, i32) {
    %c0_i32 = arith.constant 0 : i32
    %c0_i32_0 = arith.constant 0 : i32
    %c0_i32_1 = arith.constant 0 : i32
    return %arg0, %c0_i32, %c0_i32_0 : i32, i32, i32
  }
  func.func @transform_1(%arg0: i32) -> (i32, i32, i32) {
    %c0_i32 = arith.constant 0 : i32
    %c0_i32_0 = arith.constant 0 : i32
    %c0_i32_1 = arith.constant 0 : i32
    return %arg0, %c0_i32, %c0_i32_0 : i32, i32, i32
  }
  func.func @transform_2(%arg0: i32) -> (i32, i32, i32) {
    %c0_i32 = arith.constant 0 : i32
    %c0_i32_0 = arith.constant 0 : i32
    %c0_i32_1 = arith.constant 0 : i32
    return %arg0, %c0_i32, %c0_i32_0 : i32, i32, i32
  }
  func.func @transform_3(%arg0: i32) -> (i32, i32) {
    %c0_i32 = arith.constant 0 : i32
    %c0_i32_0 = arith.constant 0 : i32
    %c0_i32_1 = arith.constant 0 : i32
    return %c0_i32, %c0_i32_0 : i32, i32
  }
  func.func @transform_4(%arg0: i32) -> (i32, i32) {
    %c0_i32 = arith.constant 0 : i32
    %c0_i32_0 = arith.constant 0 : i32
    %c0_i32_1 = arith.constant 0 : i32
    return %c0_i32, %c0_i32_0 : i32, i32
  }
  func.func @transform_5(%arg0: i32) -> (i32, i32) {
    %c0_i32 = arith.constant 0 : i32
    %c0_i32_0 = arith.constant 0 : i32
    %c0_i32_1 = arith.constant 0 : i32
    return %c0_i32, %c0_i32_0 : i32, i32
  }
  func.func @transform_6(%arg0: i32) -> (i32, i32) {
    %c0_i32 = arith.constant 0 : i32
    %c0_i32_0 = arith.constant 0 : i32
    %c0_i32_1 = arith.constant 0 : i32
    return %c0_i32, %c0_i32_0 : i32, i32
  }
  func.func @transform_7(%arg0: i32) -> (i32, i32) {
    %c0_i32 = arith.constant 0 : i32
    %c0_i32_0 = arith.constant 0 : i32
    %c0_i32_1 = arith.constant 0 : i32
    return %c0_i32, %c0_i32_0 : i32, i32
  }
  func.func @transform_8(%arg0: i32) -> (i32, i32) {
    %c0_i32 = arith.constant 0 : i32
    %c0_i32_0 = arith.constant 0 : i32
    %c0_i32_1 = arith.constant 0 : i32
    return %c0_i32, %c0_i32_0 : i32, i32
  }
  func.func @transform_9(%arg0: i32) -> (i32, i32) {
    %c0_i32 = arith.constant 0 : i32
    %c0_i32_0 = arith.constant 0 : i32
    %c0_i32_1 = arith.constant 0 : i32
    return %c0_i32, %c0_i32_0 : i32, i32
  }
  func.func @transform_10(%arg0: i32) -> (i32, i32) {
    %c0_i32 = arith.constant 0 : i32
    %c0_i32_0 = arith.constant 0 : i32
    %c0_i32_1 = arith.constant 0 : i32
    return %c0_i32, %c0_i32_0 : i32, i32
  }
  func.func @transform_11(%arg0: i32) -> (i32, i32, i32) {
    %c0_i32 = arith.constant 0 : i32
    %c0_i32_0 = arith.constant 0 : i32
    %c0_i32_1 = arith.constant 0 : i32
    return %arg0, %c0_i32, %c0_i32_0 : i32, i32, i32
  }
  func.func @transform_12(%arg0: i32) -> (i32, i32, i32) {
    %c0_i32 = arith.constant 0 : i32
    %c0_i32_0 = arith.constant 0 : i32
    %c0_i32_1 = arith.constant 0 : i32
    return %arg0, %c0_i32, %c0_i32_0 : i32, i32, i32
  }
}

</mosaic_0001>

<bundles_post_ra>
// kernel: tpu_custom_call.1
= control target key start
LH: loop header
LB: loop body
LE: loop exit
PB: predicated region body
PF: predicated region fallthrough
CT: control target
= control target key end

     0   :  { %s8641_s0 = inlined_call_operand.vmem [shape: f32[2,8,16], index: 0, kind: input, shape index: {}]   ;;  %s8642_s1 = inlined_call_operand.vmem [shape: f32[2,256,16], index: 1, kind: input, shape index: {}]   ;;  %s8643_s2 = inlined_call_operand.vmem [shape: f32[2,1,256], index: 2, kind: input, shape index: {}]   ;;  %s8644_s3 = inlined_call_operand.vmem [shape: f32[16,32], index: 3, kind: input, shape index: {}]   ;;  %s8645_s4 = inlined_call_operand.vmem [shape: f32[1,32], index: 4, kind: input, shape index: {}]   ;;  %s8646_s5 = inlined_call_operand.vmem [shape: f32[16,32], index: 5, kind: input, shape index: {}]   ;;  %s8647_s6 = inlined_call_operand.vmem [shape: f32[1,32], index: 6, kind: input, shape index: {}]   ;;  %s8648_s7 = inlined_call_operand.vmem [shape: f32[1,32], index: 7, kind: input, shape index: {}]   ;;  %s8649_s8 = inlined_call_operand.<no memory space> [shape: f32[1,1], index: 8, kind: input, shape index: {}]   ;;  %s8650_s9 = inlined_call_operand.vmem [shape: f32[16,16], index: 9, kind: input, shape index: {}]   ;;  %s8651_s10 = inlined_call_operand.vmem [shape: f32[1,16], index: 10, kind: input, shape index: {}]   ;;  %s8652_s11 = inlined_call_operand.hbm [shape: f32[2,8,256], index: 11, kind: output, shape index: {0}]   ;;  %s8653_s12 = inlined_call_operand.hbm [shape: f32[2,8,16], index: 12, kind: output, shape index: {1}]  }
   0x1   :  { %8666 = sst [smem:[#allocation28_spill]] %s8641_s0 }
   0x2   :  { %8667 = sst [smem:[#allocation29_spill]] %s8642_s1 }
   0x3   :  { %8668 = sst [smem:[#allocation30_spill]] %s8643_s2 }
   0x4   :  { %18 = sst [smem:[#allocation2]] %s8649_s8 }
   0x5   :  { %19 = vsyncpa [#allocation4], 0 }
   0x6   :  { %21 = vsyncpa [#allocation4 + $0x1], 0 }
   0x7   :  { %22 = vsyncpa [#allocation6], 0 }
   0x8   :  { %24 = vsyncpa [#allocation6 + $0x1], 0  ;;  %s5826_s23 = smov 0   ;;  %s5828_s24 = smov 0  }
   0x9   :  { %s5830_s25 = smov 0   ;;  %s5832_s26 = smov 0  }
   0xa LB: > { %s5847_s8 = sadd.s32 4294967295, %s5749_s26   ;;  %s4816_s27 = sadd.s32 4294967294, %s5749_s26   ;;  %s5749_s26 = sphi %s5832_s26, %s8723_s26   ;;  %s5745_s25 = sphi %s5830_s25, %s8722_s25   ;;  %s5741_s24 = sphi %s5828_s24, %s8721_s24   ;;  %s5737_s23 = sphi %s5826_s23, %s8720_s23  }
   0xb   : > { %s5851_s28 = sadd.s32 1, %s5749_s26   ;;  %s283_s29 = sadd.s32 1, %s5745_s25 }
   0xc   : > { %s280_s30 = ssub.s32 %s5749_s26, %s5851_s28  ;;  %p293_p0 = scmp.ne.s32.totalorder %s5745_s25, %s5741_s24 }
   0xd   : > { %p281_p1 = scmp.eq.s32.totalorder %s280_s30, 0  ;;  %p294_p2 = scmp.eq.s32.totalorder %s5847_s8, 1 }
   0xe   : > { %p299_p3 = scmp.ne.s32.totalorder %s5741_s24, %s5737_s23  ;;  %p300_p4 = scmp.eq.s32.totalorder %s4816_s27, 1 }
   0xf   : > { %s5862_s13 = scalar_select %p281_p1, %s5745_s25, %s283_s29  }
  0x10   : > { %p5864_p5 = por %p294_p2, %p293_p0  ;;  %p5868_p6 = por %p300_p4, %p299_p3 }
  0x11   : > { %p4819_p7 = scmp.ge.s32.totalorder %s5749_s26, 1  ;;  %p390_p8 = scmp.lt.s32.totalorder %s5749_s26, 3 }
  0x13   : > { %p391_p9 = pnand %p4819_p7, %p390_p8 }
  0x15   : > { %394 = sbr.rel (%p391_p9) target bundleno = 1692 (0x69c), region = 64 }
  0x1c   : > { %v459_v0 = vld [vmem:[%s8644_s3] sm:$0xff]  ;;  %v460_v1 = vld [vmem:[%s8644_s3 + $0x8] sm:$0xff]  ;;  %v5751_v3 = vmov 0.0|0.0   ;;  %vm5752_vm0 = vmmov 0   ;;  %v5753_v6 = vmov 0.0   ;;  %p445_p10 = scmp.lt.s32.totalorder %s5847_s8, 1  ;;  %v767_v43 = vlaneseq }
  0x1d   : > { %v560_v2 = vld [vmem:[%s8646_s5] sm:$0xff]  ;;  %5038 = vmatprep.subr.bf16.mxu0 %v5751_v3  ;;  %v5039_v4 = vpack.c.bf16 %v460_v1, %v459_v0  ;;  %v561_v5 = vld [vmem:[%s8646_s5 + $0x8] sm:$0xff]  ;;  %4972 = vmatprep.mubr.msk.f32.mxu0 %vm5752_vm0, %v5753_v6  ;;  %vm468_vm1 = vcmask 130048   ;;  %s8671_s0 = sld [smem:[#allocation28_spill]]  ;;  %s8672_s1 = sld [smem:[#allocation29_spill]]  ;;  %vm1242_vm2 = vcmask 261120  }
  0x1e   : > { %v5041_v7 = vpack.c.bf16 %v561_v5, %v560_v2  ;;  %s5890_s29 = scalar_select %p445_p10, %s5847_s8, 1  ;;  %v5754_v41 = vmov 1966171168   ;;  %v5970_v45 = vshrl.u32 %v767_v43, 7  ;;  %v4826_v46 = vld [vmem:[%s8645_s4] ss:$0 sm:$0xff] }
  0x1f   : > { %5040 = vmatpush3.bf16.msra.mxu0 %v5039_v4  ;;  %v765_v42 = vunpack.c.l.s4 %v5754_v41  ;;  %v5989_v60 = vld [vmem:[%s8647_s6] ss:$0 sm:$0xff]  ;;  %s543_s20 = sld [smem:[#allocation2]]  ;;  %vm1895_vm3 = vcmask 130112   ;;  %vm1902_vm4 = vcmask 195712   ;;  %vm1909_vm5 = vcmask 261312  }
  0x20   : > { %5042 = vmatprep.subr.bf16.mxu1 %v5041_v7  ;;  %5046 = vmatprep.subr.bf16.mxu0 %v5041_v7  ;;  %s4822_s30 = sshll.u32 %s5890_s29, 3  ;;  %s4889_s16 = sshll.u32 %s5890_s29, 8  ;;  %8673 = vst [vmem:[#allocation9_spill] sm:$0xff] %v5970_v45  ;;  %v5980_v55 = vsub.s32 0, %v5970_v45  ;;  %vm1916_vm6 = vcmask 326912   ;;  %vm1923_vm7 = vcmask 392512  }
  0x21   : > { %5044 = vmatpush3.bf16.msra.mxu1 %v5041_v7  ;;  %v766_v44 = vunpack.c.0.s8 %v765_v42  ;;  %vm1930_vm8 = vcmask 458112   ;;  %vm1937_vm9 = vcmask 523712   ;;  %vm1944_vm10 = vcmask 589312   ;;  %s4825_s21 = sshll.u32 %s5890_s29, 1  ;;  %s8718_s2 = sld [smem:[#allocation30_spill]] }
  0x22   : > { %8674 = vst [vmem:[#allocation10_spill] sm:$0xff] %v5980_v55  ;;  %vm1951_vm11 = vcmask 654912   ;;  %vm1958_vm12 = vcmask 720512   ;;  %vm1965_vm13 = vcmask 786112   ;;  %vm1972_vm14 = vcmask 851712  }
  0x23   : > { %s448_s19 = scalar_lea.vmem %s8671_s0, %s4822_s30  ;;  %s5900_s22 = scalar_lea.vmem %s8672_s1, %s4889_s16  ;;  %v5976_v47 = vsub.s32 %v766_v44, %v5970_v45  ;;  %vm1979_vm15 = vcmask 917312  }
  0x24   : > { %v458_v8 = vld [vmem:[%s448_s19] sm:$0xff]  ;;  %v545_v10 = vld [vmem:[%s5900_s22 + $0x8] sm:$0xff]  ;;  %v546_v12 = vld [vmem:[%s5900_s22 + $0x10] sm:$0xff] }
  0x25   : > { %v544_v9 = vld [vmem:[%s5900_s22] sm:$0xff]  ;;  %4973 = vmatmul.mubr.msk.f32.vlgmr.msra.gmra.mrb[0].mxu0 %vm468_vm1, %v458_v8  ;;  %v4847_v13 = vld [vmem:[%s5900_s22 + $0x88] sm:$0xff]  ;;  %v547_v14 = vld [vmem:[%s5900_s22 + $0x18] sm:$0xff] }
  0x26   : > { %4979 = vmatprep.mubr.msk.f32.mxu1 %vm468_vm1, %v544_v9  ;;  %v4846_v11 = vld [vmem:[%s5900_s22 + $0x80] sm:$0xff]  ;;  %5048 = vmatpush3.bf16.msra.mxu0 %v5041_v7  ;;  %v4848_v15 = vld [vmem:[%s5900_s22 + $0x90] sm:$0xff]  ;;  %v4849_v17 = vld [vmem:[%s5900_s22 + $0x98] sm:$0xff] }
  0x27   : > { %4980 = vmatmul.mubr.msk.f32.vlgmr.msra.gmra.mrb[0].mxu1 %vm468_vm1, %v545_v10  ;;  %5007 = vmatprep.mubr.msk.f32.mxu0 %vm468_vm1, %v4846_v11  ;;  %v548_v16 = vld [vmem:[%s5900_s22 + $0x20] sm:$0xff]  ;;  %v549_v18 = vld [vmem:[%s5900_s22 + $0x28] sm:$0xff]  ;;  %v550_v20 = vld [vmem:[%s5900_s22 + $0x30] sm:$0xff]  ;;  %s457_s16 = scalar_lea.vmem %s8718_s2, %s4825_s21 }
  0x28   : > { %4982 = vmatprep.mubr.msk.f32.mxu1 %vm468_vm1, %v546_v12  ;;  %5081 = vmatprep.subr.bf16.mxu0 %v5751_v3  ;;  %v4850_v19 = vld [vmem:[%s5900_s22 + $0xa0] sm:$0xff]  ;;  %v4851_v21 = vld [vmem:[%s5900_s22 + $0xa8] sm:$0xff]  ;;  %v551_v22 = vld [vmem:[%s5900_s22 + $0x38] sm:$0xff] }
  0x29   : > { %5008 = vmatmul.mubr.msk.f32.vlgmr.msra.gmra.mrb[2].mxu0 %vm468_vm1, %v4847_v13  ;;  %v4852_v23 = vld [vmem:[%s5900_s22 + $0xb0] sm:$0xff]  ;;  %v552_v24 = vld [vmem:[%s5900_s22 + $0x40] sm:$0xff]  ;;  %v4853_v25 = vld [vmem:[%s5900_s22 + $0xb8] sm:$0xff] }
  0x2a   : > { %5010 = vmatprep.mubr.msk.f32.mxu0 %vm468_vm1, %v4848_v15  ;;  %v553_v26 = vld [vmem:[%s5900_s22 + $0x48] sm:$0xff]  ;;  %v4854_v27 = vld [vmem:[%s5900_s22 + $0xc0] sm:$0xff]  ;;  %v554_v28 = vld [vmem:[%s5900_s22 + $0x50] sm:$0xff] }
  0x2b   : > { %4983 = vmatmul.mubr.msk.f32.gmra.mrb[2].mxu1 %vm468_vm1, %v547_v14  ;;  %v4855_v29 = vld [vmem:[%s5900_s22 + $0xc8] sm:$0xff]  ;;  %v555_v30 = vld [vmem:[%s5900_s22 + $0x58] sm:$0xff]  ;;  %v4856_v31 = vld [vmem:[%s5900_s22 + $0xd0] sm:$0xff] }
  0x2c   : > { %4985 = vmatprep.mubr.msk.f32.mxu1 %vm468_vm1, %v548_v16  ;;  %v556_v32 = vld [vmem:[%s5900_s22 + $0x60] sm:$0xff]  ;;  %v4857_v33 = vld [vmem:[%s5900_s22 + $0xd8] sm:$0xff]  ;;  %v557_v34 = vld [vmem:[%s5900_s22 + $0x68] sm:$0xff] }
  0x2d   : > { %5011 = vmatmul.mubr.msk.f32.gmra.mrb[4].mxu0 %vm468_vm1, %v4849_v17  ;;  %v4858_v35 = vld [vmem:[%s5900_s22 + $0xe0] sm:$0xff]  ;;  %v558_v36 = vld [vmem:[%s5900_s22 + $0x70] sm:$0xff]  ;;  %v4859_v37 = vld [vmem:[%s5900_s22 + $0xe8] sm:$0xff] }
  0x2e   : > { %5013 = vmatprep.mubr.msk.f32.mxu0 %vm468_vm1, %v4850_v19  ;;  %v559_v38 = vld [vmem:[%s5900_s22 + $0x78] sm:$0xff]  ;;  %v4860_v39 = vld [vmem:[%s5900_s22 + $0xf0] sm:$0xff] }
  0x2f   : > { %4986 = vmatmul.mubr.msk.f32.gmra.mrb[4].mxu1 %vm468_vm1, %v549_v18  ;;  %v4861_v40 = vld [vmem:[%s5900_s22 + $0xf8] sm:$0xff] }
  0x30   : > { %4988 = vmatprep.mubr.msk.f32.mxu1 %vm468_vm1, %v550_v20 }
  0x31   : > { %5014 = vmatmul.mubr.msk.f32.gmra.mrb[6].mxu0 %vm468_vm1, %v4851_v21 }
  0x32   : > { %5016 = vmatprep.mubr.msk.f32.mxu0 %vm468_vm1, %v4852_v23 }
  0x33   : > { %4989 = vmatmul.mubr.msk.f32.gmra.mrb[6].mxu1 %vm468_vm1, %v551_v22 }
  0x34   : > { %4991 = vmatprep.mubr.msk.f32.mxu1 %vm468_vm1, %v552_v24 }
  0x35   : > { %5017 = vmatmul.mubr.msk.f32.gmra.mrb[8].mxu0 %vm468_vm1, %v4853_v25 }
  0x36   : > { %5019 = vmatprep.mubr.msk.f32.mxu0 %vm468_vm1, %v4854_v27 }
  0x37   : > { %4992 = vmatmul.mubr.msk.f32.gmra.mrb[8].mxu1 %vm468_vm1, %v553_v26 }
  0x38   : > { %4994 = vmatprep.mubr.msk.f32.mxu1 %vm468_vm1, %v554_v28 }
  0x39   : > { %5020 = vmatmul.mubr.msk.f32.gmra.mrb[10].mxu0 %vm468_vm1, %v4855_v29 }
  0x3a   : > { %5022 = vmatprep.mubr.msk.f32.mxu0 %vm468_vm1, %v4856_v31 }
  0x3b   : > { %4995 = vmatmul.mubr.msk.f32.gmra.mrb[10].mxu1 %vm468_vm1, %v555_v30 }
  0x3c   : > { %4997 = vmatprep.mubr.msk.f32.mxu1 %vm468_vm1, %v556_v32 }
  0x3d   : > { %5023 = vmatmul.mubr.msk.f32.gmra.mrb[12].mxu0 %vm468_vm1, %v4857_v33 }
  0x3e   : > { %5025 = vmatprep.mubr.msk.f32.mxu0 %vm468_vm1, %v4858_v35 }
  0x3f   : > { %4998 = vmatmul.mubr.msk.f32.gmra.mrb[12].mxu1 %vm468_vm1, %v557_v34 }
  0x40   : > { %5000 = vmatprep.mubr.msk.f32.mxu1 %vm468_vm1, %v558_v36 }
  0x41   : > { %5026 = vmatmul.mubr.msk.f32.gmra.mrb[14].mxu0 %vm468_vm1, %v4859_v37 }
  0x42   : > { %5028 = vmatprep.mubr.msk.f32.mxu0 %vm468_vm1, %v4860_v39 }
  0x43   : > { %5001 = vmatmul.mubr.msk.f32.gmra.mrb[14].mxu1 %vm468_vm1, %v559_v38 }
  0x45   : > { %5029 = vmatmul.mubr.msk.f32.gmra.mrb[16].mxu0 %vm468_vm1, %v4861_v40 }
  0x46   : > { %5035 = vmatprep.mubr.msk.f32.mxu0 %vm5752_vm0, %v5753_v6  ;;  %vm1986_vm0 = vcmask 982912  }
  0xf8   : > { %v538_v48 = vpop.f32.mrb[0].mxu0 }
  0xf9   : > { %v539_v49 = vadd.f32 %v4826_v46, %v538_v48  ;;  %v4974_v50 = vpop.f32.mrb[1].mxu0 }
  0xfa   : > { %v4981_v51 = vpop.f32.mrb[0].mxu1 }
  0xfb   : > { %v683_v52 = vpop.f32.mrb[1].mxu1  ;;  %v763_v53 = vcombine.high %v539_v49, %v539_v49  ;;  %v770_v54 = vrot.slane %v539_v49, %v5976_v47  ;;  %v6015_v8 = vadd.f32 %v4981_v51, %v5989_v60 }
  0xfc   : > { %v5009_v56 = vpop.f32.mrb[2].mxu0  ;;  %v6000_v3 = vadd.f32 %v5989_v60, %v683_v52  ;;  %v6088_v52 = vld [vmem:[%s8648_s7] ss:$0 sm:$0xff] }
  0xfd   : > { %v5983_v57 = vrot.slane %v763_v53, %v5976_v47  ;;  %v778_v58 = vcombine.high %v770_v54, %v770_v54  ;;  %v786_v59 = vrot.slane %v770_v54, %v5976_v47  ;;  %v2704_v62 = vpop.f32.mrb[3].mxu0  ;;  %v6003_v4 = vadd.f32 %v5009_v56, %v5989_v60 }
  0xfe   : > { %v4984_v61 = vpop.f32.mrb[2].mxu1  ;;  %v6022_v12 = vadd.f32 %v5989_v60, %v2704_v62 }
  0xff   : > { %v693_v63 = vpop.f32.mrb[3].mxu1  ;;  %v779_v0 = vcombine.high %v5983_v57, %v5983_v57  ;;  %v5994_v1 = vrot.slane %v778_v58, %v5976_v47  ;;  %v5997_v2 = vrot.slane %v786_v59, %v5980_v55  ;;  %v808_v30 = vcombine.high %v786_v59, %v786_v59 }
 0x100   : > { %v6005_v5 = vpop.f32.mrb[4].mxu0  ;;  %v6032_v17 = vadd.f32 %v5989_v60, %v693_v63  ;;  %v6055_v31 = vadd.f32 %v4984_v61, %v5989_v60 }
 0x101   : > { %v6008_v6 = vrot.slane %v779_v0, %v5976_v47  ;;  %v6012_v7 = vrot.slane %v5994_v1, %v5980_v55  ;;  %v6019_v10 = vpop.f32.mrb[5].mxu0  ;;  %v852_v15 = vadd.f32 %v5997_v2, %v6000_v3  ;;  %v2784_v16 = vadd.f32 %v6003_v4, %v5997_v2 }
 0x102   : > { %v6017_v9 = vpop.f32.mrb[4].mxu1  ;;  %v853_v21 = vadd.f32 %v5997_v2, %v6015_v8  ;;  %v2783_v28 = vadd.f32 %v6022_v12, %v5997_v2  ;;  %v854_v38 = vadd.f32 %v5997_v2, %v6032_v17  ;;  %v6074_v42 = vrot.slane %v808_v30, %v5980_v55 }
 0x103   : > { %v703_v11 = vpop.f32.mrb[5].mxu1  ;;  %v868_v22 = vadd.f32 %v6012_v7, %v6000_v3  ;;  %5133 = vtanh.f32 %v852_v15  ;;  %v869_v26 = vadd.f32 %v6012_v7, %v6015_v8  ;;  %v2800_v40 = vadd.f32 %v6003_v4, %v6012_v7 }
 0x104   : > { %v6025_v13 = vadd.f32 %v5989_v60, %v703_v11  ;;  %v5015_v14 = vpop.f32.mrb[6].mxu0  ;;  %5135 = vtanh.f32 %v2784_v16  ;;  %v855_v53 = vadd.f32 %v5997_v2, %v6055_v31  ;;  %v870_v56 = vadd.f32 %v6012_v7, %v6032_v17 }
 0x105   : > { %v6035_v18 = vadd.f32 %v5015_v14, %v5989_v60  ;;  %v2724_v20 = vpop.f32.mrb[7].mxu0  ;;  %5137 = vtanh.f32 %v853_v21  ;;  %v885_v14 = vadd.f32 %v6074_v42, %v6015_v8  ;;  %v2799_v15 = vadd.f32 %v6022_v12, %v6012_v7 }
 0x106   : > { %v4990_v19 = vpop.f32.mrb[6].mxu1  ;;  %v6045_v24 = vadd.f32 %v5989_v60, %v2724_v20  ;;  %5139 = vtanh.f32 %v868_v22 }
 0x107   : > { %v6042_v23 = vadd.f32 %v4990_v19, %v5989_v60  ;;  %v713_v25 = vpop.f32.mrb[7].mxu1  ;;  %5141 = vtanh.f32 %v869_v26 }
 0x108   : > { %v6050_v27 = vadd.f32 %v5989_v60, %v713_v25  ;;  %v5018_v29 = vpop.f32.mrb[8].mxu0  ;;  %5143 = vtanh.f32 %v2783_v28 }
 0x109   : > { %v6058_v32 = vadd.f32 %v5018_v29, %v5989_v60  ;;  %v2734_v34 = vpop.f32.mrb[9].mxu0  ;;  %5145 = vtanh.f32 %v854_v38 }
 0x10a   : > { %v4993_v33 = vpop.f32.mrb[8].mxu1  ;;  %v6064_v36 = vadd.f32 %v5989_v60, %v2734_v34  ;;  %5147 = vtanh.f32 %v2800_v40 }
 0x10b   : > { %v6061_v35 = vadd.f32 %v4993_v33, %v5989_v60  ;;  %v723_v37 = vpop.f32.mrb[9].mxu1  ;;  %5149 = vtanh.f32 %v855_v53 }
 0x10c   : > { %v6069_v39 = vadd.f32 %v5989_v60, %v723_v37  ;;  %v5021_v41 = vpop.f32.mrb[10].mxu0  ;;  %5151 = vtanh.f32 %v870_v56 }
 0x10d   : > { %v6077_v44 = vadd.f32 %v5021_v41, %v5989_v60  ;;  %v2744_v48 = vpop.f32.mrb[11].mxu0  ;;  %v5134_v58 = vpop.eup %5133  ;;  %5153 = vtanh.f32 %v2799_v15  ;;  %v6141_v15 = vrot.slane %v5983_v57, %v5976_v47  ;;  %v871_v57 = vadd.f32 %v6012_v7, %v6055_v31 }
 0x10e   : > { %v4996_v46 = vpop.f32.mrb[10].mxu1  ;;  %v6083_v50 = vadd.f32 %v5989_v60, %v2744_v48  ;;  %v5136_v61 = vpop.eup %5135  ;;  %v1114_v0 = vmul.f32 %v5134_v58, %v6088_v52  ;;  %v2816_v48 = vadd.f32 %v6003_v4, %v6074_v42  ;;  %v884_v58 = vadd.f32 %v6074_v42, %v6000_v3 }
 0x10f   : > { %v6080_v49 = vadd.f32 %v4996_v46, %v5989_v60  ;;  %v733_v51 = vpop.f32.mrb[11].mxu1  ;;  %v5138_v16 = vpop.eup %5137  ;;  %v3040_v20 = vmul.f32 %v5136_v61, %v6088_v52  ;;  %5155 = vtanh.f32 %v885_v14  ;;  %v6148_v14 = vadd.f32 %v6005_v5, %v5989_v60 }
 0x110   : > { %v6093_v54 = vadd.f32 %v5989_v60, %v733_v51  ;;  %v5024_v59 = vpop.f32.mrb[12].mxu0  ;;  %v5140_v25 = vpop.eup %5139  ;;  %v1243_v26 = vsel %vm1242_vm2, %v1114_v0, 0.0  ;;  %v1115_v29 = vmul.f32 %v5138_v16, %v6088_v52  ;;  %5157 = vtanh.f32 %v884_v58 }
 0x111   : > { %v6098_v62 = vadd.f32 %v5024_v59, %v5989_v60  ;;  %v2754_v11 = vpop.f32.mrb[13].mxu0  ;;  %v5142_v30 = vpop.eup %5141  ;;  %1244 = vadd.xlane.f32.xlu0 %v1243_v26  ;;  %v3170_v33 = vsel %vm1242_vm2, %v3040_v20, 0.0  ;;  %v1130_v37 = vmul.f32 %v5140_v25, %v6088_v52  ;;  %5159 = vtanh.f32 %v2816_v48 }
 0x112   : > { %v4999_v63 = vpop.f32.mrb[12].mxu1  ;;  %v6110_v21 = vadd.f32 %v5989_v60, %v2754_v11  ;;  %v5144_v38 = vpop.eup %5143  ;;  %3171 = vadd.xlane.f32.xlu1 %v3170_v33  ;;  %v1246_v59 = vsel %vm1242_vm2, %v1115_v29, 0.0  ;;  %v1131_v20 = vmul.f32 %v5142_v30, %v6088_v52  ;;  %v2815_v30 = vadd.f32 %v6022_v12, %v6074_v42 }
 0x113   : > { %v6106_v19 = vadd.f32 %v4999_v63, %v5989_v60  ;;  %v743_v22 = vpop.f32.mrb[13].mxu1  ;;  %v3039_v63 = vmul.f32 %v5144_v38, %v6088_v52  ;;  %v5146_v0 = vpop.eup %5145  ;;  %v1291_v11 = vsel %vm1242_vm2, %v1130_v37, 0.0  ;;  %v2786_v58 = vadd.f32 %v6148_v14, %v5997_v2 }
 0x114   : > { %v6114_v28 = vadd.f32 %v5989_v60, %v743_v22  ;;  %v5027_v34 = vpop.f32.mrb[14].mxu0  ;;  %v5148_v22 = vpop.eup %5147  ;;  %v1116_v47 = vmul.f32 %v5146_v0, %v6088_v52  ;;  %v1294_v37 = vsel %vm1242_vm2, %v1131_v20, 0.0  ;;  %5161 = vtanh.f32 %v2815_v30 }
 0x115   : > { %8675 = vst [vmem:[#allocation11_spill] sm:$0xff] %v6106_v19  ;;  %v6120_v40 = vadd.f32 %v5027_v34, %v5989_v60  ;;  %v2764_v46 = vpop.f32.mrb[15].mxu0  ;;  %1247 = vadd.xlane.f32.xlu0 %v1246_v59  ;;  %v3167_v33 = vsel %vm1242_vm2, %v3039_v63, 0.0  ;;  %v5150_v34 = vpop.eup %5149  ;;  %v3056_v5 = vmul.f32 %v5148_v22, %v6088_v52  ;;  %5163 = vtanh.f32 %v871_v57 }
 0x116   : > { %v5002_v41 = vpop.f32.mrb[14].mxu1  ;;  %v6128_v53 = vadd.f32 %v5989_v60, %v2764_v46  ;;  %1292 = vadd.xlane.f32.xlu1 %v1291_v11  ;;  %v5152_v38 = vpop.eup %5151  ;;  %v886_v46 = vadd.f32 %v6074_v42, %v6032_v17  ;;  %v1249_v48 = vsel %vm1242_vm2, %v1116_v47, 0.0 }
 0x117   : > { %8676 = vst [vmem:[#allocation12_spill] sm:$0xff] %v6120_v40  ;;  %v6125_v51 = vadd.f32 %v5002_v41, %v5989_v60  ;;  %v753_v56 = vpop.f32.mrb[15].mxu1  ;;  %v6163_v41 = vrot.slane %v6141_v15, %v5980_v55  ;;  %v5154_v59 = vpop.eup %5153  ;;  %v3218_v63 = vsel %vm1242_vm2, %v3056_v5, 0.0  ;;  %v1132_v0 = vmul.f32 %v5152_v38, %v6088_v52 }
 0x118   : > { %v6134_v61 = vadd.f32 %v5989_v60, %v753_v56  ;;  %v5030_v16 = vpop.f32.mrb[16].mxu0  ;;  %v1117_v56 = vmul.f32 %v5150_v34, %v6088_v52  ;;  %5165 = vtanh.f32 %v886_v46  ;;  %v3055_v22 = vmul.f32 %v5154_v59, %v6088_v52 }
 0x119   : > { %8677 = vst [vmem:[#allocation13_spill] sm:$0xff] %v6125_v51  ;;  %v6144_v25 = vadd.f32 %v5030_v16, %v5989_v60  ;;  %v2774_v26 = vpop.f32.mrb[17].mxu0  ;;  %3168 = vadd.xlane.f32.xlu0 %v3167_v33  ;;  %v5156_v11 = vpop.eup %5155  ;;  %v2802_v16 = vadd.f32 %v6148_v14, %v6012_v7  ;;  %5167 = vtanh.f32 %v2786_v58  ;;  %v1297_v33 = vsel %vm1242_vm2, %v1132_v0, 0.0 }
 0x11a   : > { %8678 = vst [vmem:[#allocation14_spill] sm:$0xff] %v6134_v61  ;;  %v6151_v29 = vadd.f32 %v5989_v60, %v2774_v26  ;;  %1295 = vadd.xlane.f32.xlu1 %v1294_v37  ;;  %v1252_v20 = vsel %vm1242_vm2, %v1117_v56, 0.0  ;;  %v917_v26 = vadd.f32 %v6163_v41, %v6015_v8  ;;  %v5158_v30 = vpop.eup %5157  ;;  %v1147_v47 = vmul.f32 %v5156_v11, %v6088_v52 }
 0x11b   : > { %8679 = vst [vmem:[#allocation15_spill] sm:$0xff] %v6144_v25  ;;  %v5160_v57 = vpop.eup %5159  ;;  %v6183_v34 = vadd.f32 %v5989_v60, %v6019_v10  ;;  %5169 = vtanh.f32 %v2802_v16  ;;  %v887_v37 = vadd.f32 %v6074_v42, %v6055_v31  ;;  %v3215_v5 = vsel %vm1242_vm2, %v3055_v22, 0.0 }
 0x11c   : > { %8680 = vst [vmem:[#allocation16_spill] sm:$0xff] %v6151_v29  ;;  %v1146_v38 = vmul.f32 %v5158_v30, %v6088_v52  ;;  %5171 = vtanh.f32 %v917_v26  ;;  %v2848_v46 = vadd.f32 %v6003_v4, %v6163_v41  ;;  %v1342_v56 = vsel %vm1242_vm2, %v1147_v47, 0.0 }
 0x11d   : > { %1250 = vadd.xlane.f32.xlu0 %v1249_v48  ;;  %v3072_v58 = vmul.f32 %v5160_v57, %v6088_v52  ;;  %5173 = vtanh.f32 %v887_v37  ;;  %v916_v59 = vadd.f32 %v6163_v41, %v6000_v3  ;;  %v2801_v11 = vadd.f32 %v6183_v34, %v6012_v7 }
 0x11e   : > { %3219 = vadd.xlane.f32.xlu1 %v3218_v63  ;;  %v5162_v48 = vpop.eup %5161  ;;  %v1339_v63 = vsel %vm1242_vm2, %v1146_v38, 0.0  ;;  %5175 = vtanh.f32 %v2848_v46  ;;  %v6203_v30 = vadd.f32 %v6017_v9, %v5989_v60  ;;  %v2817_v37 = vadd.f32 %v6183_v34, %v6074_v42 }
 0x11f   : > { %v5164_v10 = vpop.eup %5163  ;;  %v3071_v0 = vmul.f32 %v5162_v48, %v6088_v52  ;;  %5177 = vtanh.f32 %v916_v59  ;;  %v810_v9 = vcombine.high %v5994_v1, %v5994_v1  ;;  %v2847_v48 = vadd.f32 %v6022_v12, %v6163_v41 }
 0x120   : > { %v1133_v22 = vmul.f32 %v5164_v10, %v6088_v52  ;;  %5179 = vtanh.f32 %v2801_v11  ;;  %v873_v10 = vadd.f32 %v6012_v7, %v6203_v30 }
 0x121   : > { %1253 = vadd.xlane.f32.xlu0 %v1252_v20  ;;  %v3266_v20 = vsel %vm1242_vm2, %v3072_v58, 0.0  ;;  %v3263_v47 = vsel %vm1242_vm2, %v3071_v0, 0.0  ;;  %v6224_v1 = vrot.slane %v810_v9, %v5980_v55 }
 0x122   : > { %1298 = vadd.xlane.f32.xlu1 %v1297_v33  ;;  %v5166_v16 = vpop.eup %5165  ;;  %v2818_v33 = vadd.f32 %v6148_v14, %v6074_v42  ;;  %v1300_v38 = vsel %vm1242_vm2, %v1133_v22, 0.0 }
 0x123   : > { %v5168_v26 = vpop.eup %5167  ;;  %v1148_v57 = vmul.f32 %v5166_v16, %v6088_v52  ;;  %v918_v16 = vadd.f32 %v6163_v41, %v6032_v17 }
 0x124   : > { %v3042_v46 = vmul.f32 %v5168_v26, %v6088_v52  ;;  %5181 = vtanh.f32 %v2818_v33  ;;  %v2849_v26 = vadd.f32 %v6183_v34, %v6163_v41 }
 0x125   : > { %3216 = vadd.xlane.f32.xlu0 %v3215_v5  ;;  %v5170_v5 = vpop.eup %5169  ;;  %5183 = vtanh.f32 %v2817_v37 }
 0x126   : > { %1343 = vadd.xlane.f32.xlu1 %v1342_v56  ;;  %v5172_v60 = vpop.eup %5171  ;;  %v1345_v56 = vsel %vm1242_vm2, %v1148_v57, 0.0  ;;  %v3058_v58 = vmul.f32 %v5170_v5, %v6088_v52  ;;  %5185 = vtanh.f32 %v2847_v48  ;;  %v919_v5 = vadd.f32 %v6163_v41, %v6055_v31 }
 0x127   : > { %v5174_v59 = vpop.eup %5173  ;;  %v1179_v0 = vmul.f32 %v5172_v60, %v6088_v52  ;;  %5187 = vtanh.f32 %v873_v10  ;;  %v900_v60 = vadd.f32 %v6224_v1, %v6000_v3  ;;  %v2850_v10 = vadd.f32 %v6148_v14, %v6163_v41 }
 0x128   : > { %v5176_v11 = vpop.eup %5175  ;;  %v1149_v22 = vmul.f32 %v5174_v59, %v6088_v52  ;;  %5189 = vtanh.f32 %v918_v16 }
 0x129   : > { %1340 = vadd.xlane.f32.xlu0 %v1339_v63  ;;  %v3176_v63 = vsel %vm1242_vm2, %v3042_v46, 0.0  ;;  %v5178_v33 = vpop.eup %5177  ;;  %v3104_v57 = vmul.f32 %v5176_v11, %v6088_v52  ;;  %5191 = vtanh.f32 %v2849_v26  ;;  %v2785_v26 = vadd.f32 %v6183_v34, %v5997_v2 }
 0x12a   : > { %3267 = vadd.xlane.f32.xlu1 %v3266_v20  ;;  %v3224_v20 = vsel %vm1242_vm2, %v3058_v58, 0.0  ;;  %v5180_v37 = vpop.eup %5179  ;;  %v1178_v46 = vmul.f32 %v5178_v33, %v6088_v52  ;;  %5193 = vtanh.f32 %v919_v5 }
 0x12b   : > { %v3362_v48 = vsel %vm1242_vm2, %v3104_v57, 0.0  ;;  %5195 = vtanh.f32 %v900_v60  ;;  %v872_v57 = vadd.f32 %v6012_v7, %v6025_v13  ;;  %v857_v60 = vadd.f32 %v5997_v2, %v6203_v30 }
 0x12c   : > { %v1435_v59 = vsel %vm1242_vm2, %v1178_v46, 0.0  ;;  %5197 = vtanh.f32 %v2850_v10 }
 0x12d   : > { %3264 = vadd.xlane.f32.xlu0 %v3263_v47  ;;  %v1438_v47 = vsel %vm1242_vm2, %v1179_v0, 0.0  ;;  %v2832_v0 = vadd.f32 %v6003_v4, %v6224_v1 }
 0x12e   : > { %1301 = vadd.xlane.f32.xlu1 %v1300_v38  ;;  %v1348_v38 = vsel %vm1242_vm2, %v1149_v22, 0.0  ;;  %v5182_v9 = vpop.eup %5181 }
 0x12f   : > { %v5184_v58 = vpop.eup %5183  ;;  %5199 = vtanh.f32 %v2832_v0  ;;  %v889_v0 = vadd.f32 %v6074_v42, %v6203_v30 }
 0x130   : > { %v5186_v11 = vpop.eup %5185  ;;  %5201 = vtanh.f32 %v2785_v26 }
 0x131   : > { %1346 = vadd.xlane.f32.xlu0 %v1345_v56  ;;  %v3057_v56 = vmul.f32 %v5180_v37, %v6088_v52  ;;  %v5188_v22 = vpop.eup %5187  ;;  %5203 = vtanh.f32 %v872_v57  ;;  %v6276_v57 = vrot.slane %v6008_v6, %v5980_v55 }
 0x132   : > { %3177 = vadd.xlane.f32.xlu1 %v3176_v63  ;;  %v3074_v63 = vmul.f32 %v5182_v9, %v6088_v52  ;;  %v5190_v37 = vpop.eup %5189  ;;  %5205 = vtanh.f32 %v857_v60 }
 0x133   : > { %v3221_v16 = vsel %vm1242_vm2, %v3057_v56, 0.0  ;;  %v5192_v46 = vpop.eup %5191  ;;  %v902_v56 = vadd.f32 %v6224_v1, %v6032_v17 }
 0x134   : > { %v3272_v33 = vsel %vm1242_vm2, %v3074_v63, 0.0 }
 0x135   : > { %3225 = vadd.xlane.f32.xlu0 %v3224_v20  ;;  %v3073_v20 = vmul.f32 %v5184_v58, %v6088_v52  ;;  %v5194_v58 = vpop.eup %5193  ;;  %5207 = vtanh.f32 %v902_v56 }
 0x136   : > { %1439 = vadd.xlane.f32.xlu1 %v1438_v47  ;;  %v3103_v47 = vmul.f32 %v5186_v11, %v6088_v52  ;;  %v5196_v63 = vpop.eup %5195  ;;  %5209 = vtanh.f32 %v889_v0 }
 0x137   : > { %v3269_v5 = vsel %vm1242_vm2, %v3073_v20, 0.0  ;;  %v2833_v20 = vadd.f32 %v6183_v34, %v6224_v1 }
 0x138   : > { %v3359_v9 = vsel %vm1242_vm2, %v3103_v47, 0.0 }
 0x139   : > { %1349 = vadd.xlane.f32.xlu0 %v1348_v38  ;;  %v1135_v38 = vmul.f32 %v5188_v22, %v6088_v52  ;;  %v5198_v22 = vpop.eup %5197  ;;  %5211 = vtanh.f32 %v2833_v20 }
 0x13a   : > { %3363 = vadd.xlane.f32.xlu1 %v3362_v48  ;;  %v1180_v48 = vmul.f32 %v5190_v37, %v6088_v52  ;;  %v5200_v47 = vpop.eup %5199  ;;  %v921_v37 = vadd.f32 %v6163_v41, %v6203_v30 }
 0x13b   : > { %v1306_v10 = vsel %vm1242_vm2, %v1135_v38, 0.0  ;;  %v3106_v38 = vmul.f32 %v5198_v22, %v6088_v52  ;;  %v5202_v60 = vpop.eup %5201  ;;  %v2831_v22 = vadd.f32 %v6022_v12, %v6224_v1 }
 0x13c   : > { %v1441_v11 = vsel %vm1242_vm2, %v1180_v48, 0.0  ;;  %v3088_v48 = vmul.f32 %v5200_v47, %v6088_v52  ;;  %v5204_v56 = vpop.eup %5203  ;;  %5213 = vtanh.f32 %v921_v37  ;;  %v2864_v47 = vadd.f32 %v6003_v4, %v6276_v57 }
 0x13d   : > { %1436 = vadd.xlane.f32.xlu0 %v1435_v59  ;;  %v3105_v59 = vmul.f32 %v5192_v46, %v6088_v52  ;;  %v903_v46 = vadd.f32 %v6224_v1, %v6055_v31  ;;  %v5206_v0 = vpop.eup %5205 }
 0x13e   : > { %3222 = vadd.xlane.f32.xlu1 %v3221_v16  ;;  %v1181_v16 = vmul.f32 %v5194_v58, %v6088_v52  ;;  %v901_v58 = vadd.f32 %v6224_v1, %v6015_v8 }
 0x13f   : > { %v3365_v26 = vsel %vm1242_vm2, %v3105_v59, 0.0  ;;  %v3041_v59 = vmul.f32 %v5202_v60, %v6088_v52  ;;  %5215 = vtanh.f32 %v903_v46  ;;  %v5208_v20 = vpop.eup %5207  ;;  %v809_v60 = vcombine.high %v6141_v15, %v6141_v15 }
 0x140   : > { %5217 = vtanh.f32 %v901_v58  ;;  %v5210_v37 = vpop.eup %5209  ;;  %v904_v58 = vadd.f32 %v6224_v1, %v6025_v13 }
 0x141   : > { %3273 = vadd.xlane.f32.xlu0 %v3272_v33  ;;  %v1162_v33 = vmul.f32 %v5196_v63, %v6088_v52  ;;  %v932_v63 = vadd.f32 %v6276_v57, %v6000_v3  ;;  %v6313_v15 = vrot.slane %v809_v60, %v5980_v55 }
 0x142   : > { %3270 = vadd.xlane.f32.xlu1 %v3269_v5  ;;  %v1444_v5 = vsel %vm1242_vm2, %v1181_v16, 0.0  ;;  %v1134_v16 = vmul.f32 %v5204_v56, %v6088_v52  ;;  %v1151_v56 = vmul.f32 %v5210_v37, %v6088_v52 }
 0x143   : > { %5219 = vtanh.f32 %v932_v63  ;;  %v5212_v46 = vpop.eup %5211  ;;  %v949_v60 = vadd.f32 %v6313_v15, %v6015_v8 }
 0x144   : > { %5221 = vtanh.f32 %v2831_v22  ;;  %v3089_v63 = vmul.f32 %v5212_v46, %v6088_v52  ;;  %v934_v22 = vadd.f32 %v6276_v57, %v6032_v17 }
 0x145   : > { %3360 = vadd.xlane.f32.xlu0 %v3359_v9  ;;  %v1387_v9 = vsel %vm1242_vm2, %v1162_v33, 0.0  ;;  %v1119_v33 = vmul.f32 %v5206_v0, %v6088_v52  ;;  %5223 = vtanh.f32 %v2864_v47 }
 0x146   : > { %1307 = vadd.xlane.f32.xlu1 %v1306_v10  ;;  %v3368_v10 = vsel %vm1242_vm2, %v3106_v38, 0.0  ;;  %v1164_v38 = vmul.f32 %v5208_v20, %v6088_v52 }
 0x149   : > { %1442 = vadd.xlane.f32.xlu0 %v1441_v11  ;;  %v3314_v11 = vsel %vm1242_vm2, %v3088_v48, 0.0  ;;  %v1258_v48 = vsel %vm1242_vm2, %v1119_v33, 0.0  ;;  %v3317_v33 = vsel %vm1242_vm2, %v3089_v63, 0.0 }
 0x14a   : > { %3366 = vadd.xlane.f32.xlu1 %v3365_v26  ;;  %v3173_v26 = vsel %vm1242_vm2, %v3041_v59, 0.0  ;;  %v1393_v59 = vsel %vm1242_vm2, %v1164_v38, 0.0 }
 0x14d   : > { %1445 = vadd.xlane.f32.xlu0 %v1444_v5  ;;  %v1303_v5 = vsel %vm1242_vm2, %v1134_v16, 0.0  ;;  %v1354_v16 = vsel %vm1242_vm2, %v1151_v56, 0.0 }
 0x14e   : > { %1388 = vadd.xlane.f32.xlu1 %v1387_v9  ;;  %v856_v9 = vadd.f32 %v5997_v2, %v6025_v13 }
 0x150   : > { %5225 = vtanh.f32 %v856_v9 }
 0x151   : > { %3369 = vadd.xlane.f32.xlu0 %v3368_v10  ;;  %v5214_v10 = vpop.eup %5213  ;;  %5227 = vtanh.f32 %v904_v58 }
 0x152   : > { %3315 = vadd.xlane.f32.xlu1 %v3314_v11  ;;  %v5216_v0 = vpop.eup %5215  ;;  %v888_v11 = vadd.f32 %v6074_v42, %v6025_v13  ;;  %v1183_v20 = vmul.f32 %v5214_v10, %v6088_v52  ;;  %v2834_v10 = vadd.f32 %v6148_v14, %v6224_v1 }
 0x153   : > { %v1165_v47 = vmul.f32 %v5216_v0, %v6088_v52  ;;  %v2865_v0 = vadd.f32 %v6183_v34, %v6276_v57 }
 0x154   : > { %5229 = vtanh.f32 %v888_v11  ;;  %v1450_v38 = vsel %vm1242_vm2, %v1183_v20, 0.0 }
 0x155   : > { %3174 = vadd.xlane.f32.xlu0 %v3173_v26  ;;  %v5218_v26 = vpop.eup %5217  ;;  %5231 = vtanh.f32 %v934_v22 }
 0x156   : > { %1304 = vadd.xlane.f32.xlu1 %v1303_v5  ;;  %v5220_v37 = vpop.eup %5219  ;;  %v933_v5 = vadd.f32 %v6276_v57, %v6015_v8  ;;  %v1163_v46 = vmul.f32 %v5218_v26, %v6088_v52  ;;  %v2863_v26 = vadd.f32 %v6022_v12, %v6276_v57 }
 0x157   : > { %v5222_v9 = vpop.eup %5221  ;;  %v1194_v56 = vmul.f32 %v5220_v37, %v6088_v52  ;;  %v2880_v37 = vadd.f32 %v6003_v4, %v6313_v15 }
 0x158   : > { %v5224_v58 = vpop.eup %5223  ;;  %5233 = vtanh.f32 %v933_v5  ;;  %v3087_v63 = vmul.f32 %v5222_v9, %v6088_v52  ;;  %v948_v9 = vadd.f32 %v6313_v15, %v6000_v3 }
 0x159   : > { %1259 = vadd.xlane.f32.xlu0 %v1258_v48  ;;  %v1396_v48 = vsel %vm1242_vm2, %v1165_v47, 0.0  ;;  %5235 = vtanh.f32 %v949_v60  ;;  %v3120_v20 = vmul.f32 %v5224_v58, %v6088_v52  ;;  %v905_v58 = vadd.f32 %v6224_v1, %v6203_v30 }
 0x15a   : > { %1394 = vadd.xlane.f32.xlu1 %v1393_v59  ;;  %v1390_v59 = vsel %vm1242_vm2, %v1163_v46, 0.0  ;;  %v5226_v11 = vpop.eup %5225  ;;  %5237 = vtanh.f32 %v2834_v10 }
 0x15b   : > { %v5228_v22 = vpop.eup %5227  ;;  %v1118_v47 = vmul.f32 %v5226_v11, %v6088_v52  ;;  %5239 = vtanh.f32 %v2865_v0  ;;  %v2879_v11 = vadd.f32 %v6022_v12, %v6313_v15 }
 0x15c   : > { %v1166_v46 = vmul.f32 %v5228_v22, %v6088_v52  ;;  %5241 = vtanh.f32 %v2863_v26  ;;  %v935_v22 = vadd.f32 %v6276_v57, %v6055_v31 }
 0x15d   : > { %1355 = vadd.xlane.f32.xlu0 %v1354_v16  ;;  %v1483_v16 = vsel %vm1242_vm2, %v1194_v56, 0.0  ;;  %5243 = vtanh.f32 %v2880_v37 }
 0x15e   : > { %3318 = vadd.xlane.f32.xlu1 %v3317_v33  ;;  %v3311_v33 = vsel %vm1242_vm2, %v3087_v63, 0.0  ;;  %v5230_v5 = vpop.eup %5229  ;;  %5245 = vtanh.f32 %v948_v9 }
 0x15f   : > { %v5232_v60 = vpop.eup %5231  ;;  %v1150_v56 = vmul.f32 %v5230_v5, %v6088_v52  ;;  %5247 = vtanh.f32 %v905_v58  ;;  %v920_v5 = vadd.f32 %v6163_v41, %v6025_v13 }
 0x160   : > { %v1196_v63 = vmul.f32 %v5232_v60, %v6088_v52  ;;  %5249 = vtanh.f32 %v2879_v11  ;;  %v2881_v60 = vadd.f32 %v6183_v34, %v6313_v15 }
 0x161   : > { %1451 = vadd.xlane.f32.xlu0 %v1450_v38  ;;  %v3410_v38 = vsel %vm1242_vm2, %v3120_v20, 0.0  ;;  %5251 = vtanh.f32 %v935_v22 }
 0x162   : > { %1397 = vadd.xlane.f32.xlu1 %v1396_v48  ;;  %v1255_v48 = vsel %vm1242_vm2, %v1118_v47, 0.0  ;;  %v5234_v10 = vpop.eup %5233  ;;  %5253 = vtanh.f32 %v920_v5  ;;  %v937_v5 = vadd.f32 %v6276_v57, %v6203_v30 }
 0x163   : > { %v5236_v0 = vpop.eup %5235  ;;  %v1195_v20 = vmul.f32 %v5234_v10, %v6088_v52  ;;  %v950_v10 = vadd.f32 %v6313_v15, %v6032_v17  ;;  %5255 = vtanh.f32 %v2881_v60 }
 0x164   : > { %v5238_v26 = vpop.eup %5237  ;;  %v1211_v47 = vmul.f32 %v5236_v0, %v6088_v52  ;;  %v936_v0 = vadd.f32 %v6276_v57, %v6025_v13 }
 0x165   : > { %1391 = vadd.xlane.f32.xlu0 %v1390_v59  ;;  %v1399_v59 = vsel %vm1242_vm2, %v1166_v46, 0.0  ;;  %v5240_v37 = vpop.eup %5239  ;;  %v3090_v46 = vmul.f32 %v5238_v26, %v6088_v52  ;;  %v811_v26 = vcombine.high %v6008_v6, %v6008_v6  ;;  %5257 = vtanh.f32 %v950_v10 }
 0x166   : > { %1484 = vadd.xlane.f32.xlu1 %v1483_v16  ;;  %v1351_v16 = vsel %vm1242_vm2, %v1150_v56, 0.0  ;;  %v5242_v9 = vpop.eup %5241  ;;  %v3121_v56 = vmul.f32 %v5240_v37, %v6088_v52  ;;  %5259 = vtanh.f32 %v936_v0  ;;  %v2788_v10 = vadd.f32 %v6035_v18, %v5997_v2 }
 0x167   : > { %v5244_v58 = vpop.eup %5243  ;;  %v6390_v6 = vrot.slane %v811_v26, %v5980_v55 }
 0x168   : > { %v5246_v11 = vpop.eup %5245 }
 0x169   : > { %3312 = vadd.xlane.f32.xlu0 %v3311_v33  ;;  %v1489_v33 = vsel %vm1242_vm2, %v1196_v63, 0.0  ;;  %v3119_v63 = vmul.f32 %v5242_v9, %v6088_v52  ;;  %v5248_v22 = vpop.eup %5247  ;;  %v1210_v37 = vmul.f32 %v5246_v11, %v6088_v52  ;;  %v964_v26 = vadd.f32 %v6390_v6, %v6000_v3 }
 0x16a   : > { %3411 = vadd.xlane.f32.xlu1 %v3410_v38  ;;  %v1486_v38 = vsel %vm1242_vm2, %v1195_v20, 0.0  ;;  %v3136_v20 = vmul.f32 %v5244_v58, %v6088_v52  ;;  %v1167_v60 = vmul.f32 %v5248_v22, %v6088_v52  ;;  %v2896_v3 = vadd.f32 %v6003_v4, %v6390_v6 }
 0x16b   : > { %v966_v4 = vadd.f32 %v6390_v6, %v6032_v17 }
 0x16d   : > { %1256 = vadd.xlane.f32.xlu0 %v1255_v48  ;;  %v1534_v48 = vsel %vm1242_vm2, %v1211_v47, 0.0  ;;  %v3407_v47 = vsel %vm1242_vm2, %v3119_v63, 0.0  ;;  %v1402_v63 = vsel %vm1242_vm2, %v1167_v60, 0.0 }
 0x16e   : > { %1400 = vadd.xlane.f32.xlu1 %v1399_v59  ;;  %v3320_v59 = vsel %vm1242_vm2, %v3090_v46, 0.0  ;;  %v3458_v46 = vsel %vm1242_vm2, %v3136_v20, 0.0 }
 0x171   : > { %1352 = vadd.xlane.f32.xlu0 %v1351_v16  ;;  %v3413_v16 = vsel %vm1242_vm2, %v3121_v56, 0.0  ;;  %v1531_v56 = vsel %vm1242_vm2, %v1210_v37, 0.0 }
 0x172   : > { %1490 = vadd.xlane.f32.xlu1 %v1489_v33  ;;  %v2866_v33 = vadd.f32 %v6148_v14, %v6276_v57 }
 0x174   : > { %5261 = vtanh.f32 %v2866_v33 }
 0x175   : > { %1487 = vadd.xlane.f32.xlu0 %v1486_v38  ;;  %v5250_v38 = vpop.eup %5249  ;;  %5263 = vtanh.f32 %v937_v5 }
 0x176   : > { %1535 = vadd.xlane.f32.xlu1 %v1534_v48  ;;  %v5252_v9 = vpop.eup %5251  ;;  %v951_v48 = vadd.f32 %v6313_v15, %v6055_v31  ;;  %v3135_v58 = vmul.f32 %v5250_v38, %v6088_v52  ;;  %v952_v38 = vadd.f32 %v6313_v15, %v6025_v13 }
 0x177   : > { %v1197_v0 = vmul.f32 %v5252_v9, %v6088_v52 }
 0x178   : > { %5265 = vtanh.f32 %v951_v48  ;;  %v3455_v20 = vsel %vm1242_vm2, %v3135_v58, 0.0 }
 0x179   : > { %3321 = vadd.xlane.f32.xlu0 %v3320_v59  ;;  %v5254_v59 = vpop.eup %5253  ;;  %5267 = vtanh.f32 %v2788_v10  ;;  %v953_v10 = vadd.f32 %v6313_v15, %v6203_v30 }
 0x17a   : > { %3414 = vadd.xlane.f32.xlu1 %v3413_v16  ;;  %v5256_v11 = vpop.eup %5255  ;;  %v2882_v16 = vadd.f32 %v6148_v14, %v6313_v15  ;;  %v1182_v22 = vmul.f32 %v5254_v59, %v6088_v52 }
 0x17b   : > { %v5258_v33 = vpop.eup %5257  ;;  %v3137_v37 = vmul.f32 %v5256_v11, %v6088_v52 }
 0x17c   : > { %v5260_v5 = vpop.eup %5259  ;;  %5269 = vtanh.f32 %v2882_v16  ;;  %v1212_v60 = vmul.f32 %v5258_v33, %v6088_v52 }
 0x17d   : > { %3408 = vadd.xlane.f32.xlu0 %v3407_v47  ;;  %v1492_v47 = vsel %vm1242_vm2, %v1197_v0, 0.0  ;;  %5271 = vtanh.f32 %v964_v26  ;;  %v3461_v48 = vsel %vm1242_vm2, %v3137_v37, 0.0  ;;  %v2804_v26 = vadd.f32 %v6035_v18, %v6012_v7 }
 0x17e   : > { %3459 = vadd.xlane.f32.xlu1 %v3458_v46  ;;  %v1447_v46 = vsel %vm1242_vm2, %v1182_v22, 0.0  ;;  %v5262_v9 = vpop.eup %5261  ;;  %5273 = vtanh.f32 %v952_v38  ;;  %v1537_v59 = vsel %vm1242_vm2, %v1212_v60, 0.0  ;;  %v2897_v22 = vadd.f32 %v6183_v34, %v6390_v6 }
 0x17f   : > { %v5264_v58 = vpop.eup %5263  ;;  %5275 = vtanh.f32 %v2896_v3  ;;  %v2820_v34 = vadd.f32 %v6035_v18, %v6074_v42  ;;  %v967_v3 = vadd.f32 %v6390_v6, %v6055_v31  ;;  %v2868_v31 = vadd.f32 %v6035_v18, %v6276_v57 }
 0x180   : > { %v1199_v16 = vmul.f32 %v5264_v58, %v6088_v52  ;;  %5277 = vtanh.f32 %v953_v10  ;;  %v965_v10 = vadd.f32 %v6390_v6, %v6015_v8  ;;  %v2836_v8 = vadd.f32 %v6035_v18, %v6224_v1 }
 0x181   : > { %1532 = vadd.xlane.f32.xlu0 %v1531_v56  ;;  %v1198_v56 = vmul.f32 %v5260_v5, %v6088_v52  ;;  %5279 = vtanh.f32 %v966_v4 }
 0x182   : > { %1403 = vadd.xlane.f32.xlu1 %v1402_v63  ;;  %v3122_v63 = vmul.f32 %v5262_v9, %v6088_v52  ;;  %v5266_v0 = vpop.eup %5265  ;;  %v1498_v37 = vsel %vm1242_vm2, %v1199_v16, 0.0  ;;  %5281 = vtanh.f32 %v2897_v22 }
 0x183   : > { %v1495_v11 = vsel %vm1242_vm2, %v1198_v56, 0.0  ;;  %5283 = vtanh.f32 %v2804_v26 }
 0x184   : > { %v3416_v33 = vsel %vm1242_vm2, %v3122_v63, 0.0  ;;  %5285 = vtanh.f32 %v2820_v34 }
 0x185   : > { %3456 = vadd.xlane.f32.xlu0 %v3455_v20  ;;  %v5268_v20 = vpop.eup %5267  ;;  %5287 = vtanh.f32 %v967_v3 }
 0x186   : > { %1493 = vadd.xlane.f32.xlu1 %v1492_v47  ;;  %v1213_v47 = vmul.f32 %v5266_v0, %v6088_v52  ;;  %v5270_v17 = vpop.eup %5269  ;;  %v3044_v5 = vmul.f32 %v5268_v20, %v6088_v52  ;;  %v6449_v20 = vand.u32 127, %v767_v43  ;;  %5289 = vtanh.f32 %v965_v10 }
 0x187   : > { %v5272_v38 = vpop.eup %5271  ;;  %v3138_v60 = vmul.f32 %v5270_v17, %v6088_v52  ;;  %5291 = vtanh.f32 %v2868_v31 }
 0x188   : > { %v5274_v9 = vpop.eup %5273  ;;  %v1226_v56 = vmul.f32 %v5272_v38, %v6088_v52  ;;  %8681 = vst [vmem:[#allocation17_spill] sm:$0xff] %v6449_v20  ;;  %v1890_v34 = vadd.s32 4294967288, %v6449_v20  ;;  %5293 = vtanh.f32 %v2836_v8  ;;  %v1897_v31 = vadd.s32 4294967280, %v6449_v20 }
 0x189   : > { %1448 = vadd.xlane.f32.xlu0 %v1447_v46  ;;  %v1540_v46 = vsel %vm1242_vm2, %v1213_v47, 0.0  ;;  %v5276_v58 = vpop.eup %5275  ;;  %v1214_v63 = vmul.f32 %v5274_v9, %v6088_v52  ;;  %v2898_v47 = vadd.f32 %v6148_v14, %v6390_v6  ;;  %v2895_v14 = vadd.f32 %v6022_v12, %v6390_v6 }
 0x18a   : > { %3462 = vadd.xlane.f32.xlu1 %v3461_v48  ;;  %v3182_v48 = vsel %vm1242_vm2, %v3044_v5, 0.0  ;;  %v5278_v4 = vpop.eup %5277  ;;  %v1579_v0 = vsel %vm1242_vm2, %v1226_v56, 0.0  ;;  %v6459_v5 = vstv %s543_s20  ;;  %v6476_v12 = vsub.s32 %v1890_v34, %v5970_v45  ;;  %s8561_s20 = sand.u32 1, %s5741_s24  }
 0x18b   : > { %v5280_v16 = vpop.eup %5279  ;;  %v1543_v26 = vsel %vm1242_vm2, %v1214_v63, 0.0  ;;  %5295 = vtanh.f32 %v2898_v47  ;;  %s4820_s21 = sshll.u32 %s8561_s20, 4  ;;  %s4669_s18 = scalar_lea.sflag [#allocation4], %s8561_s20 }
 0x18c   : > { %v5282_v22 = vpop.eup %5281  ;;  %v1228_v43 = vmul.f32 %v5280_v16, %v6088_v52  ;;  %5297 = vtanh.f32 %v2895_v14  ;;  %v2852_v16 = vadd.f32 %v6035_v18, %v6163_v41  ;;  %s437_s27 = scalar_lea.vmem [#allocation3], %s4820_s21  ;;  %s5756_s21 = smov [#allocation3]  }
 0x18d   : > { %1538 = vadd.xlane.f32.xlu0 %v1537_v59  ;;  %v3464_v59 = vsel %vm1242_vm2, %v3138_v60, 0.0  ;;  %v5284_v17 = vpop.eup %5283  ;;  %v968_v60 = vadd.f32 %v6390_v6, %v6025_v13  ;;  %v3153_v9 = vmul.f32 %v5282_v22, %v6088_v52  ;;  %s4688_s17 = sshll.u32 %s437_s27, 4  ;;  %s5659_s0 = sshll.u32 %s5756_s21, 4  ;;  %s4689_s17 = int_to_ptr.vmem [resolvable:$true] %s4688_s17  ;;  %s5660_s0 = int_to_ptr.vmem [resolvable:$false] %s5659_s0 }
 0x18e   : > { %1496 = vadd.xlane.f32.xlu1 %v1495_v11  ;;  %v3152_v11 = vmul.f32 %v5276_v58, %v6088_v52  ;;  %v5286_v56 = vpop.eup %5285  ;;  %v6471_v58 = vsub.s32 %v6449_v20, %v5970_v45  ;;  %s5655_s19 = scalar_lea.vmem %s4689_s17, 256  ;;  %s5661_s1 = scalar_lea.vmem %s5660_s0, 512 }
 0x18f   : > { %v5288_v13 = vpop.eup %5287  ;;  %v3509_v8 = vsel %vm1242_vm2, %v3153_v9, 0.0  ;;  %5299 = vtanh.f32 %v968_v60  ;;  %v6498_v60 = vsub.s32 %v1897_v31, %v5970_v45  ;;  %p5656_p11 = scmp.ne.s32.totalorder %s4689_s17, %s5655_s19  ;;  %p5662_p0 = scmp.lt.s32.totalorder %s4689_s17, %s5660_s0 }
 0x190   : > { %p5663_p1 = scmp.lt.s32.totalorder %s5661_s1, %s5655_s19 }
 0x191   : > { %3417 = vadd.xlane.f32.xlu0 %v3416_v33  ;;  %v1215_v33 = vmul.f32 %v5278_v4, %v6088_v52  ;;  %v2803_v4 = vadd.f32 %v6045_v24, %v6012_v7  ;;  %p5657_p12 = pnand %p5656_p11, %p5864_p5 }
 0x192   : > { %1499 = vadd.xlane.f32.xlu1 %v1498_v37  ;;  %v3506_v37 = vsel %vm1242_vm2, %v3152_v11, 0.0  ;;  %p5664_p2 = por %p5663_p1, %p5662_p0 }
 0x193   : > { %v1546_v3 = vsel %vm1242_vm2, %v1215_v33, 0.0  ;;  %v5290_v33 = vpop.eup %5289  ;;  %5301 = vtanh.f32 %v2803_v4  ;;  %p5658_p13 = pneg %p5657_p12 }
 0x194   : > { %v5292_v34 = vpop.eup %5291  ;;  %5303 = vtanh.f32 %v2852_v16 }
 0x195   : > { %1541 = vadd.xlane.f32.xlu0 %v1540_v46  ;;  %v5294_v31 = vpop.eup %5293  ;;  %p5665_p3 = pnand %p5664_p2, %p5658_p13 }
 0x196   : > { %3183 = vadd.xlane.f32.xlu1 %v3182_v48  ;;  %v3060_v48 = vmul.f32 %v5284_v17, %v6088_v52 }
 0x198   : > { %v3230_v22 = vsel %vm1242_vm2, %v3060_v48, 0.0 }
 0x199   : > { %3465 = vadd.xlane.f32.xlu0 %v3464_v59  ;;  %v1585_v59 = vsel %vm1242_vm2, %v1228_v43, 0.0  ;;  %v6493_v43 = vld [vmem:[%s8648_s7] ss:$0 sm:$0xff] }
 0x19a   : > { %1580 = vadd.xlane.f32.xlu1 %v1579_v0  ;;  %v3124_v16 = vmul.f32 %v6493_v43, %v5292_v34  ;;  %v859_v34 = vadd.f32 %v5997_v2, %v6042_v23 }
 0x19d   : > { %1544 = vadd.xlane.f32.xlu0 %v1543_v26  ;;  %v3076_v26 = vmul.f32 %v5286_v56, %v6088_v52  ;;  %v2787_v56 = vadd.f32 %v6045_v24, %v5997_v2 }
 0x19e   : > { %3507 = vadd.xlane.f32.xlu1 %v3506_v37  ;;  %v1245_v38 = vpop.xlane.xlu0 %1244 }
 0x19f   : > { %v3172_v46 = vpop.xlane.xlu1 %3171  ;;  %v1628_v10 = vadd.f32 %v6459_v5, %v1245_v38  ;;  %v1229_v38 = vmul.f32 %v6493_v43, %v5288_v13  ;;  %v1227_v13 = vmul.f32 %v6493_v43, %v5290_v33  ;;  %5305 = vtanh.f32 %v2787_v56 }
 0x1a0   : > { %v3552_v17 = vadd.f32 %v3172_v46, %v6459_v5  ;;  %v1904_v46 = vadd.s32 4294967272, %v6449_v20 }
 0x1a1   : > { %1547 = vadd.xlane.f32.xlu0 %v1546_v3  ;;  %v1889_v47 = vrot.slane %v1628_v10, %v6471_v58 }
 0x1a2   : > { %1586 = vadd.xlane.f32.xlu1 %v1585_v59  ;;  %v1248_v63 = vpop.xlane.xlu0 %1247  ;;  %v3278_v59 = vsel %vm1242_vm2, %v3076_v26, 0.0  ;;  %v3814_v4 = vrot.slane %v3552_v17, %v6476_v12 }
 0x1a3   : > { %v1629_v0 = vadd.f32 %v6459_v5, %v1248_v63  ;;  %v1293_v11 = vpop.xlane.xlu1 %1292  ;;  %v2819_v63 = vadd.f32 %v6045_v24, %v6074_v42 }
 0x1a4   : > { %v1644_v14 = vadd.f32 %v6459_v5, %v1293_v11  ;;  %v1588_v11 = vsel %vm1242_vm2, %v1229_v38, 0.0 }
 0x1a5   : > { %v1894_v37 = vrot.slane %v1629_v0, %v6476_v12  ;;  %3231 = vadd.xlane.f32.xlu0 %v3230_v22  ;;  %5307 = vtanh.f32 %v2819_v63 }
 0x1a6   : > { %3510 = vadd.xlane.f32.xlu1 %v3509_v8  ;;  %v3169_v52 = vpop.xlane.xlu0 %3168  ;;  %v5296_v8 = vpop.eup %5295  ;;  %v1998_v22 = vrot.slane %v1644_v14, %v6471_v58  ;;  %5309 = vtanh.f32 %v859_v34 }
 0x1a7   : > { %v1896_v3 = vsel %vm1895_vm3, %v1894_v37, %v1889_v47  ;;  %v1296_v9 = vpop.xlane.xlu1 %1295  ;;  %v3551_v48 = vadd.f32 %v3169_v52, %v6459_v5  ;;  %v2835_v47 = vadd.f32 %v6045_v24, %v6224_v1  ;;  %v1582_v52 = vsel %vm1242_vm2, %v1227_v13, 0.0 }
 0x1a8   : > { %v1645_v10 = vadd.f32 %v6459_v5, %v1296_v9  ;;  %v3092_v9 = vmul.f32 %v6493_v43, %v5294_v31  ;;  %v3154_v56 = vmul.f32 %v6493_v43, %v5296_v8  ;;  %v875_v13 = vadd.f32 %v6012_v7, %v6042_v23 }
 0x1a9   : > { %v3810_v0 = vrot.slane %v3551_v48, %v6471_v58  ;;  %3279 = vadd.xlane.f32.xlu0 %v3278_v59  ;;  %v5298_v48 = vpop.eup %5297  ;;  %v3422_v59 = vsel %vm1242_vm2, %v3124_v16, 0.0  ;;  %v891_v16 = vadd.f32 %v6074_v42, %v6042_v23  ;;  %5311 = vtanh.f32 %v2835_v47 }
 0x1aa   : > { %v2002_v26 = vrot.slane %v1645_v10, %v6476_v12  ;;  %1589 = vadd.xlane.f32.xlu1 %v1588_v11  ;;  %v1251_v33 = vpop.xlane.xlu0 %1250  ;;  %v3326_v8 = vsel %vm1242_vm2, %v3092_v9, 0.0  ;;  %5313 = vtanh.f32 %v875_v13  ;;  %v2851_v9 = vadd.f32 %v6045_v24, %v6163_v41 }
 0x1ab   : > { %v6519_v17 = vsel %vm1895_vm3, %v3814_v4, %v3810_v0  ;;  %v3220_v37 = vpop.xlane.xlu1 %3219  ;;  %v1630_v38 = vadd.f32 %v6459_v5, %v1251_v33  ;;  %v6530_v4 = vsub.s32 %v1904_v46, %v5970_v45  ;;  %v5300_v0 = vpop.eup %5299  ;;  %v3151_v33 = vmul.f32 %v6493_v43, %v5298_v48 }
 0x1ac   : > { %v2003_v14 = vsel %vm1895_vm3, %v2002_v26, %v1998_v22  ;;  %v5302_v46 = vpop.eup %5301  ;;  %v1230_v34 = vmul.f32 %v6493_v43, %v5300_v0  ;;  %5315 = vtanh.f32 %v891_v16 }
 0x1ad   : > { %v1901_v10 = vrot.slane %v1630_v38, %v6498_v60  ;;  %1583 = vadd.xlane.f32.xlu0 %v1582_v52  ;;  %v5304_v38 = vpop.eup %5303  ;;  %v3568_v52 = vadd.f32 %v3220_v37, %v6459_v5 }
 0x1ae   : > { %3423 = vadd.xlane.f32.xlu1 %v3422_v59  ;;  %v1254_v11 = vpop.xlane.xlu0 %1253  ;;  %v3108_v13 = vmul.f32 %v6493_v43, %v5304_v38  ;;  %v1591_v16 = vsel %vm1242_vm2, %v1230_v34, 0.0 }
 0x1af   : > { %v1903_v63 = vsel %vm1902_vm4, %v1901_v10, %v1896_v3  ;;  %v1299_v31 = vpop.xlane.xlu1 %1298  ;;  %v1631_v22 = vadd.f32 %v6459_v5, %v1254_v11  ;;  %v3512_v10 = vsel %vm1242_vm2, %v3154_v56, 0.0  ;;  %v2883_v56 = vadd.f32 %v6045_v24, %v6313_v15 }
 0x1b0   : > { %v1646_v26 = vadd.f32 %v6459_v5, %v1299_v31  ;;  %v3503_v31 = vsel %vm1242_vm2, %v3151_v33, 0.0  ;;  %v3374_v34 = vsel %vm1242_vm2, %v3108_v13, 0.0 }
 0x1b1   : > { %v1908_v3 = vrot.slane %v1631_v22, %v6530_v4  ;;  %3327 = vadd.xlane.f32.xlu0 %v3326_v8  ;;  %v3059_v22 = vmul.f32 %v6493_v43, %v5302_v46  ;;  %v3893_v8 = vrot.slane %v3568_v52, %v6476_v12  ;;  %5317 = vtanh.f32 %v2883_v56 }
 0x1b2   : > { %v2007_v59 = vrot.slane %v1646_v26, %v6498_v60  ;;  %3513 = vadd.xlane.f32.xlu1 %v3512_v10  ;;  %v3217_v11 = vpop.xlane.xlu0 %3216  ;;  %v5306_v26 = vpop.eup %5305  ;;  %v923_v52 = vadd.f32 %v6163_v41, %v6042_v23  ;;  %5319 = vtanh.f32 %v2851_v9 }
 0x1b3   : > { %v6550_v47 = vsel %vm1909_vm5, %v1908_v3, %v1903_v63  ;;  %v1344_v48 = vpop.xlane.xlu1 %1343  ;;  %v3567_v37 = vadd.f32 %v3217_v11, %v6459_v5  ;;  %v5308_v10 = vpop.eup %5307 }
 0x1b4   : > { %v2008_v0 = vsel %vm1902_vm4, %v2007_v59, %v2003_v14  ;;  %v1661_v63 = vadd.f32 %v6459_v5, %v1344_v48  ;;  %v2867_v14 = vadd.f32 %v6045_v24, %v6276_v57  ;;  %v3227_v59 = vsel %vm1242_vm2, %v3059_v22, 0.0 }
 0x1b5   : > { %v3889_v3 = vrot.slane %v3567_v37, %v6471_v58  ;;  %3504 = vadd.xlane.f32.xlu0 %v3503_v31  ;;  %v3043_v48 = vmul.f32 %v6493_v43, %v5306_v26  ;;  %v5310_v37 = vpop.eup %5309  ;;  %v3075_v56 = vmul.f32 %v6493_v43, %v5308_v10  ;;  %v907_v22 = vadd.f32 %v6224_v1, %v6042_v23 }
 0x1b6   : > { %1592 = vadd.xlane.f32.xlu1 %v1591_v16  ;;  %v1341_v11 = vpop.xlane.xlu0 %1340  ;;  %v2081_v31 = vrot.slane %v1661_v63, %v6476_v12  ;;  %v5312_v16 = vpop.eup %5311  ;;  %5321 = vtanh.f32 %v923_v52  ;;  %v858_v63 = vadd.f32 %v5997_v2, %v6050_v27 }
 0x1b7   : > { %v6566_v46 = vsel %vm1895_vm3, %v3893_v8, %v3889_v3  ;;  %v3268_v33 = vpop.xlane.xlu1 %3267  ;;  %v1660_v38 = vadd.f32 %v6459_v5, %v1341_v11  ;;  %v3179_v10 = vsel %vm1242_vm2, %v3043_v48, 0.0  ;;  %5323 = vtanh.f32 %v2867_v14 }
 0x1b8   : > { %v3584_v8 = vadd.f32 %v3268_v33, %v6459_v5  ;;  %v5314_v33 = vpop.eup %5313  ;;  %v3091_v52 = vmul.f32 %v6493_v43, %v5312_v16  ;;  %v874_v48 = vadd.f32 %v6012_v7, %v6050_v27  ;;  %5325 = vtanh.f32 %v858_v63 }
 0x1b9   : > { %v2077_v3 = vrot.slane %v1660_v38, %v6471_v58  ;;  %3375 = vadd.xlane.f32.xlu0 %v3374_v34  ;;  %v5316_v34 = vpop.eup %5315  ;;  %5327 = vtanh.f32 %v907_v22 }
 0x1ba   : > { %3228 = vadd.xlane.f32.xlu1 %v3227_v59  ;;  %v3265_v11 = vpop.xlane.xlu0 %3264  ;;  %v1121_v59 = vmul.f32 %v6493_v43, %v5310_v37  ;;  %v3972_v55 = vrot.slane %v3584_v8, %v6476_v12  ;;  %5329 = vtanh.f32 %v874_v48 }
 0x1bb   : > { %v2082_v13 = vsel %vm1895_vm3, %v2081_v31, %v2077_v3  ;;  %v1302_v26 = vpop.xlane.xlu1 %1301  ;;  %v3583_v9 = vadd.f32 %v3265_v11, %v6459_v5  ;;  %v3275_v3 = vsel %vm1242_vm2, %v3075_v56, 0.0  ;;  %v890_v56 = vadd.f32 %v6074_v42, %v6050_v27 }
 0x1bc   : > { %v1647_v38 = vadd.f32 %v6459_v5, %v1302_v26  ;;  %v1264_v26 = vsel %vm1242_vm2, %v1121_v59, 0.0  ;;  %v922_v59 = vadd.f32 %v6163_v41, %v6050_v27 }
 0x1bd   : > { %v3968_v31 = vrot.slane %v3583_v9, %v6471_v58  ;;  %3180 = vadd.xlane.f32.xlu0 %v3179_v10  ;;  %v1153_v9 = vmul.f32 %v6493_v43, %v5316_v34  ;;  %v3323_v10 = vsel %vm1242_vm2, %v3091_v52, 0.0  ;;  %5331 = vtanh.f32 %v890_v56 }
 0x1be   : > { %v2012_v11 = vrot.slane %v1647_v38, %v6530_v4  ;;  %3276 = vadd.xlane.f32.xlu1 %v3275_v3  ;;  %v1347_v25 = vpop.xlane.xlu0 %1346  ;;  %v5318_v38 = vpop.eup %5317  ;;  %v906_v52 = vadd.f32 %v6224_v1, %v6050_v27  ;;  %v938_v56 = vadd.f32 %v6276_v57, %v6050_v27  ;;  %5333 = vtanh.f32 %v922_v59 }
 0x1bf   : > { %v6595_v37 = vsel %vm1895_vm3, %v3972_v55, %v3968_v31  ;;  %v6597_v14 = vpop.xlane.xlu1 %3177  ;;  %v1662_v8 = vadd.f32 %v6459_v5, %v1347_v25  ;;  %v1137_v25 = vmul.f32 %v6493_v43, %v5314_v33  ;;  %v5320_v63 = vpop.eup %5319  ;;  %v1360_v22 = vsel %vm1242_vm2, %v1153_v9, 0.0 }
 0x1c0   : > { %v6603_v16 = vsel %vm1909_vm5, %v2012_v11, %v2008_v0  ;;  %v3139_v34 = vmul.f32 %v6493_v43, %v5318_v38  ;;  %v5322_v11 = vpop.eup %5321  ;;  %v3107_v48 = vmul.f32 %v6493_v43, %v5320_v63  ;;  %v2806_v38 = vadd.f32 %v6058_v32, %v6012_v7 }
 0x1c1   : > { %v2086_v55 = vrot.slane %v1662_v8, %v6498_v60  ;;  %1265 = vadd.xlane.f32.xlu0 %v1264_v26  ;;  %v1312_v33 = vsel %vm1242_vm2, %v1137_v25, 0.0  ;;  %v5324_v8 = vpop.eup %5323  ;;  %5335 = vtanh.f32 %v906_v52  ;;  %v2790_v25 = vadd.f32 %v6058_v32, %v5997_v2 }
 0x1c2   : > { %3324 = vadd.xlane.f32.xlu1 %v3323_v10  ;;  %v3226_v31 = vpop.xlane.xlu0 %3225  ;;  %v1185_v10 = vmul.f32 %v6493_v43, %v5322_v11  ;;  %v5326_v63 = vpop.eup %5325  ;;  %v3371_v51 = vsel %vm1242_vm2, %v3107_v48, 0.0  ;;  %v3123_v59 = vmul.f32 %v6493_v43, %v5324_v8  ;;  %5337 = vtanh.f32 %v938_v56 }
 0x1c3   : > { %v2087_v0 = vsel %vm1902_vm4, %v2086_v55, %v2082_v13  ;;  %v1440_v3 = vpop.xlane.xlu1 %1439  ;;  %v3467_v55 = vsel %vm1242_vm2, %v3139_v34, 0.0  ;;  %v2822_v34 = vadd.f32 %v6058_v32, %v6074_v42  ;;  %v3570_v52 = vadd.f32 %v3226_v31, %v6459_v5 }
 0x1c4   : > { %5339 = vtanh.f32 %v2806_v38  ;;  %v1456_v8 = vsel %vm1242_vm2, %v1185_v10, 0.0  ;;  %v2838_v10 = vadd.f32 %v6058_v32, %v6224_v1 }
 0x1c5   : > { %1361 = vadd.xlane.f32.xlu0 %v1360_v22  ;;  %v1693_v22 = vadd.f32 %v6459_v5, %v1440_v3  ;;  %5341 = vtanh.f32 %v2790_v25  ;;  %v2854_v25 = vadd.f32 %v6058_v32, %v6163_v41 }
 0x1c6   : > { %1313 = vadd.xlane.f32.xlu1 %v1312_v33  ;;  %v1350_v13 = vpop.xlane.xlu0 %1349  ;;  %5343 = vtanh.f32 %v2822_v34 }
 0x1c7   : > { %v3364_v26 = vpop.xlane.xlu1 %3363  ;;  %v1663_v9 = vadd.f32 %v6459_v5, %v1350_v13  ;;  %v5328_v13 = vpop.eup %5327  ;;  %v2239_v61 = vrot.slane %v1693_v22, %v6476_v12  ;;  %5345 = vtanh.f32 %v2838_v10 }
 0x1c8   : > { %v5330_v48 = vpop.eup %5329  ;;  %v3616_v40 = vadd.f32 %v3364_v26, %v6459_v5  ;;  %5347 = vtanh.f32 %v2854_v25  ;;  %v2805_v26 = vadd.f32 %v6064_v36, %v6012_v7 }
 0x1c9   : > { %v2091_v33 = vrot.slane %v1663_v9, %v6530_v4  ;;  %3468 = vadd.xlane.f32.xlu0 %v3467_v55  ;;  %v5332_v56 = vpop.eup %5331 }
 0x1ca   : > { %3372 = vadd.xlane.f32.xlu1 %v3371_v51  ;;  %v1437_v29 = vpop.xlane.xlu0 %1436  ;;  %v1120_v51 = vmul.f32 %v6493_v43, %v5326_v63  ;;  %v3903_v63 = vrot.slane %v3570_v52, %v6530_v4 }
 0x1cb   : > { %v6636_v11 = vsel %vm1909_vm5, %v2091_v33, %v2087_v0  ;;  %v3223_v3 = vpop.xlane.xlu1 %3222  ;;  %v1692_v9 = vadd.f32 %v6459_v5, %v1437_v29  ;;  %v3419_v0 = vsel %vm1242_vm2, %v3123_v59, 0.0  ;;  %v1169_v33 = vmul.f32 %v6493_v43, %v5328_v13 }
 0x1cc   : > { %v3569_v55 = vadd.f32 %v3223_v3, %v6459_v5  ;;  %v1136_v13 = vmul.f32 %v6493_v43, %v5330_v48 }
 0x1cd   : > { %v2235_v31 = vrot.slane %v1692_v9, %v6471_v58  ;;  %1457 = vadd.xlane.f32.xlu0 %v1456_v8  ;;  %v1152_v8 = vmul.f32 %v6493_v43, %v5332_v56 }
 0x1ce   : > { %v3898_v29 = vrot.slane %v3569_v55, %v6498_v60  ;;  %3420 = vadd.xlane.f32.xlu1 %v3419_v0  ;;  %v3274_v38 = vpop.xlane.xlu0 %3273  ;;  %v1261_v55 = vsel %vm1242_vm2, %v1120_v51, 0.0  ;;  %v5334_v0 = vpop.eup %5333 }
 0x1cf   : > { %v2240_v22 = vsel %vm1895_vm3, %v2239_v61, %v2235_v31  ;;  %v3271_v3 = vpop.xlane.xlu1 %3270  ;;  %v3586_v59 = vadd.f32 %v3274_v38, %v6459_v5  ;;  %v1408_v61 = vsel %vm1242_vm2, %v1169_v33, 0.0  ;;  %v5336_v48 = vpop.eup %5335  ;;  %v2789_v33 = vadd.f32 %v6064_v36, %v5997_v2 }
 0x1d0   : > { %v3899_v9 = vsel %vm1902_vm4, %v3898_v29, %v6566_v46  ;;  %v3585_v34 = vadd.f32 %v3271_v3, %v6459_v5  ;;  %v5338_v38 = vpop.eup %5337  ;;  %v1309_v3 = vsel %vm1242_vm2, %v1136_v13, 0.0  ;;  %v1184_v10 = vmul.f32 %v6493_v43, %v5334_v0 }
 0x1d1   : > { %v3982_v52 = vrot.slane %v3586_v59, %v6530_v4  ;;  %1262 = vadd.xlane.f32.xlu0 %v1261_v55  ;;  %v6664_v31 = vsel %vm1909_vm5, %v3903_v63, %v3899_v9  ;;  %v1357_v59 = vsel %vm1242_vm2, %v1152_v8, 0.0  ;;  %v5340_v9 = vpop.eup %5339  ;;  %v2821_v13 = vadd.f32 %v6064_v36, %v6074_v42 }
 0x1d2   : > { %8682 = vst [vmem:[#allocation18_spill] sm:$0xff] %v6664_v31  ;;  %v3977_v46 = vrot.slane %v3585_v34, %v6498_v60  ;;  %1409 = vadd.xlane.f32.xlu1 %v1408_v61  ;;  %v3361_v29 = vpop.xlane.xlu0 %3360  ;;  %v4130_v34 = vrot.slane %v3616_v40, %v6476_v12  ;;  %v1168_v61 = vmul.f32 %v6493_v43, %v5336_v48  ;;  %5349 = vtanh.f32 %v2789_v33 }
 0x1d3   : > { %v6667_v51 = vpop.xlane.xlu1 %1307  ;;  %v3615_v56 = vadd.f32 %v3361_v29, %v6459_v5  ;;  %v5342_v29 = vpop.eup %5341  ;;  %v861_v40 = vadd.f32 %v5997_v2, %v6061_v35  ;;  %v1453_v48 = vsel %vm1242_vm2, %v1184_v10, 0.0  ;;  %5351 = vtanh.f32 %v2805_v26 }
 0x1d4   : > { %v3978_v63 = vsel %vm1902_vm4, %v3977_v46, %v6595_v37  ;;  %v1918_v33 = vadd.s32 4294967256, %v6449_v20  ;;  %5353 = vtanh.f32 %v2821_v13  ;;  %v2837_v13 = vadd.f32 %v6064_v36, %v6224_v1 }
 0x1d5   : > { %v6681_v25 = vsel %vm1909_vm5, %v3982_v52, %v3978_v63  ;;  %v4126_v55 = vrot.slane %v3615_v56, %v6471_v58  ;;  %1358 = vadd.xlane.f32.xlu0 %v1357_v59  ;;  %v5344_v52 = vpop.eup %5343  ;;  %v3062_v63 = vmul.f32 %v6493_v43, %v5340_v9  ;;  %v1405_v59 = vsel %vm1242_vm2, %v1168_v61, 0.0 }
 0x1d6   : > { %8683 = vst [vmem:[#allocation19_spill] sm:$0xff] %v6681_v25  ;;  %1310 = vadd.xlane.f32.xlu1 %v1309_v3  ;;  %v1443_v37 = vpop.xlane.xlu0 %1442  ;;  %5355 = vtanh.f32 %v861_v40  ;;  %v2853_v9 = vadd.f32 %v6064_v36, %v6163_v41  ;;  %v5346_v61 = vpop.eup %5345  ;;  %v3046_v40 = vmul.f32 %v6493_v43, %v5342_v29 }
 0x1d7   : > { %v4131_v8 = vsel %vm1895_vm3, %v4130_v34, %v4126_v55  ;;  %v3367_v0 = vpop.xlane.xlu1 %3366  ;;  %v1694_v46 = vadd.f32 %v6459_v5, %v1443_v37  ;;  %v1200_v34 = vmul.f32 %v6493_v43, %v5338_v38 }
 0x1d8   : > { %v3617_v56 = vadd.f32 %v3367_v0, %v6459_v5  ;;  %5357 = vtanh.f32 %v2853_v9 }
 0x1d9   : > { %v2244_v3 = vrot.slane %v1694_v46, %v6498_v60  ;;  %1454 = vadd.xlane.f32.xlu0 %v1453_v48  ;;  %v3236_v46 = vsel %vm1242_vm2, %v3062_v63, 0.0  ;;  %v5348_v48 = vpop.eup %5347  ;;  %5359 = vtanh.f32 %v2837_v13 }
 0x1da   : > { %v4135_v55 = vrot.slane %v3617_v56, %v6498_v60  ;;  %1406 = vadd.xlane.f32.xlu1 %v1405_v59  ;;  %v1446_v37 = vpop.xlane.xlu0 %1445  ;;  %v3078_v56 = vmul.f32 %v6493_v43, %v5344_v52  ;;  %v6717_v52 = vsub.s32 %v1918_v33, %v5970_v45 }
 0x1db   : > { %v2245_v0 = vsel %vm1902_vm4, %v2244_v3, %v2240_v22  ;;  %v6700_v10 = vpop.xlane.xlu1 %1388  ;;  %v1695_v26 = vadd.f32 %v6459_v5, %v1446_v37  ;;  %v1501_v3 = vsel %vm1242_vm2, %v1200_v34, 0.0  ;;  %v1911_v37 = vadd.s32 4294967264, %v6449_v20 }
 0x1dc   : > { %v4136_v38 = vsel %vm1902_vm4, %v4135_v55, %v4131_v8  ;;  %v893_v8 = vadd.f32 %v6074_v42, %v6061_v35  ;;  %v3284_v29 = vsel %vm1242_vm2, %v3078_v56, 0.0  ;;  %v3188_v20 = vsel %vm1242_vm2, %v3046_v40, 0.0 }
 0x1dd   : > { %v2249_v22 = vrot.slane %v1695_v26, %v6530_v4  ;;  %3237 = vadd.xlane.f32.xlu0 %v3236_v46  ;;  %v3110_v26 = vmul.f32 %v6493_v43, %v5348_v48  ;;  %v877_v46 = vadd.f32 %v6012_v7, %v6061_v35  ;;  %v3554_v56 = vadd.f32 %v6597_v14, %v6459_v5 }
 0x1de   : > { %1502 = vadd.xlane.f32.xlu1 %v1501_v3  ;;  %v3370_v59 = vpop.xlane.xlu0 %3369  ;;  %v5350_v3 = vpop.eup %5349  ;;  %v6737_v13 = vsub.s32 %v1911_v37, %v5970_v45  ;;  %5361 = vtanh.f32 %v893_v8  ;;  %v1649_v40 = vadd.f32 %v6459_v5, %v6667_v51 }
 0x1df   : > { %v6720_v63 = vsel %vm1909_vm5, %v2249_v22, %v2245_v0  ;;  %v6722_v55 = vpop.xlane.xlu1 %3315  ;;  %v3618_v34 = vadd.f32 %v3370_v59, %v6459_v5  ;;  %v3094_v0 = vmul.f32 %v6493_v43, %v5346_v61  ;;  %v2869_v22 = vadd.f32 %v6064_v36, %v6276_v57  ;;  %v5352_v9 = vpop.eup %5351 }
 0x1e0   : > { %8684 = vst [vmem:[#allocation20_spill] sm:$0xff] %v6737_v13  ;;  %v5354_v14 = vpop.eup %5353  ;;  %v3380_v37 = vsel %vm1242_vm2, %v3110_v26, 0.0  ;;  %v3045_v45 = vmul.f32 %v6493_v43, %v5350_v3  ;;  %5363 = vtanh.f32 %v877_v46  ;;  %v876_v26 = vadd.f32 %v6012_v7, %v6069_v39 }
 0x1e1   : > { %v4140_v33 = vrot.slane %v3618_v34, %v6530_v4  ;;  %3285 = vadd.xlane.f32.xlu0 %v3284_v29  ;;  %v860_v29 = vadd.f32 %v5997_v2, %v6069_v39  ;;  %v5356_v8 = vpop.eup %5355  ;;  %5365 = vtanh.f32 %v2869_v22  ;;  %v2022_v46 = vrot.slane %v1649_v40, %v6717_v52 }
 0x1e2   : > { %3189 = vadd.xlane.f32.xlu1 %v3188_v20  ;;  %v3175_v48 = vpop.xlane.xlu0 %3174  ;;  %v892_v22 = vadd.f32 %v6074_v42, %v6069_v39 }
 0x1e3   : > { %v6742_v59 = vsel %vm1909_vm5, %v4140_v33, %v4136_v38  ;;  %v1305_v61 = vpop.xlane.xlu1 %1304  ;;  %v3553_v34 = vadd.f32 %v3175_v48, %v6459_v5  ;;  %v3332_v38 = vsel %vm1242_vm2, %v3094_v0, 0.0  ;;  %v3061_v33 = vmul.f32 %v6493_v43, %v5352_v9 }
 0x1e4   : > { %8685 = vst [vmem:[#allocation21_spill] sm:$0xff] %v6742_v59  ;;  %v1648_v20 = vadd.f32 %v6459_v5, %v1305_v61  ;;  %v3824_v48 = vrot.slane %v3554_v56, %v6530_v4  ;;  %5367 = vtanh.f32 %v860_v29  ;;  %v3185_v56 = vsel %vm1242_vm2, %v3045_v45, 0.0 }
 0x1e5   : > { %v3819_v51 = vrot.slane %v3553_v34, %v6498_v60  ;;  %3381 = vadd.xlane.f32.xlu0 %v3380_v37  ;;  %v1123_v34 = vmul.f32 %v6493_v43, %v5356_v8  ;;  %v5358_v37 = vpop.eup %5357  ;;  %v3233_v40 = vsel %vm1242_vm2, %v3061_v33, 0.0  ;;  %5369 = vtanh.f32 %v892_v22 }
 0x1e6   : > { %v2017_v59 = vrot.slane %v1648_v20, %v6737_v13  ;;  %3333 = vadd.xlane.f32.xlu1 %v3332_v38  ;;  %v6755_v61 = vpop.xlane.xlu0 %1259  ;;  %v2792_v45 = vadd.f32 %v6077_v44, %v5997_v2  ;;  %v3109_v33 = vmul.f32 %v6493_v43, %v5358_v37  ;;  %5371 = vtanh.f32 %v876_v26 }
 0x1e7   : > { %v3820_v3 = vsel %vm1902_vm4, %v3819_v51, %v6519_v17  ;;  %v1395_v0 = vpop.xlane.xlu1 %1394  ;;  %v3077_v17 = vmul.f32 %v6493_v43, %v5354_v14  ;;  %v5360_v51 = vpop.eup %5359  ;;  %v1270_v8 = vsel %vm1242_vm2, %v1123_v34, 0.0  ;;  %v908_v14 = vadd.f32 %v6224_v1, %v6069_v39 }
 0x1e8   : > { %v2018_v9 = vsel %vm1916_vm6, %v2017_v59, %v6603_v16  ;;  %v6769_v20 = vsel %vm1909_vm5, %v3824_v48, %v3820_v3  ;;  %v5362_v59 = vpop.eup %5361  ;;  %v2808_v3 = vadd.f32 %v6077_v44, %v6012_v7  ;;  %5373 = vtanh.f32 %v2792_v45 }
 0x1e9   : > { %8686 = vst [vmem:[#allocation22_spill] sm:$0xff] %v6769_v20  ;;  %3186 = vadd.xlane.f32.xlu0 %v3185_v56  ;;  %v6774_v29 = vsel %vm1923_vm7, %v2022_v46, %v2018_v9  ;;  %v3281_v48 = vsel %vm1242_vm2, %v3077_v17, 0.0  ;;  %v3093_v46 = vmul.f32 %v6493_v43, %v5360_v51  ;;  %v2824_v56 = vadd.f32 %v6077_v44, %v6074_v42 }
 0x1ea   : > { %8687 = vst [vmem:[#allocation23_spill] sm:$0xff] %v6774_v29  ;;  %3234 = vadd.xlane.f32.xlu1 %v3233_v40  ;;  %v6776_v38 = vpop.xlane.xlu0 %1355  ;;  %v5364_v22 = vpop.eup %5363  ;;  %v2807_v37 = vadd.f32 %v6083_v50, %v6012_v7  ;;  %v3377_v40 = vsel %vm1242_vm2, %v3109_v33, 0.0  ;;  %v1155_v17 = vmul.f32 %v6493_v43, %v5362_v59  ;;  %5375 = vtanh.f32 %v908_v14 }
 0x1eb   : > { %v3319_v16 = vpop.xlane.xlu1 %3318  ;;  %v5366_v34 = vpop.eup %5365  ;;  %v1139_v29 = vmul.f32 %v6493_v43, %v5364_v22  ;;  %5377 = vtanh.f32 %v2808_v3  ;;  %v1678_v45 = vadd.f32 %v6459_v5, %v1395_v0  ;;  %v2791_v33 = vadd.f32 %v6083_v50, %v5997_v2 }
 0x1ec   : > { %5379 = vtanh.f32 %v2824_v56  ;;  %v3125_v22 = vmul.f32 %v6493_v43, %v5366_v34  ;;  %v2839_v0 = vadd.f32 %v6083_v50, %v6224_v1  ;;  %v3601_v34 = vadd.f32 %v3319_v16, %v6459_v5 }
 0x1ed   : > { %1271 = vadd.xlane.f32.xlu0 %v1270_v8  ;;  %v1676_v8 = vadd.f32 %v6459_v5, %v6700_v10  ;;  %5381 = vtanh.f32 %v2807_v37  ;;  %v2823_v20 = vadd.f32 %v6083_v50, %v6074_v42 }
 0x1ee   : > { %3282 = vadd.xlane.f32.xlu1 %v3281_v48  ;;  %v6788_v9 = vpop.xlane.xlu0 %1451  ;;  %v5368_v51 = vpop.eup %5367  ;;  %v3329_v48 = vsel %vm1242_vm2, %v3093_v46, 0.0  ;;  %v1366_v46 = vsel %vm1242_vm2, %v1155_v17, 0.0  ;;  %v2165_v17 = vrot.slane %v1678_v45, %v6498_v60  ;;  %5383 = vtanh.f32 %v2791_v33 }
 0x1ef   : > { %v1398_v26 = vpop.xlane.xlu1 %1397  ;;  %v1122_v3 = vmul.f32 %v6493_v43, %v5368_v51  ;;  %v5370_v56 = vpop.eup %5369  ;;  %v3425_v16 = vsel %vm1242_vm2, %v3125_v22, 0.0  ;;  %v4056_v22 = vrot.slane %v3601_v34, %v6498_v60  ;;  %5385 = vtanh.f32 %v2839_v0 }
 0x1f0   : > { %v1679_v59 = vadd.f32 %v6459_v5, %v1398_v26  ;;  %v3600_v26 = vadd.f32 %v6722_v55, %v6459_v5  ;;  %v5372_v37 = vpop.eup %5371  ;;  %5387 = vtanh.f32 %v2823_v20 }
 0x1f1   : > { %3378 = vadd.xlane.f32.xlu0 %v3377_v40  ;;  %v2156_v40 = vrot.slane %v1676_v8, %v6471_v58  ;;  %v1267_v33 = vsel %vm1242_vm2, %v1122_v3, 0.0 }
 0x1f2   : > { %3330 = vadd.xlane.f32.xlu1 %v3329_v48  ;;  %v1392_v25 = vpop.xlane.xlu0 %1391  ;;  %v2170_v8 = vrot.slane %v1679_v59, %v6530_v4  ;;  %v4051_v59 = vrot.slane %v3600_v26, %v6476_v12 }
 0x1f3   : > { %v6804_v14 = vpop.xlane.xlu1 %1484  ;;  %v1677_v10 = vadd.f32 %v6459_v5, %v1392_v25  ;;  %v1318_v25 = vsel %vm1242_vm2, %v1139_v29, 0.0 }
 0x1f5   : > { %v2160_v48 = vrot.slane %v1677_v10, %v6476_v12  ;;  %1367 = vadd.xlane.f32.xlu0 %v1366_v46  ;;  %v878_v10 = vadd.f32 %v6012_v7, %v6093_v54  ;;  %v1154_v46 = vmul.f32 %v6493_v43, %v5370_v56 }
 0x1f6   : > { %1319 = vadd.xlane.f32.xlu1 %v1318_v25  ;;  %v3313_v51 = vpop.xlane.xlu0 %3312  ;;  %v5374_v25 = vpop.eup %5373 }
 0x1f7   : > { %v2161_v55 = vsel %vm1895_vm3, %v2160_v48, %v2156_v40  ;;  %v6823_v31 = vpop.xlane.xlu1 %3411  ;;  %v3599_v29 = vadd.f32 %v3313_v51, %v6459_v5  ;;  %v1138_v51 = vmul.f32 %v6493_v43, %v5372_v37  ;;  %v5376_v19 = vpop.eup %5375  ;;  %v3048_v34 = vmul.f32 %v6493_v43, %v5374_v25 }
 0x1f8   : > { %v2166_v45 = vsel %vm1902_vm4, %v2165_v17, %v2161_v55  ;;  %v1633_v17 = vadd.f32 %v6459_v5, %v6755_v61  ;;  %v5378_v56 = vpop.eup %5377  ;;  %v1363_v61 = vsel %vm1242_vm2, %v1154_v46, 0.0  ;;  %v1170_v20 = vmul.f32 %v6493_v43, %v5376_v19 }
 0x1f9   : > { %v4047_v40 = vrot.slane %v3599_v29, %v6471_v58  ;;  %1268 = vadd.xlane.f32.xlu0 %v1267_v33  ;;  %v2171_v48 = vsel %vm1909_vm5, %v2170_v8, %v2166_v45  ;;  %v862_v8 = vadd.f32 %v5997_v2, %v6093_v54  ;;  %v5380_v37 = vpop.eup %5379  ;;  %5389 = vtanh.f32 %v878_v10 }
 0x1fa   : > { %3426 = vadd.xlane.f32.xlu1 %v3425_v16  ;;  %v1257_v3 = vpop.xlane.xlu0 %1256  ;;  %v5382_v0 = vpop.eup %5381  ;;  %v2793_v19 = vadd.f32 %v6110_v21, %v5997_v2 }
 0x1fb   : > { %v4052_v55 = vsel %vm1895_vm3, %v4051_v59, %v4047_v40  ;;  %v1401_v26 = vpop.xlane.xlu1 %1400  ;;  %v1632_v29 = vadd.f32 %v6459_v5, %v1257_v3  ;;  %v1315_v59 = vsel %vm1242_vm2, %v1138_v51, 0.0  ;;  %v1922_v40 = vrot.slane %v1633_v17, %v6717_v52  ;;  %v5384_v10 = vpop.eup %5383 }
 0x1fc   : > { %v1680_v45 = vadd.f32 %v6459_v5, %v1401_v26  ;;  %v6847_v16 = vsel %vm1902_vm4, %v4056_v22, %v4052_v55  ;;  %v1665_v3 = vadd.f32 %v6459_v5, %v6776_v38  ;;  %v2809_v22 = vadd.f32 %v6110_v21, %v6012_v7 }
 0x1fd   : > { %v1915_v33 = vrot.slane %v1632_v29, %v6737_v13  ;;  %1364 = vadd.xlane.f32.xlu0 %v1363_v61  ;;  %5391 = vtanh.f32 %v862_v8  ;;  %v3194_v17 = vsel %vm1242_vm2, %v3048_v34, 0.0  ;;  %v3080_v29 = vmul.f32 %v6493_v43, %v5380_v37 }
 0x1fe   : > { %v2175_v46 = vrot.slane %v1680_v45, %v6737_v13  ;;  %1316 = vadd.xlane.f32.xlu1 %v1315_v59  ;;  %v1353_v25 = vpop.xlane.xlu0 %1352  ;;  %v1411_v8 = vsel %vm1242_vm2, %v1170_v20, 0.0  ;;  %v2899_v37 = vadd.f32 %v6045_v24, %v6390_v6  ;;  %5393 = vtanh.f32 %v2793_v19 }
 0x1ff   : > { %v1917_v55 = vsel %vm1916_vm6, %v1915_v33, %v6550_v47  ;;  %v1491_v51 = vpop.xlane.xlu1 %1490  ;;  %v1664_v26 = vadd.f32 %v6459_v5, %v1353_v25  ;;  %v1708_v47 = vadd.f32 %v6459_v5, %v6804_v14  ;;  %v3064_v33 = vmul.f32 %v6493_v43, %v5378_v56  ;;  %v5386_v56 = vpop.eup %5385 }
 0x200   : > { %v6864_v38 = vsel %vm1916_vm6, %v2175_v46, %v2171_v48  ;;  %v6869_v45 = vsel %vm1923_vm7, %v1922_v40, %v1917_v55  ;;  %v2101_v48 = vrot.slane %v1665_v3, %v6717_v52  ;;  %v1710_v59 = vadd.f32 %v6459_v5, %v1491_v51  ;;  %v5388_v24 = vpop.eup %5387 }
 0x201   : > { %v2096_v61 = vrot.slane %v1664_v26, %v6737_v13  ;;  %3195 = vadd.xlane.f32.xlu0 %v3194_v17  ;;  %v2884_v20 = vadd.f32 %v6035_v18, %v6313_v15  ;;  %v3290_v3 = vsel %vm1242_vm2, %v3080_v29, 0.0  ;;  %v3047_v25 = vmul.f32 %v6493_v43, %v5384_v10 }
 0x202   : > { %1412 = vadd.xlane.f32.xlu1 %v1411_v8  ;;  %v1488_v34 = vpop.xlane.xlu0 %1487  ;;  %5395 = vtanh.f32 %v2809_v22  ;;  %v2314_v51 = vrot.slane %v1708_v47, %v6471_v58  ;;  %v3242_v26 = vsel %vm1242_vm2, %v3064_v33, 0.0  ;;  %v3063_v19 = vmul.f32 %v6493_v43, %v5382_v0 }
 0x203   : > { %v2097_v40 = vsel %vm1916_vm6, %v2096_v61, %v6636_v11  ;;  %v1536_v14 = vpop.xlane.xlu1 %1535  ;;  %v1709_v46 = vadd.f32 %v6459_v5, %v1488_v34  ;;  %v2323_v17 = vrot.slane %v1710_v59, %v6498_v60  ;;  %5397 = vtanh.f32 %v2899_v37  ;;  %v5390_v10 = vpop.eup %5389 }
 0x204   : > { %v6888_v55 = vsel %vm1923_vm7, %v2101_v48, %v2097_v40  ;;  %v863_v22 = vadd.f32 %v5997_v2, %v6080_v49  ;;  %5399 = vtanh.f32 %v2884_v20  ;;  %v879_v33 = vadd.f32 %v6012_v7, %v6080_v49 }
 0x205   : > { %v2318_v11 = vrot.slane %v1709_v46, %v6476_v12  ;;  %3291 = vadd.xlane.f32.xlu0 %v3290_v3  ;;  %v3191_v0 = vsel %vm1242_vm2, %v3047_v25, 0.0  ;;  %v3079_v48 = vmul.f32 %v6493_v43, %v5388_v24  ;;  %v909_v34 = vadd.f32 %v6224_v1, %v6061_v35 }
 0x206   : > { %3243 = vadd.xlane.f32.xlu1 %v3242_v26  ;;  %v3322_v29 = vpop.xlane.xlu0 %3321  ;;  %v3632_v40 = vadd.f32 %v6823_v31, %v6459_v5  ;;  %v3239_v20 = vsel %vm1242_vm2, %v3063_v19, 0.0  ;;  %v3095_v3 = vmul.f32 %v6493_v43, %v5386_v56  ;;  %5401 = vtanh.f32 %v863_v22 }
 0x207   : > { %v2319_v61 = vsel %vm1895_vm3, %v2318_v11, %v2314_v51  ;;  %v3415_v8 = vpop.xlane.xlu1 %3414  ;;  %v3602_v47 = vadd.f32 %v3322_v29, %v6459_v5  ;;  %v5392_v37 = vpop.eup %5391  ;;  %v894_v51 = vadd.f32 %v6074_v42, %v6093_v54  ;;  %v1140_v19 = vmul.f32 %v6493_v43, %v5390_v10 }
 0x208   : > { %v6904_v59 = vsel %vm1902_vm4, %v2323_v17, %v2319_v61  ;;  %v3633_v25 = vadd.f32 %v3415_v8, %v6459_v5  ;;  %5403 = vtanh.f32 %v879_v33  ;;  %v3287_v56 = vsel %vm1242_vm2, %v3079_v48, 0.0  ;;  %v5394_v29 = vpop.eup %5393 }
 0x209   : > { %v4061_v46 = vrot.slane %v3602_v47, %v6530_v4  ;;  %3192 = vadd.xlane.f32.xlu0 %v3191_v0  ;;  %v1124_v17 = vmul.f32 %v6493_v43, %v5392_v37  ;;  %5405 = vtanh.f32 %v909_v34  ;;  %v4209_v22 = vrot.slane %v3632_v40, %v6476_v12 }
 0x20a   : > { %3240 = vadd.xlane.f32.xlu1 %v3239_v20  ;;  %v3409_v24 = vpop.xlane.xlu0 %3408  ;;  %v1725_v61 = vadd.f32 %v6459_v5, %v1536_v14  ;;  %v4214_v0 = vrot.slane %v3633_v25, %v6498_v60  ;;  %5407 = vtanh.f32 %v894_v51  ;;  %v939_v43 = vadd.f32 %v6276_v57, %v6042_v23 }
 0x20b   : > { %v6918_v11 = vsel %vm1909_vm5, %v4061_v46, %v6847_v16  ;;  %v3460_v31 = vpop.xlane.xlu1 %3459  ;;  %v3631_v26 = vadd.f32 %v3409_v24, %v6459_v5  ;;  %v3335_v16 = vsel %vm1242_vm2, %v3095_v3, 0.0  ;;  %v1321_v14 = vsel %vm1242_vm2, %v1140_v19, 0.0  ;;  %v6941_v3 = vld [vmem:[%s8648_s7] ss:$0 sm:$0xff] }
 0x20c   : > { %v5396_v47 = vpop.eup %5395  ;;  %v924_v37 = vadd.f32 %v6163_v41, %v6069_v39  ;;  %v1273_v20 = vsel %vm1242_vm2, %v1124_v17, 0.0  ;;  %v3049_v25 = vmul.f32 %v6941_v3, %v5394_v29  ;;  %v3648_v19 = vadd.f32 %v3460_v31, %v6459_v5 }
 0x20d   : > { %v4205_v8 = vrot.slane %v3631_v26, %v6471_v58  ;;  %3288 = vadd.xlane.f32.xlu0 %v3287_v56  ;;  %v5398_v40 = vpop.eup %5397  ;;  %v2397_v26 = vrot.slane %v1725_v61, %v6476_v12  ;;  %v3065_v17 = vmul.f32 %v6941_v3, %v5396_v47  ;;  %5409 = vtanh.f32 %v939_v43 }
 0x20e   : > { %3336 = vadd.xlane.f32.xlu1 %v3335_v16  ;;  %v1533_v10 = vpop.xlane.xlu0 %1532  ;;  %v5400_v51 = vpop.eup %5399  ;;  %v969_v29 = vadd.f32 %v6390_v6, %v6203_v30  ;;  %5411 = vtanh.f32 %v924_v37  ;;  %v954_v31 = vadd.f32 %v6313_v15, %v6050_v27 }
 0x20f   : > { %v4210_v33 = vsel %vm1895_vm3, %v4209_v22, %v4205_v8  ;;  %v1404_v48 = vpop.xlane.xlu1 %1403  ;;  %v1724_v34 = vadd.f32 %v6459_v5, %v1533_v10  ;;  %v3140_v30 = vmul.f32 %v6941_v3, %v5400_v51  ;;  %v3245_v37 = vsel %vm1242_vm2, %v3065_v17, 0.0 }
 0x210   : > { %v1681_v46 = vadd.f32 %v6459_v5, %v1404_v48  ;;  %v6945_v24 = vsel %vm1902_vm4, %v4214_v0, %v4210_v33  ;;  %v5402_v10 = vpop.eup %5401  ;;  %v3197_v33 = vsel %vm1242_vm2, %v3049_v25, 0.0  ;;  %v2810_v51 = vadd.f32 %v6098_v62, %v6012_v7 }
 0x211   : > { %v2393_v56 = vrot.slane %v1724_v34, %v6471_v58  ;;  %1274 = vadd.xlane.f32.xlu0 %v1273_v20  ;;  %v4288_v34 = vrot.slane %v3648_v19, %v6476_v12  ;;  %v2794_v19 = vadd.f32 %v6098_v62, %v5997_v2  ;;  %5413 = vtanh.f32 %v954_v31 }
 0x212   : > { %v2180_v22 = vrot.slane %v1681_v46, %v6717_v52  ;;  %1322 = vadd.xlane.f32.xlu1 %v1321_v14  ;;  %v3457_v8 = vpop.xlane.xlu0 %3456  ;;  %v5404_v48 = vpop.eup %5403  ;;  %v3155_v46 = vmul.f32 %v6941_v3, %v5398_v40  ;;  %v1125_v40 = vmul.f32 %v6941_v3, %v5402_v10  ;;  %5415 = vtanh.f32 %v969_v29 }
 0x213   : > { %v6955_v16 = vsel %vm1895_vm3, %v2397_v26, %v2393_v56  ;;  %v1494_v0 = vpop.xlane.xlu1 %1493  ;;  %v3647_v61 = vadd.f32 %v3457_v8, %v6459_v5  ;;  %v5406_v20 = vpop.eup %5405  ;;  %v2840_v10 = vadd.f32 %v6077_v44, %v6224_v1  ;;  %5417 = vtanh.f32 %v2810_v51 }
 0x214   : > { %v6962_v47 = vsel %vm1923_vm7, %v2180_v22, %v6864_v38  ;;  %v1711_v43 = vadd.f32 %v6459_v5, %v1494_v0  ;;  %v1697_v38 = vadd.f32 %v6459_v5, %v6788_v9  ;;  %v5408_v8 = vpop.eup %5407  ;;  %v2825_v29 = vadd.f32 %v6110_v21, %v6074_v42 }
 0x215   : > { %8688 = vst [vmem:[#allocation24_spill] sm:$0xff] %v6962_v47  ;;  %v4284_v14 = vrot.slane %v3647_v61, %v6471_v58  ;;  %3198 = vadd.xlane.f32.xlu0 %v3197_v33  ;;  %v3470_v61 = vsel %vm1242_vm2, %v3140_v30, 0.0  ;;  %v3515_v33 = vsel %vm1242_vm2, %v3155_v46, 0.0  ;;  %5419 = vtanh.f32 %v2794_v19 }
 0x216   : > { %v2328_v26 = vrot.slane %v1711_v43, %v6530_v4  ;;  %3246 = vadd.xlane.f32.xlu1 %v3245_v37  ;;  %v1449_v25 = vpop.xlane.xlu0 %1448  ;;  %v2259_v31 = vrot.slane %v1697_v38, %v6717_v52  ;;  %v1156_v51 = vmul.f32 %v6941_v3, %v5408_v8  ;;  %5421 = vtanh.f32 %v2840_v10 }
 0x217   : > { %v4289_v56 = vsel %vm1895_vm3, %v4288_v34, %v4284_v14  ;;  %v3463_v17 = vpop.xlane.xlu1 %3462  ;;  %v1696_v22 = vadd.f32 %v6459_v5, %v1449_v25  ;;  %v1141_v34 = vmul.f32 %v6941_v3, %v5404_v48  ;;  %v1276_v48 = vsel %vm1242_vm2, %v1125_v40, 0.0 }
 0x218   : > { %v2329_v9 = vsel %vm1909_vm5, %v2328_v26, %v6904_v59  ;;  %v3649_v0 = vadd.f32 %v3463_v17, %v6459_v5  ;;  %v5410_v26 = vpop.eup %5409  ;;  %v1171_v40 = vmul.f32 %v6941_v3, %v5406_v20  ;;  %5423 = vtanh.f32 %v2825_v29 }
 0x219   : > { %v2254_v43 = vrot.slane %v1696_v22, %v6737_v13  ;;  %3471 = vadd.xlane.f32.xlu0 %v3470_v61  ;;  %v5412_v22 = vpop.eup %5411  ;;  %v2870_v61 = vadd.f32 %v6058_v32, %v6276_v57 }
 0x21a   : > { %v4293_v14 = vrot.slane %v3649_v0, %v6498_v60  ;;  %3516 = vadd.xlane.f32.xlu1 %v3515_v33  ;;  %v1539_v59 = vpop.xlane.xlu0 %1538  ;;  %v1324_v0 = vsel %vm1242_vm2, %v1141_v34, 0.0  ;;  %v2855_v34 = vadd.f32 %v6083_v50, %v6163_v41  ;;  %v1186_v10 = vmul.f32 %v6941_v3, %v5412_v22 }
 0x21b   : > { %v2255_v30 = vsel %vm1916_vm6, %v2254_v43, %v6720_v63  ;;  %v1497_v37 = vpop.xlane.xlu1 %1496  ;;  %v1726_v46 = vadd.f32 %v6459_v5, %v1539_v59  ;;  %v5414_v59 = vpop.eup %5413 }
 0x21c   : > { %v6999_v38 = vsel %vm1902_vm4, %v4293_v14, %v4289_v56  ;;  %v1712_v25 = vadd.f32 %v6459_v5, %v1497_v37  ;;  %v7004_v17 = vsel %vm1923_vm7, %v2259_v31, %v2255_v30  ;;  %v1369_v14 = vsel %vm1242_vm2, %v1156_v51, 0.0  ;;  %v5416_v29 = vpop.eup %5415 }
 0x21d   : > { %v2402_v63 = vrot.slane %v1726_v46, %v6498_v60  ;;  %1277 = vadd.xlane.f32.xlu0 %v1276_v48  ;;  %v1201_v37 = vmul.f32 %v6941_v3, %v5410_v26  ;;  %5425 = vtanh.f32 %v2855_v34  ;;  %v2885_v26 = vadd.f32 %v6064_v36, %v6313_v15 }
 0x21e   : > { %v2333_v19 = vrot.slane %v1712_v25, %v6737_v13  ;;  %1325 = vadd.xlane.f32.xlu1 %v1324_v0  ;;  %v3418_v56 = vpop.xlane.xlu0 %3417  ;;  %5427 = vtanh.f32 %v2870_v61 }
 0x21f   : > { %v2403_v8 = vsel %vm1902_vm4, %v2402_v63, %v6955_v16  ;;  %v1500_v43 = vpop.xlane.xlu1 %1499  ;;  %v3634_v33 = vadd.f32 %v3418_v56, %v6459_v5  ;;  %v1414_v16 = vsel %vm1242_vm2, %v1171_v40, 0.0  ;;  %v5418_v63 = vpop.eup %5417  ;;  %v1459_v40 = vsel %vm1242_vm2, %v1186_v10, 0.0 }
 0x220   : > { %v2334_v20 = vsel %vm1916_vm6, %v2333_v19, %v2329_v9  ;;  %v1713_v31 = vadd.f32 %v6459_v5, %v1500_v43  ;;  %v2900_v9 = vadd.f32 %v6035_v18, %v6390_v6  ;;  %v1216_v18 = vmul.f32 %v6941_v3, %v5414_v59  ;;  %v5420_v19 = vpop.eup %5419 }
 0x221   : > { %v4219_v30 = vrot.slane %v3634_v33, %v6530_v4  ;;  %1370 = vadd.xlane.f32.xlu0 %v1369_v14  ;;  %v1504_v56 = vsel %vm1242_vm2, %v1201_v37, 0.0  ;;  %v1231_v43 = vmul.f32 %v6941_v3, %v5416_v29  ;;  %v880_v33 = vadd.f32 %v6012_v7, %v6114_v28  ;;  %v5422_v59 = vpop.eup %5421 }
 0x222   : > { %v2338_v46 = vrot.slane %v1713_v31, %v6717_v52  ;;  %1415 = vadd.xlane.f32.xlu1 %v1414_v16  ;;  %v1542_v48 = vpop.xlane.xlu0 %1541  ;;  %5429 = vtanh.f32 %v2885_v26  ;;  %v910_v10 = vadd.f32 %v6224_v1, %v6093_v54  ;;  %v3050_v16 = vmul.f32 %v6941_v3, %v5420_v19  ;;  %v5424_v29 = vpop.eup %5423 }
 0x223   : > { %v7029_v25 = vsel %vm1909_vm5, %v4219_v30, %v6945_v24  ;;  %v7031_v51 = vpop.xlane.xlu1 %3183  ;;  %v1727_v22 = vadd.f32 %v6459_v5, %v1542_v48  ;;  %v1549_v30 = vsel %vm1242_vm2, %v1216_v18, 0.0  ;;  %5431 = vtanh.f32 %v2900_v9 }
 0x224   : > { %v7037_v0 = vsel %vm1923_vm7, %v2338_v46, %v2334_v20  ;;  %v864_v20 = vadd.f32 %v5997_v2, %v6114_v28  ;;  %v895_v37 = vadd.f32 %v6074_v42, %v6080_v49  ;;  %v1594_v46 = vsel %vm1242_vm2, %v1231_v43, 0.0 }
 0x225   : > { %8689 = vst [vmem:[#allocation25_spill] sm:$0xff] %v7037_v0  ;;  %v2407_v24 = vrot.slane %v1727_v22, %v6530_v4  ;;  %1460 = vadd.xlane.f32.xlu0 %v1459_v40  ;;  %v3066_v48 = vmul.f32 %v6941_v3, %v5418_v63  ;;  %5433 = vtanh.f32 %v880_v33  ;;  %v940_v26 = vadd.f32 %v6276_v57, %v6069_v39 }
 0x226   : > { %1505 = vadd.xlane.f32.xlu1 %v1504_v56  ;;  %v3466_v34 = vpop.xlane.xlu0 %3465  ;;  %5435 = vtanh.f32 %v864_v20  ;;  %v925_v19 = vadd.f32 %v6163_v41, %v6061_v35  ;;  %v3200_v63 = vsel %vm1242_vm2, %v3050_v16, 0.0  ;;  %v970_v56 = vadd.f32 %v6390_v6, %v6050_v27 }
 0x227   : > { %v2408_v31 = vsel %vm1909_vm5, %v2407_v24, %v2403_v8  ;;  %v7049_v14 = vpop.xlane.xlu1 %1580  ;;  %v3650_v61 = vadd.f32 %v3466_v34, %v6459_v5  ;;  %5437 = vtanh.f32 %v910_v10  ;;  %v3081_v24 = vmul.f32 %v6941_v3, %v5424_v29  ;;  %v5426_v43 = vpop.eup %5425 }
 0x228   : > { %5439 = vtanh.f32 %v895_v37  ;;  %v3248_v33 = vsel %vm1242_vm2, %v3066_v48, 0.0  ;;  %v3096_v34 = vmul.f32 %v6941_v3, %v5422_v59  ;;  %v955_v20 = vadd.f32 %v6313_v15, %v6042_v23 }
 0x229   : > { %v4298_v8 = vrot.slane %v3650_v61, %v6530_v4  ;;  %1550 = vadd.xlane.f32.xlu0 %v1549_v30  ;;  %v5428_v61 = vpop.eup %5427  ;;  %5441 = vtanh.f32 %v940_v26  ;;  %v3293_v37 = vsel %vm1242_vm2, %v3081_v24, 0.0  ;;  %v3111_v29 = vmul.f32 %v6941_v3, %v5426_v43 }
 0x22a   : > { %1595 = vadd.xlane.f32.xlu1 %v1594_v46  ;;  %v1545_v22 = vpop.xlane.xlu0 %1544  ;;  %5443 = vtanh.f32 %v925_v19  ;;  %v3338_v46 = vsel %vm1242_vm2, %v3096_v34, 0.0  ;;  %v3126_v48 = vmul.f32 %v6941_v3, %v5428_v61  ;;  %v2811_v26 = vadd.f32 %v6128_v53, %v6012_v7 }
 0x22b   : > { %v7065_v9 = vsel %vm1909_vm5, %v4298_v8, %v6999_v38  ;;  %v7067_v40 = vpop.xlane.xlu1 %3507  ;;  %v1728_v18 = vadd.f32 %v6459_v5, %v1545_v22  ;;  %5445 = vtanh.f32 %v970_v56  ;;  %v3383_v56 = vsel %vm1242_vm2, %v3111_v29, 0.0 }
 0x22c   : > { %v5430_v8 = vpop.eup %5429  ;;  %5447 = vtanh.f32 %v955_v20 }
 0x22d   : > { %v2412_v38 = vrot.slane %v1728_v18, %v6737_v13  ;;  %3201 = vadd.xlane.f32.xlu0 %v3200_v63  ;;  %v5432_v22 = vpop.eup %5431  ;;  %v3141_v43 = vmul.f32 %v6941_v3, %v5430_v8  ;;  %5449 = vtanh.f32 %v2811_v26 }
 0x22e   : > { %3249 = vadd.xlane.f32.xlu1 %v3248_v33  ;;  %v1548_v10 = vpop.xlane.xlu0 %1547  ;;  %v3428_v33 = vsel %vm1242_vm2, %v3126_v48, 0.0  ;;  %v3156_v34 = vmul.f32 %v6941_v3, %v5432_v22  ;;  %v1740_v48 = vadd.f32 %v6459_v5, %v7049_v14 }
 0x22f   : > { %v2413_v30 = vsel %vm1916_vm6, %v2412_v38, %v2408_v31  ;;  %v1587_v16 = vpop.xlane.xlu1 %1586  ;;  %v1729_v27 = vadd.f32 %v6459_v5, %v1548_v10  ;;  %v5434_v18 = vpop.eup %5433  ;;  %v2795_v10 = vadd.f32 %v6128_v53, %v5997_v2  ;;  %v3473_v29 = vsel %vm1242_vm2, %v3141_v43, 0.0 }
 0x230   : > { %v5436_v24 = vpop.eup %5435  ;;  %v3518_v22 = vsel %vm1242_vm2, %v3156_v34, 0.0  ;;  %v2472_v0 = vrot.slane %v1740_v48, %v6471_v58 }
 0x231   : > { %v2417_v59 = vrot.slane %v1729_v27, %v6717_v52  ;;  %3294 = vadd.xlane.f32.xlu0 %v3293_v37  ;;  %v5438_v38 = vpop.eup %5437  ;;  %v1142_v27 = vmul.f32 %v6941_v3, %v5434_v18  ;;  %v1126_v8 = vmul.f32 %v6941_v3, %v5436_v24  ;;  %5451 = vtanh.f32 %v2795_v10 }
 0x232   : > { %3339 = vadd.xlane.f32.xlu1 %v3338_v46  ;;  %v7088_v31 = vpop.xlane.xlu0 %3231  ;;  %v5440_v20 = vpop.eup %5439  ;;  %v2826_v24 = vadd.f32 %v6098_v62, %v6074_v42 }
 0x233   : > { %v7093_v19 = vsel %vm1923_vm7, %v2417_v59, %v2413_v30  ;;  %v7095_v63 = vpop.xlane.xlu1 %3510  ;;  %v5442_v37 = vpop.eup %5441  ;;  %v1172_v59 = vmul.f32 %v6941_v3, %v5438_v38  ;;  %v1157_v26 = vmul.f32 %v6941_v3, %v5440_v20  ;;  %v1327_v34 = vsel %vm1242_vm2, %v1142_v27, 0.0 }
 0x234   : > { %8690 = vst [vmem:[#allocation26_spill] sm:$0xff] %v7093_v19  ;;  %v5444_v46 = vpop.eup %5443  ;;  %v1202_v20 = vmul.f32 %v6941_v3, %v5442_v37  ;;  %5453 = vtanh.f32 %v2826_v24  ;;  %v2901_v24 = vadd.f32 %v6064_v36, %v6390_v6  ;;  %v8691_v36 = vld [vmem:[#allocation11_spill] sm:$0xff] }
 0x235   : > { %3384 = vadd.xlane.f32.xlu0 %v3383_v56  ;;  %v5446_v56 = vpop.eup %5445  ;;  %v1187_v10 = vmul.f32 %v6941_v3, %v5444_v46  ;;  %v2871_v46 = vadd.f32 %v6083_v50, %v6276_v57 }
 0x236   : > { %3429 = vadd.xlane.f32.xlu1 %v3428_v33  ;;  %v7101_v61 = vpop.xlane.xlu0 %3279  ;;  %v1742_v33 = vadd.f32 %v6459_v5, %v1587_v16  ;;  %v5448_v43 = vpop.eup %5447  ;;  %v1417_v16 = vsel %vm1242_vm2, %v1172_v59, 0.0  ;;  %v1232_v27 = vmul.f32 %v6941_v3, %v5446_v56  ;;  %v2856_v56 = vadd.f32 %v6077_v44, %v6163_v41 }
 0x237   : > { %v1590_v30 = vpop.xlane.xlu1 %1589  ;;  %v1217_v59 = vmul.f32 %v6941_v3, %v5448_v43  ;;  %v1462_v47 = vsel %vm1242_vm2, %v1187_v10, 0.0  ;;  %v3664_v43 = vadd.f32 %v7067_v40, %v6459_v5 }
 0x238   : > { %v1743_v38 = vadd.f32 %v6459_v5, %v1590_v30  ;;  %v2481_v37 = vrot.slane %v1742_v33, %v6498_v60  ;;  %v5450_v33 = vpop.eup %5449 }
 0x239   : > { %3474 = vadd.xlane.f32.xlu0 %v3473_v29  ;;  %v1279_v29 = vsel %vm1242_vm2, %v1126_v8, 0.0 }
 0x23a   : > { %3519 = vadd.xlane.f32.xlu1 %v3518_v22  ;;  %v1584_v18 = vpop.xlane.xlu0 %1583  ;;  %v2841_v22 = vadd.f32 %v6110_v21, %v6224_v1  ;;  %v2486_v48 = vrot.slane %v1743_v38, %v6530_v4  ;;  %v1597_v38 = vsel %vm1242_vm2, %v1232_v27, 0.0  ;;  %v3067_v27 = vmul.f32 %v6941_v3, %v5450_v33 }
 0x23b   : > { %v7117_v19 = vpop.xlane.xlu1 %3423  ;;  %v1741_v14 = vadd.f32 %v6459_v5, %v1584_v18  ;;  %v1372_v18 = vsel %vm1242_vm2, %v1157_v26, 0.0  ;;  %v1507_v26 = vsel %vm1242_vm2, %v1202_v20, 0.0  ;;  %v2886_v20 = vadd.f32 %v6058_v32, %v6313_v15 }
 0x23c   : > { %5455 = vtanh.f32 %v2841_v22  ;;  %v1552_v22 = vsel %vm1242_vm2, %v1217_v59, 0.0  ;;  %v4367_v59 = vrot.slane %v3664_v43, %v6476_v12 }
 0x23d   : > { %v2476_v30 = vrot.slane %v1741_v14, %v6476_v12  ;;  %1280 = vadd.xlane.f32.xlu0 %v1279_v29  ;;  %5457 = vtanh.f32 %v2871_v46  ;;  %v3572_v12 = vadd.f32 %v7088_v31, %v6459_v5 }
 0x23e   : > { %1328 = vadd.xlane.f32.xlu1 %v1327_v34  ;;  %v7132_v8 = vpop.xlane.xlu0 %3327  ;;  %5459 = vtanh.f32 %v2856_v56 }
 0x23f   : > { %v2477_v14 = vsel %vm1895_vm3, %v2476_v30, %v2472_v0  ;;  %v3514_v29 = vpop.xlane.xlu1 %3513  ;;  %v3665_v30 = vadd.f32 %v7095_v63, %v6459_v5  ;;  %5461 = vtanh.f32 %v2901_v24  ;;  %v865_v63 = vadd.f32 %v5997_v2, %v8691_v36 }
 0x240   : > { %v2482_v34 = vsel %vm1902_vm4, %v2481_v37, %v2477_v14  ;;  %v881_v37 = vadd.f32 %v6012_v7, %v8691_v36  ;;  %v3666_v40 = vadd.f32 %v3514_v29, %v6459_v5  ;;  %v5452_v14 = vpop.eup %5451  ;;  %5463 = vtanh.f32 %v2886_v20 }
 0x241   : > { %1373 = vadd.xlane.f32.xlu0 %v1372_v18  ;;  %v2487_v0 = vsel %vm1909_vm5, %v2486_v48, %v2482_v34  ;;  %v896_v29 = vadd.f32 %v6074_v42, %v6114_v28  ;;  %v4372_v56 = vrot.slane %v3665_v30, %v6498_v60  ;;  %v3051_v20 = vmul.f32 %v6941_v3, %v5452_v14  ;;  %v5454_v60 = vpop.eup %5453 }
 0x242   : > { %1418 = vadd.xlane.f32.xlu1 %v1417_v16  ;;  %v3505_v10 = vpop.xlane.xlu0 %3504  ;;  %v911_v16 = vadd.f32 %v6224_v1, %v6080_v49  ;;  %5465 = vtanh.f32 %v881_v37 }
 0x243   : > { %v1593_v18 = vpop.xlane.xlu1 %1592  ;;  %v3663_v48 = vadd.f32 %v3505_v10, %v6459_v5  ;;  %v941_v10 = vadd.f32 %v6276_v57, %v6061_v35  ;;  %5467 = vtanh.f32 %v865_v63 }
 0x244   : > { %v1744_v34 = vadd.f32 %v6459_v5, %v1593_v18  ;;  %v3251_v18 = vsel %vm1242_vm2, %v3067_v27, 0.0  ;;  %5469 = vtanh.f32 %v911_v16  ;;  %v3913_v27 = vrot.slane %v3572_v12, %v6717_v52 }
 0x245   : > { %v4363_v46 = vrot.slane %v3663_v48, %v6471_v58  ;;  %1463 = vadd.xlane.f32.xlu0 %v1462_v47  ;;  %v4377_v58 = vrot.slane %v3666_v40, %v6530_v4  ;;  %v926_v4 = vadd.f32 %v6163_v41, %v6093_v54  ;;  %5471 = vtanh.f32 %v896_v29 }
 0x246   : > { %v2491_v33 = vrot.slane %v1744_v34, %v6737_v13  ;;  %1508 = vadd.xlane.f32.xlu1 %v1507_v26  ;;  %v7171_v24 = vpop.xlane.xlu0 %3375  ;;  %v5456_v40 = vpop.eup %5455  ;;  %v3588_v34 = vadd.f32 %v7101_v61, %v6459_v5  ;;  %v3203_v29 = vsel %vm1242_vm2, %v3051_v20, 0.0  ;;  %5473 = vtanh.f32 %v941_v10  ;;  %v8695_v10 = vld [vmem:[#allocation12_spill] sm:$0xff] }
 0x247   : > { %v4368_v47 = vsel %vm1895_vm3, %v4367_v59, %v4363_v46  ;;  %v3229_v43 = vpop.xlane.xlu1 %3228  ;;  %v3082_v59 = vmul.f32 %v6941_v3, %v5454_v60  ;;  %v5458_v46 = vpop.eup %5457  ;;  %v3097_v61 = vmul.f32 %v6941_v3, %v5456_v40  ;;  %v956_v12 = vadd.f32 %v6313_v15, %v6069_v39 }
 0x248   : > { %v7181_v30 = vsel %vm1916_vm6, %v2491_v33, %v2487_v0  ;;  %v4373_v26 = vsel %vm1902_vm4, %v4372_v56, %v4368_v47  ;;  %v3571_v37 = vadd.f32 %v3229_v43, %v6459_v5  ;;  %v3556_v0 = vadd.f32 %v7031_v51, %v6459_v5  ;;  %v8694_v51 = vld [vmem:[#allocation18_spill] sm:$0xff] }
 0x249   : > { %8692 = vst [vmem:[#allocation11_spill] sm:$0xff] %v7181_v30  ;;  %1553 = vadd.xlane.f32.xlu0 %v1552_v22  ;;  %v7189_v31 = vsel %vm1909_vm5, %v4377_v58, %v4373_v26  ;;  %v971_v22 = vadd.f32 %v6390_v6, %v6042_v23  ;;  %v5460_v23 = vpop.eup %5459  ;;  %5475 = vtanh.f32 %v926_v4  ;;  %v2812_v26 = vadd.f32 %v8695_v10, %v6012_v7 }
 0x24a   : > { %8693 = vst [vmem:[#allocation27_spill] sm:$0xff] %v7189_v31  ;;  %v3908_v48 = vrot.slane %v3571_v37, %v6737_v13  ;;  %1598 = vadd.xlane.f32.xlu1 %v1597_v38  ;;  %v3181_v14 = vpop.xlane.xlu0 %3180  ;;  %v5462_v47 = vpop.eup %5461  ;;  %v3834_v43 = vrot.slane %v3556_v0, %v6717_v52  ;;  %v3992_v40 = vrot.slane %v3588_v34, %v6717_v52  ;;  %v3296_v0 = vsel %vm1242_vm2, %v3082_v59, 0.0 }
 0x24b   : > { %v3277_v63 = vpop.xlane.xlu1 %3276  ;;  %v3555_v16 = vadd.f32 %v3181_v14, %v6459_v5  ;;  %v5464_v37 = vpop.eup %5463  ;;  %v8696_v14 = vld [vmem:[#allocation22_spill] sm:$0xff]  ;;  %v3341_v34 = vsel %vm1242_vm2, %v3097_v61, 0.0  ;;  %5477 = vtanh.f32 %v971_v22  ;;  %vm2548_vm3 = vcmask 1041409  }
 0x24c   : > { %v3909_v56 = vsel %vm1916_vm6, %v3908_v48, %v8694_v51  ;;  %v3587_v38 = vadd.f32 %v3277_v63, %v6459_v5  ;;  %v3604_v48 = vadd.f32 %v7132_v8, %v6459_v5  ;;  %v3127_v8 = vmul.f32 %v6941_v3, %v5458_v46 }
 0x24d   : > { %v3829_v33 = vrot.slane %v3555_v16, %v6737_v13  ;;  %3204 = vadd.xlane.f32.xlu0 %v3203_v29  ;;  %v7210_v58 = vsel %vm1923_vm7, %v3913_v27, %v3909_v56  ;;  %v5466_v16 = vpop.eup %5465  ;;  %v3112_v56 = vmul.f32 %v6941_v3, %v5460_v23  ;;  %v3157_v23 = vmul.f32 %v6941_v3, %v5462_v47 }
 0x24e   : > { %v3987_v60 = vrot.slane %v3587_v38, %v6737_v13  ;;  %3252 = vadd.xlane.f32.xlu1 %v3251_v18  ;;  %v7214_v20 = vpop.xlane.xlu0 %1265  ;;  %v8697_v18 = vld [vmem:[#allocation19_spill] sm:$0xff]  ;;  %v5468_v59 = vpop.eup %5467  ;;  %v4071_v61 = vrot.slane %v3604_v48, %v6717_v52  ;;  %v3142_v22 = vmul.f32 %v6941_v3, %v5464_v37  ;;  %5479 = vtanh.f32 %v956_v12 }
 0x24f   : > { %v3830_v27 = vsel %vm1916_vm6, %v3829_v33, %v8696_v14  ;;  %v3325_v63 = vpop.xlane.xlu1 %3324  ;;  %v5470_v14 = vpop.eup %5469  ;;  %v2842_v46 = vadd.f32 %v6098_v62, %v6224_v1  ;;  %v3386_v47 = vsel %vm1242_vm2, %v3112_v56, 0.0  ;;  %v3431_v48 = vsel %vm1242_vm2, %v3127_v8, 0.0 }
 0x250   : > { %v3988_v51 = vsel %vm1916_vm6, %v3987_v60, %v8697_v18  ;;  %v3603_v4 = vadd.f32 %v3325_v63, %v6459_v5  ;;  %v7229_v38 = vsel %vm1923_vm7, %v3834_v43, %v3830_v27  ;;  %v2796_v43 = vadd.f32 %v8695_v10, %v5997_v2 }
 0x251   : > { %3297 = vadd.xlane.f32.xlu0 %v3296_v0  ;;  %v7234_v29 = vsel %vm1923_vm7, %v3992_v40, %v3988_v51  ;;  %v5472_v40 = vpop.eup %5471  ;;  %v1143_v0 = vmul.f32 %v6941_v3, %v5466_v16  ;;  %v2827_v18 = vadd.f32 %v6128_v53, %v6074_v42  ;;  %5481 = vtanh.f32 %v2812_v26 }
 0x252   : > { %v4066_v33 = vrot.slane %v3603_v4, %v6737_v13  ;;  %3342 = vadd.xlane.f32.xlu1 %v3341_v34  ;;  %v7237_v60 = vpop.xlane.xlu0 %1361  ;;  %v5474_v37 = vpop.eup %5473  ;;  %v3521_v4 = vsel %vm1242_vm2, %v3157_v23, 0.0  ;;  %v1173_v56 = vmul.f32 %v6941_v3, %v5470_v14  ;;  %5483 = vtanh.f32 %v2796_v43  ;;  %v8698_v43 = vld [vmem:[#allocation17_spill] sm:$0xff] }
 0x253   : > { %v7243_v27 = vpop.xlane.xlu1 %1313  ;;  %v3620_v16 = vadd.f32 %v7171_v24, %v6459_v5  ;;  %v3476_v26 = vsel %vm1242_vm2, %v3142_v22, 0.0  ;;  %5485 = vtanh.f32 %v2842_v46  ;;  %v1158_v23 = vmul.f32 %v6941_v3, %v5472_v40 }
 0x254   : > { %v4067_v63 = vsel %vm1916_vm6, %v4066_v33, %v6918_v11  ;;  %v1127_v11 = vmul.f32 %v6941_v3, %v5468_v59  ;;  %v5476_v33 = vpop.eup %5475  ;;  %5487 = vtanh.f32 %v2827_v18  ;;  %v1925_v14 = vadd.s32 4294967248, %v8698_v43 }
 0x255   : > { %3387 = vadd.xlane.f32.xlu0 %v3386_v47  ;;  %v7256_v12 = vsel %vm1923_vm7, %v4071_v61, %v4067_v63  ;;  %v1330_v63 = vsel %vm1242_vm2, %v1143_v0, 0.0  ;;  %v1203_v24 = vmul.f32 %v6941_v3, %v5474_v37  ;;  %v2872_v47 = vadd.f32 %v6077_v44, %v6276_v57  ;;  %v5478_v18 = vpop.eup %5477 }
 0x256   : > { %3432 = vadd.xlane.f32.xlu1 %v3431_v48  ;;  %v3469_v51 = vpop.xlane.xlu0 %3468  ;;  %v1932_v22 = vadd.s32 4294967240, %v8698_v43  ;;  %v1282_v40 = vsel %vm1242_vm2, %v1127_v11, 0.0  ;;  %v1420_v0 = vsel %vm1242_vm2, %v1173_v56, 0.0  ;;  %v4150_v37 = vrot.slane %v3620_v16, %v6717_v52  ;;  %v8701_v16 = vld [vmem:[#allocation9_spill] sm:$0xff] }
 0x257   : > { %v3373_v34 = vpop.xlane.xlu1 %3372  ;;  %v3651_v8 = vadd.f32 %v3469_v51, %v6459_v5  ;;  %v3636_v51 = vadd.f32 %v7117_v19, %v6459_v5  ;;  %v1375_v56 = vsel %vm1242_vm2, %v1158_v23, 0.0  ;;  %v1188_v30 = vmul.f32 %v6941_v3, %v5476_v33 }
 0x258   : > { %v3619_v61 = vadd.f32 %v3373_v34, %v6459_v5  ;;  %v5480_v19 = vpop.eup %5479  ;;  %v7294_v31 = vsub.s32 %v1925_v14, %v8701_v16  ;;  %5489 = vtanh.f32 %v2872_v47  ;;  %vm2550_vm4 = vcmask 1042434  }
 0x259   : > { %v4303_v59 = vrot.slane %v3651_v8, %v6737_v13  ;;  %3477 = vadd.xlane.f32.xlu0 %v3476_v26  ;;  %v8700_v26 = vld [vmem:[#allocation21_spill] sm:$0xff]  ;;  %vm2552_vm5 = vcmask 1043459  }
 0x25a   : > { %v4145_v46 = vrot.slane %v3619_v61, %v6737_v13  ;;  %3522 = vadd.xlane.f32.xlu1 %v3521_v4  ;;  %v7275_v48 = vpop.xlane.xlu0 %1457  ;;  %v2857_v4 = vadd.f32 %v6110_v21, %v6163_v41 }
 0x25b   : > { %v7284_v34 = vsel %vm1916_vm6, %v4303_v59, %v7065_v9  ;;  %v3421_v8 = vpop.xlane.xlu1 %3420  ;;  %v1510_v9 = vsel %vm1242_vm2, %v1203_v24, 0.0  ;;  %v5482_v14 = vpop.eup %5481 }
 0x25c   : > { %8699 = vst [vmem:[#allocation18_spill] sm:$0xff] %v7284_v34  ;;  %v4146_v61 = vsel %vm1916_vm6, %v4145_v46, %v8700_v26  ;;  %v3635_v11 = vadd.f32 %v3421_v8, %v6459_v5  ;;  %v7301_v34 = vsub.s32 %v1932_v22, %v8701_v16  ;;  %v1635_v46 = vadd.f32 %v6459_v5, %v7214_v20 }
 0x25d   : > { %1283 = vadd.xlane.f32.xlu0 %v1282_v40  ;;  %v7298_v59 = vsel %vm1923_vm7, %v4150_v37, %v4146_v61  ;;  %v1233_v40 = vmul.f32 %v6941_v3, %v5478_v18  ;;  %v4229_v8 = vrot.slane %v3636_v51, %v6717_v52  ;;  %5491 = vtanh.f32 %v2857_v4  ;;  %v5484_v37 = vpop.eup %5483  ;;  %v8702_v61 = vld [vmem:[#allocation14_spill] sm:$0xff] }
 0x25e   : > { %v4224_v23 = vrot.slane %v3635_v11, %v6737_v13  ;;  %1331 = vadd.xlane.f32.xlu1 %v1330_v63  ;;  %v1263_v33 = vpop.xlane.xlu0 %1262  ;;  %v2902_v22 = vadd.f32 %v6058_v32, %v6390_v6  ;;  %v1218_v63 = vmul.f32 %v6941_v3, %v5480_v19  ;;  %v2887_v18 = vadd.f32 %v6083_v50, %v6313_v15  ;;  %v7316_v26 = vpop.eup %5485 }
 0x25f   : > { %v1410_v24 = vpop.xlane.xlu1 %1409  ;;  %v1634_v47 = vadd.f32 %v6459_v5, %v1263_v33  ;;  %v882_v4 = vadd.f32 %v6012_v7, %v8702_v61  ;;  %v5488_v11 = vpop.eup %5487  ;;  %v1667_v19 = vadd.f32 %v6459_v5, %v7237_v60  ;;  %v1465_v33 = vsel %vm1242_vm2, %v1188_v30, 0.0 }
 0x260   : > { %v4225_v20 = vsel %vm1916_vm6, %v4224_v23, %v7029_v25  ;;  %v1936_v25 = vrot.slane %v1635_v46, %v7301_v34  ;;  %5493 = vtanh.f32 %v2902_v22  ;;  %v1555_v60 = vsel %vm1242_vm2, %v1218_v63, 0.0 }
 0x261   : > { %v1929_v51 = vrot.slane %v1634_v47, %v7294_v31  ;;  %1376 = vadd.xlane.f32.xlu0 %v1375_v56  ;;  %v7322_v32 = vsel %vm1923_vm7, %v4229_v8, %v4225_v20  ;;  %v866_v56 = vadd.f32 %v5997_v2, %v8702_v61  ;;  %v1651_v47 = vadd.f32 %v6459_v5, %v7243_v27 }
 0x262   : > { %1421 = vadd.xlane.f32.xlu1 %v1420_v0  ;;  %v1359_v23 = vpop.xlane.xlu0 %1358  ;;  %5495 = vtanh.f32 %v2887_v18  ;;  %v3052_v27 = vmul.f32 %v6941_v3, %v5484_v37  ;;  %v1699_v22 = vadd.f32 %v6459_v5, %v7275_v48 }
 0x263   : > { %v1931_v8 = vsel %vm1930_vm8, %v1929_v51, %v6869_v45  ;;  %v1311_v20 = vpop.xlane.xlu1 %1310  ;;  %v1666_v13 = vadd.f32 %v6459_v5, %v1359_v23  ;;  %5497 = vtanh.f32 %v882_v4  ;;  %v912_v45 = vadd.f32 %v6224_v1, %v6114_v28 }
 0x264   : > { %v1650_v46 = vadd.f32 %v6459_v5, %v1311_v20  ;;  %v7338_v30 = vsel %vm1937_vm9, %v1936_v25, %v1931_v8  ;;  %v2111_v51 = vrot.slane %v1667_v19, %v7301_v34  ;;  %5499 = vtanh.f32 %v866_v56  ;;  %v5490_v25 = vpop.eup %5489  ;;  %v8703_v19 = vld [vmem:[#allocation23_spill] sm:$0xff] }
 0x265   : > { %v2106_v0 = vrot.slane %v1666_v13, %v7294_v31  ;;  %1466 = vadd.xlane.f32.xlu0 %v1465_v33  ;;  %v2032_v13 = vrot.slane %v1651_v47, %v7301_v34  ;;  %v1683_v23 = vadd.f32 %v6459_v5, %v1410_v24  ;;  %v1600_v20 = vsel %vm1242_vm2, %v1233_v40, 0.0 }
 0x266   : > { %v2027_v63 = vrot.slane %v1650_v46, %v7294_v31  ;;  %1511 = vadd.xlane.f32.xlu1 %v1510_v9  ;;  %v1455_v18 = vpop.xlane.xlu0 %1454  ;;  %v897_v9 = vadd.f32 %v6074_v42, %v8691_v36  ;;  %5501 = vtanh.f32 %v912_v45  ;;  %v942_v45 = vadd.f32 %v6276_v57, %v6093_v54 }
 0x267   : > { %v2107_v37 = vsel %vm1930_vm8, %v2106_v0, %v6888_v55  ;;  %v1407_v4 = vpop.xlane.xlu1 %1406  ;;  %v1698_v33 = vadd.f32 %v6459_v5, %v1455_v18  ;;  %v5492_v47 = vpop.eup %5491  ;;  %v3068_v55 = vmul.f32 %v6941_v3, %v5482_v14  ;;  %v2269_v0 = vrot.slane %v1699_v22, %v7301_v34 }
 0x268   : > { %v2028_v8 = vsel %vm1930_vm8, %v2027_v63, %v8703_v19  ;;  %v1682_v48 = vadd.f32 %v6459_v5, %v1407_v4  ;;  %v7359_v56 = vsel %vm1937_vm9, %v2111_v51, %v2107_v37  ;;  %v3206_v51 = vsel %vm1242_vm2, %v3052_v27, 0.0 }
 0x269   : > { %v2264_v24 = vrot.slane %v1698_v33, %v7294_v31  ;;  %1556 = vadd.xlane.f32.xlu0 %v1555_v60  ;;  %v7365_v46 = vsel %vm1937_vm9, %v2032_v13, %v2028_v8  ;;  %v3083_v37 = vmul.f32 %v6941_v3, %v5488_v11  ;;  %v2190_v4 = vrot.slane %v1683_v23, %v7301_v34  ;;  %v8704_v13 = vld [vmem:[#allocation24_spill] sm:$0xff] }
 0x26a   : > { %v2185_v63 = vrot.slane %v1682_v48, %v7294_v31  ;;  %1601 = vadd.xlane.f32.xlu1 %v1600_v20  ;;  %v3238_v18 = vpop.xlane.xlu0 %3237  ;;  %v927_v14 = vadd.f32 %v6163_v41, %v6080_v49  ;;  %5503 = vtanh.f32 %v897_v9  ;;  %v5494_v11 = vpop.eup %5493  ;;  %v3254_v23 = vsel %vm1242_vm2, %v3068_v55, 0.0  ;;  %v8706_v55 = vld [vmem:[#allocation25_spill] sm:$0xff] }
 0x26b   : > { %v2265_v40 = vsel %vm1930_vm8, %v2264_v24, %v7004_v17  ;;  %v1503_v60 = vpop.xlane.xlu1 %1502  ;;  %v3098_v17 = vmul.f32 %v6941_v3, %v7316_v26  ;;  %v3299_v26 = vsel %vm1242_vm2, %v3083_v37, 0.0 }
 0x26c   : > { %v2186_v22 = vsel %vm1930_vm8, %v2185_v63, %v8704_v13  ;;  %v1714_v33 = vadd.f32 %v6459_v5, %v1503_v60  ;;  %v7380_v27 = vsel %vm1937_vm9, %v2269_v0, %v2265_v40  ;;  %v5496_v8 = vpop.eup %5495  ;;  %5505 = vtanh.f32 %v927_v14 }
 0x26d   : > { %8705 = vst [vmem:[#allocation12_spill] sm:$0xff] %v7380_v27  ;;  %3207 = vadd.xlane.f32.xlu0 %v3206_v51  ;;  %v7388_v19 = vsel %vm1937_vm9, %v2190_v4, %v2186_v22  ;;  %v5498_v24 = vpop.eup %5497  ;;  %v3113_v51 = vmul.f32 %v6941_v3, %v5492_v47  ;;  %v972_v4 = vadd.f32 %v6390_v6, %v6069_v39  ;;  %v3344_v40 = vsel %vm1242_vm2, %v3098_v17, 0.0  ;;  %v8708_v22 = vld [vmem:[#allocation16_spill] sm:$0xff] }
 0x26e   : > { %v2343_v48 = vrot.slane %v1714_v33, %v7294_v31  ;;  %3255 = vadd.xlane.f32.xlu1 %v3254_v23  ;;  %v3286_v9 = vpop.xlane.xlu0 %3285  ;;  %v5500_v0 = vpop.eup %5499  ;;  %v3128_v60 = vmul.f32 %v6941_v3, %v5490_v25  ;;  %5507 = vtanh.f32 %v942_v45  ;;  %v957_v14 = vadd.f32 %v6313_v15, %v6061_v35 }
 0x26f   : > { %v3190_v20 = vpop.xlane.xlu1 %3189  ;;  %v2813_v33 = vadd.f32 %v8708_v22, %v6012_v7  ;;  %v3158_v47 = vmul.f32 %v6941_v3, %v5494_v11  ;;  %v3389_v39 = vsel %vm1242_vm2, %v3113_v51, 0.0  ;;  %v3143_v23 = vmul.f32 %v6941_v3, %v5496_v8 }
 0x270   : > { %v7393_v63 = vsel %vm1930_vm8, %v2343_v48, %v8706_v55  ;;  %v1144_v17 = vmul.f32 %v6941_v3, %v5498_v24  ;;  %5509 = vtanh.f32 %v972_v4  ;;  %v5502_v25 = vpop.eup %5501  ;;  %v3434_v45 = vsel %vm1242_vm2, %v3128_v60, 0.0 }
 0x271   : > { %8707 = vst [vmem:[#allocation22_spill] sm:$0xff] %v7393_v63  ;;  %3300 = vadd.xlane.f32.xlu0 %v3299_v26  ;;  %v1128_v48 = vmul.f32 %v6941_v3, %v5500_v0  ;;  %5511 = vtanh.f32 %v957_v14  ;;  %v2797_v55 = vadd.f32 %v8708_v22, %v5997_v2  ;;  %v3558_v11 = vadd.f32 %v3190_v20, %v6459_v5 }
 0x272   : > { %3345 = vadd.xlane.f32.xlu1 %v3344_v40  ;;  %v3382_v13 = vpop.xlane.xlu0 %3381  ;;  %5513 = vtanh.f32 %v2813_v33  ;;  %v2843_v8 = vadd.f32 %v6128_v53, %v6224_v1  ;;  %v3574_v24 = vadd.f32 %v3238_v18, %v6459_v5  ;;  %v3524_v3 = vsel %vm1242_vm2, %v3158_v47, 0.0  ;;  %v7429_v33 = vld [vmem:[%s8648_s7] ss:$0 sm:$0xff] }
 0x273   : > { %v7405_v37 = vpop.xlane.xlu1 %3333  ;;  %v2828_v0 = vadd.f32 %v8695_v10, %v6074_v42  ;;  %v3479_v20 = vsel %vm1242_vm2, %v3143_v23, 0.0  ;;  %v1333_v14 = vsel %vm1242_vm2, %v1144_v17, 0.0  ;;  %v1174_v18 = vmul.f32 %v7429_v33, %v5502_v25 }
 0x274   : > { %v5504_v26 = vpop.eup %5503  ;;  %v1285_v47 = vsel %vm1242_vm2, %v1128_v48, 0.0  ;;  %5515 = vtanh.f32 %v2797_v55  ;;  %v3844_v23 = vrot.slane %v3558_v11, %v7301_v34  ;;  %v2873_v25 = vadd.f32 %v6110_v21, %v6276_v57 }
 0x275   : > { %3390 = vadd.xlane.f32.xlu0 %v3389_v39  ;;  %5517 = vtanh.f32 %v2843_v8 }
 0x276   : > { %3435 = vadd.xlane.f32.xlu1 %v3434_v45  ;;  %v3187_v51 = vpop.xlane.xlu0 %3186  ;;  %v5506_v39 = vpop.eup %5505  ;;  %5519 = vtanh.f32 %v2828_v0 }
 0x277   : > { %v3235_v4 = vpop.xlane.xlu1 %3234  ;;  %v3557_v40 = vadd.f32 %v3187_v51, %v6459_v5  ;;  %v1159_v51 = vmul.f32 %v7429_v33, %v5504_v26  ;;  %v1189_v8 = vmul.f32 %v7429_v33, %v5506_v39  ;;  %5521 = vtanh.f32 %v2873_v25 }
 0x278   : > { %v3573_v60 = vadd.f32 %v3235_v4, %v6459_v5  ;;  %v5508_v63 = vpop.eup %5507 }
 0x279   : > { %v3839_v45 = vrot.slane %v3557_v40, %v7294_v31  ;;  %3480 = vadd.xlane.f32.xlu0 %v3479_v20  ;;  %v3923_v40 = vrot.slane %v3574_v24, %v7301_v34  ;;  %v3590_v20 = vadd.f32 %v3286_v9, %v6459_v5  ;;  %v1423_v24 = vsel %vm1242_vm2, %v1174_v18, 0.0 }
 0x27a   : > { %v3918_v17 = vrot.slane %v3573_v60, %v7294_v31  ;;  %3525 = vadd.xlane.f32.xlu1 %v3524_v3  ;;  %v7437_v4 = vpop.xlane.xlu0 %1271  ;;  %v1378_v9 = vsel %vm1242_vm2, %v1159_v51, 0.0  ;;  %v5510_v60 = vpop.eup %5509  ;;  %v2903_v18 = vadd.f32 %v6083_v50, %v6390_v6  ;;  %v2888_v50 = vadd.f32 %v6077_v44, %v6313_v15 }
 0x27b   : > { %v3840_v48 = vsel %vm1930_vm8, %v3839_v45, %v7229_v38  ;;  %v3283_v55 = vpop.xlane.xlu1 %3282  ;;  %v2858_v38 = vadd.f32 %v6098_v62, %v6163_v41  ;;  %v4002_v51 = vrot.slane %v3590_v20, %v7301_v34 }
 0x27c   : > { %v3919_v26 = vsel %vm1930_vm8, %v3918_v17, %v7210_v58  ;;  %v3589_v11 = vadd.f32 %v3283_v55, %v6459_v5  ;;  %v7450_v3 = vsel %vm1937_vm9, %v3844_v23, %v3840_v48  ;;  %v3622_v58 = vadd.f32 %v3382_v13, %v6459_v5 }
 0x27d   : > { %1286 = vadd.xlane.f32.xlu0 %v1285_v47  ;;  %v7457_v0 = vsel %vm1937_vm9, %v3923_v40, %v3919_v26  ;;  %v1204_v23 = vmul.f32 %v7429_v33, %v5508_v63  ;;  %v5512_v47 = vpop.eup %5511  ;;  %v3606_v17 = vadd.f32 %v7405_v37, %v6459_v5  ;;  %v1468_v63 = vsel %vm1242_vm2, %v1189_v8, 0.0 }
 0x27e   : > { %v3997_v45 = vrot.slane %v3589_v11, %v7294_v31  ;;  %1334 = vadd.xlane.f32.xlu1 %v1333_v14  ;;  %v3379_v39 = vpop.xlane.xlu0 %3378  ;;  %v5514_v13 = vpop.eup %5513  ;;  %v1939_v37 = vadd.s32 4294967232, %v8698_v43  ;;  %v1234_v26 = vmul.f32 %v7429_v33, %v5510_v60  ;;  %v4160_v11 = vrot.slane %v3622_v58, %v7301_v34 }
 0x27f   : > { %v3331_v40 = vpop.xlane.xlu1 %3330  ;;  %v3621_v48 = vadd.f32 %v3379_v39, %v6459_v5  ;;  %v1219_v39 = vmul.f32 %v7429_v33, %v5512_v47  ;;  %5523 = vtanh.f32 %v2858_v38 }
 0x280   : > { %v3998_v14 = vsel %vm1930_vm8, %v3997_v45, %v7234_v29  ;;  %v3605_v55 = vadd.f32 %v3331_v40, %v6459_v5  ;;  %v1946_v29 = vadd.s32 4294967224, %v8698_v43  ;;  %v5516_v40 = vpop.eup %5515  ;;  %5525 = vtanh.f32 %v2903_v18 }
 0x281   : > { %v4155_v20 = vrot.slane %v3621_v48, %v7294_v31  ;;  %1379 = vadd.xlane.f32.xlu0 %v1378_v9  ;;  %v7478_v25 = vsel %vm1937_vm9, %v4002_v51, %v3998_v14  ;;  %v4081_v9 = vrot.slane %v3606_v17, %v7301_v34  ;;  %v3069_v51 = vmul.f32 %v7429_v33, %v5514_v13  ;;  %v5518_v14 = vpop.eup %5517 }
 0x282   : > { %v4076_v45 = vrot.slane %v3605_v55, %v7294_v31  ;;  %1424 = vadd.xlane.f32.xlu1 %v1423_v24  ;;  %v1368_v8 = vpop.xlane.xlu0 %1367  ;;  %v8709_v55 = vld [vmem:[#allocation13_spill] sm:$0xff]  ;;  %v5520_v27 = vpop.eup %5519  ;;  %v1513_v17 = vsel %vm1242_vm2, %v1204_v23, 0.0  ;;  %v1603_v38 = vsel %vm1242_vm2, %v1234_v26, 0.0  ;;  %v1637_v18 = vadd.f32 %v6459_v5, %v7437_v4 }
 0x283   : > { %v4156_v48 = vsel %vm1930_vm8, %v4155_v20, %v7298_v59  ;;  %v1320_v60 = vpop.xlane.xlu1 %1319  ;;  %v883_v24 = vadd.f32 %v6012_v7, %v8709_v55  ;;  %v7497_v59 = vsub.s32 %v1939_v37, %v8701_v16  ;;  %5527 = vtanh.f32 %v2888_v50 }
 0x284   : > { %v4077_v58 = vsel %vm1930_vm8, %v4076_v45, %v7256_v12  ;;  %v7493_v47 = vsel %vm1937_vm9, %v4160_v11, %v4156_v48  ;;  %v7504_v12 = vsub.s32 %v1946_v29, %v8701_v16  ;;  %v1558_v11 = vsel %vm1242_vm2, %v1219_v39, 0.0 }
 0x285   : > { %1469 = vadd.xlane.f32.xlu0 %v1468_v63  ;;  %v7501_v13 = vsel %vm1937_vm9, %v4081_v9, %v4077_v58  ;;  %v3257_v37 = vsel %vm1242_vm2, %v3069_v51, 0.0  ;;  %v3053_v26 = vmul.f32 %v7429_v33, %v5516_v40  ;;  %v867_v45 = vadd.f32 %v5997_v2, %v8709_v55  ;;  %v5522_v9 = vpop.eup %5521 }
 0x286   : > { %1514 = vadd.xlane.f32.xlu1 %v1513_v17  ;;  %v1269_v20 = vpop.xlane.xlu0 %1268  ;;  %v3099_v4 = vmul.f32 %v7429_v33, %v5518_v14  ;;  %5529 = vtanh.f32 %v883_v24  ;;  %v3084_v50 = vmul.f32 %v7429_v33, %v5520_v27  ;;  %v913_v48 = vadd.f32 %v6224_v1, %v8691_v36 }
 0x287   : > { %v3427_v23 = vpop.xlane.xlu1 %3426  ;;  %v1636_v63 = vadd.f32 %v6459_v5, %v1269_v20  ;;  %v1950_v40 = vrot.slane %v1637_v18, %v7504_v12  ;;  %v1669_v51 = vadd.f32 %v6459_v5, %v1368_v8  ;;  %v898_v14 = vadd.f32 %v6074_v42, %v8702_v61 }
 0x288   : > { %v3637_v29 = vadd.f32 %v3427_v23, %v6459_v5  ;;  %v1653_v24 = vadd.f32 %v6459_v5, %v1320_v60  ;;  %5531 = vtanh.f32 %v867_v45  ;;  %v943_v45 = vadd.f32 %v6276_v57, %v6080_v49 }
 0x289   : > { %v1943_v39 = vrot.slane %v1636_v63, %v7497_v59  ;;  %1559 = vadd.xlane.f32.xlu0 %v1558_v11  ;;  %v5524_v63 = vpop.eup %5523  ;;  %5533 = vtanh.f32 %v898_v14 }
 0x28a   : > { %v4234_v58 = vrot.slane %v3637_v29, %v7294_v31  ;;  %1604 = vadd.xlane.f32.xlu1 %v1603_v38  ;;  %v1365_v17 = vpop.xlane.xlu0 %1364  ;;  %v3209_v38 = vsel %vm1242_vm2, %v3053_v26, 0.0  ;;  %v3129_v29 = vmul.f32 %v7429_v33, %v5522_v9  ;;  %5535 = vtanh.f32 %v913_v48 }
 0x28b   : > { %v1945_v27 = vsel %vm1944_vm10, %v1943_v39, %v7338_v30  ;;  %v1317_v20 = vpop.xlane.xlu1 %1316  ;;  %v1668_v11 = vadd.f32 %v6459_v5, %v1365_v17  ;;  %v3347_v30 = vsel %vm1242_vm2, %v3099_v4, 0.0  ;;  %v2121_v39 = vrot.slane %v1669_v51, %v7504_v12 }
 0x28c   : > { %v7531_v18 = vsel %vm1930_vm8, %v4234_v58, %v7322_v32  ;;  %v1652_v8 = vadd.f32 %v6459_v5, %v1317_v20  ;;  %v7536_v23 = vsel %vm1951_vm11, %v1950_v40, %v1945_v27  ;;  %v5526_v32 = vpop.eup %5525  ;;  %v928_v40 = vadd.f32 %v6163_v41, %v6114_v28 }
 0x28d   : > { %v2116_v60 = vrot.slane %v1668_v11, %v7497_v59  ;;  %3210 = vadd.xlane.f32.xlu0 %v3209_v38  ;;  %v2042_v17 = vrot.slane %v1653_v24, %v7504_v12  ;;  %v3302_v27 = vsel %vm1242_vm2, %v3084_v50, 0.0  ;;  %v5528_v20 = vpop.eup %5527  ;;  %v3114_v14 = vmul.f32 %v7429_v33, %v5524_v63 }
 0x28e   : > { %v2037_v58 = vrot.slane %v1652_v8, %v7497_v59  ;;  %3258 = vadd.xlane.f32.xlu1 %v3257_v37  ;;  %v3196_v26 = vpop.xlane.xlu0 %3195  ;;  %v3159_v24 = vmul.f32 %v7429_v33, %v5526_v32  ;;  %5537 = vtanh.f32 %v943_v45  ;;  %v973_v50 = vadd.f32 %v6390_v6, %v6061_v35  ;;  %v8710_v32 = vld [vmem:[#allocation15_spill] sm:$0xff] }
 0x28f   : > { %v2117_v4 = vsel %vm1944_vm10, %v2116_v60, %v7359_v56  ;;  %v1413_v9 = vpop.xlane.xlu1 %1412  ;;  %5539 = vtanh.f32 %v928_v40  ;;  %v958_v38 = vadd.f32 %v6313_v15, %v6093_v54  ;;  %v3144_v60 = vmul.f32 %v7429_v33, %v5528_v20 }
 0x290   : > { %v2038_v51 = vsel %vm1944_vm10, %v2037_v58, %v7365_v46  ;;  %v1684_v37 = vadd.f32 %v6459_v5, %v1413_v9  ;;  %v7556_v11 = vsel %vm1951_vm11, %v2121_v39, %v2117_v4  ;;  %v5530_v48 = vpop.eup %5529  ;;  %v2814_v39 = vadd.f32 %v8710_v32, %v6012_v7 }
 0x291   : > { %3303 = vadd.xlane.f32.xlu0 %v3302_v27  ;;  %v7560_v56 = vsel %vm1951_vm11, %v2042_v17, %v2038_v51  ;;  %v3392_v35 = vsel %vm1242_vm2, %v3114_v14, 0.0  ;;  %v3437_v40 = vsel %vm1242_vm2, %v3129_v29, 0.0  ;;  %v3527_v17 = vsel %vm1242_vm2, %v3159_v24, 0.0 }
 0x292   : > { %v2195_v46 = vrot.slane %v1684_v37, %v7497_v59  ;;  %3348 = vadd.xlane.f32.xlu1 %v3347_v30  ;;  %v3292_v8 = vpop.xlane.xlu0 %3291  ;;  %v2798_v30 = vadd.f32 %v8710_v32, %v5997_v2  ;;  %v5532_v58 = vpop.eup %5531  ;;  %v1145_v4 = vmul.f32 %v7429_v33, %v5530_v48  ;;  %5541 = vtanh.f32 %v973_v50 }
 0x293   : > { %v3244_v63 = vpop.xlane.xlu1 %3243  ;;  %v3560_v7 = vadd.f32 %v3196_v26, %v6459_v5  ;;  %5543 = vtanh.f32 %v958_v38  ;;  %v2829_v2 = vadd.f32 %v8708_v22, %v6074_v42  ;;  %v3482_v51 = vsel %vm1242_vm2, %v3144_v60, 0.0  ;;  %v5534_v37 = vpop.eup %5533 }
 0x294   : > { %v7572_v45 = vsel %vm1944_vm10, %v2195_v46, %v7388_v19  ;;  %v2844_v19 = vadd.f32 %v8695_v10, %v6224_v1  ;;  %v3576_v27 = vadd.f32 %v3244_v63, %v6459_v5  ;;  %5545 = vtanh.f32 %v2814_v39  ;;  %v5536_v50 = vpop.eup %5535 }
 0x295   : > { %3393 = vadd.xlane.f32.xlu0 %v3392_v35  ;;  %v1129_v14 = vmul.f32 %v7429_v33, %v5532_v58  ;;  %5547 = vtanh.f32 %v2798_v30  ;;  %v2874_v24 = vadd.f32 %v6098_v62, %v6276_v57  ;;  %v1336_v46 = vsel %vm1242_vm2, %v1145_v4, 0.0 }
 0x296   : > { %3438 = vadd.xlane.f32.xlu1 %v3437_v40  ;;  %v3193_v9 = vpop.xlane.xlu0 %3192  ;;  %v1953_v38 = vadd.s32 4294967216, %v8698_v43  ;;  %v2859_v63 = vadd.f32 %v6128_v53, %v6163_v41  ;;  %v3854_v60 = vrot.slane %v3560_v7, %v7504_v12  ;;  %v3592_v39 = vadd.f32 %v3292_v8, %v6459_v5 }
 0x297   : > { %v3241_v29 = vpop.xlane.xlu1 %3240  ;;  %v3559_v20 = vadd.f32 %v3193_v9, %v6459_v5  ;;  %5549 = vtanh.f32 %v2829_v2  ;;  %v3933_v40 = vrot.slane %v3576_v27, %v7504_v12 }
 0x298   : > { %v3575_v26 = vadd.f32 %v3241_v29, %v6459_v5  ;;  %v5538_v58 = vpop.eup %5537  ;;  %5551 = vtanh.f32 %v2844_v19 }
 0x299   : > { %v3849_v48 = vrot.slane %v3559_v20, %v7497_v59  ;;  %3483 = vadd.xlane.f32.xlu0 %v3482_v51  ;;  %v1160_v20 = vmul.f32 %v7429_v33, %v5534_v37  ;;  %v5540_v51 = vpop.eup %5539  ;;  %5553 = vtanh.f32 %v2859_v63 }
 0x29a   : > { %v3928_v35 = vrot.slane %v3575_v26, %v7497_v59  ;;  %3528 = vadd.xlane.f32.xlu1 %v3527_v17  ;;  %v3289_v30 = vpop.xlane.xlu0 %3288  ;;  %v1288_v17 = vsel %vm1242_vm2, %v1129_v14, 0.0  ;;  %v1175_v26 = vmul.f32 %v7429_v33, %v5536_v50  ;;  %v1205_v14 = vmul.f32 %v7429_v33, %v5538_v58 }
 0x29b   : > { %v3850_v4 = vsel %vm1944_vm10, %v3849_v48, %v7450_v3  ;;  %v3337_v9 = vpop.xlane.xlu1 %3336  ;;  %v3591_v29 = vadd.f32 %v3289_v30, %v6459_v5  ;;  %v7612_v3 = vsub.s32 %v1953_v38, %v8701_v16  ;;  %v4012_v48 = vrot.slane %v3592_v39, %v7504_v12 }
 0x29c   : > { %v3929_v8 = vsel %vm1944_vm10, %v3928_v35, %v7457_v0  ;;  %v3607_v7 = vadd.f32 %v3337_v9, %v6459_v5  ;;  %v3855_v2 = vsel %vm1951_vm11, %v3854_v60, %v3850_v4  ;;  %v5542_v60 = vpop.eup %5541  ;;  %v1381_v50 = vsel %vm1242_vm2, %v1160_v20, 0.0 }
 0x29d   : > { %v4007_v27 = vrot.slane %v3591_v29, %v7497_v59  ;;  %1289 = vadd.xlane.f32.xlu0 %v1288_v17  ;;  %v3934_v37 = vsel %vm1951_vm11, %v3933_v40, %v3929_v8  ;;  %v1190_v40 = vmul.f32 %v7429_v33, %v5540_v51  ;;  %v5544_v9 = vpop.eup %5543  ;;  %v1426_v29 = vsel %vm1242_vm2, %v1175_v26, 0.0 }
 0x29e   : > { %v4086_v0 = vrot.slane %v3607_v7, %v7497_v59  ;;  %1337 = vadd.xlane.f32.xlu1 %v1336_v46  ;;  %v1275_v35 = vpop.xlane.xlu0 %1274  ;;  %v5546_v58 = vpop.eup %5545  ;;  %v2889_v20 = vadd.f32 %v6110_v21, %v6313_v15  ;;  %v2904_v7 = vadd.f32 %v6077_v44, %v6390_v6  ;;  %v1516_v26 = vsel %vm1242_vm2, %v1205_v14, 0.0 }
 0x29f   : > { %v4008_v30 = vsel %vm1944_vm10, %v4007_v27, %v7478_v25  ;;  %v1323_v4 = vpop.xlane.xlu1 %1322  ;;  %v1638_v38 = vadd.f32 %v6459_v5, %v1275_v35  ;;  %v5548_v51 = vpop.eup %5547  ;;  %5555 = vtanh.f32 %v2874_v24 }
 0x2a0   : > { %v7626_v39 = vsel %vm1944_vm10, %v4086_v0, %v7501_v13  ;;  %v1654_v46 = vadd.f32 %v6459_v5, %v1323_v4  ;;  %v7630_v19 = vsel %vm1951_vm11, %v4012_v48, %v4008_v30  ;;  %v1471_v30 = vsel %vm1242_vm2, %v1190_v40, 0.0 }
 0x2a1   : > { %v1957_v25 = vrot.slane %v1638_v38, %v7612_v3  ;;  %1382 = vadd.xlane.f32.xlu0 %v1381_v50  ;;  %v5550_v63 = vpop.eup %5549  ;;  %v1220_v4 = vmul.f32 %v7429_v33, %v5544_v9  ;;  %v1960_v38 = vadd.s32 4294967208, %v8698_v43  ;;  %5557 = vtanh.f32 %v2889_v20 }
 0x2a2   : > { %v2047_v13 = vrot.slane %v1654_v46, %v7612_v3  ;;  %1427 = vadd.xlane.f32.xlu1 %v1426_v29  ;;  %v3199_v8 = vpop.xlane.xlu0 %3198  ;;  %v914_v50 = vadd.f32 %v6224_v1, %v8702_v61  ;;  %5559 = vtanh.f32 %v2904_v7 }
 0x2a3   : > { %v1959_v17 = vsel %vm1958_vm12, %v1957_v25, %v7536_v23  ;;  %v3247_v27 = vpop.xlane.xlu1 %3246  ;;  %v3561_v48 = vadd.f32 %v3199_v8, %v6459_v5  ;;  %v1235_v23 = vmul.f32 %v7429_v33, %v5542_v60  ;;  %v899_v60 = vadd.f32 %v6074_v42, %v8709_v55  ;;  %v5552_v25 = vpop.eup %5551 }
 0x2a4   : > { %v2048_v0 = vsel %vm1958_vm12, %v2047_v13, %v7560_v56  ;;  %v3577_v35 = vadd.f32 %v3247_v27, %v6459_v5  ;;  %v3054_v56 = vmul.f32 %v7429_v33, %v5548_v51  ;;  %v1561_v51 = vsel %vm1242_vm2, %v1220_v4, 0.0  ;;  %v5554_v7 = vpop.eup %5553  ;;  %v8712_v4 = vld [vmem:[#allocation18_spill] sm:$0xff] }
 0x2a5   : > { %v3859_v44 = vrot.slane %v3561_v48, %v7612_v3  ;;  %1472 = vadd.xlane.f32.xlu0 %v1471_v30  ;;  %v7669_v8 = vsub.s32 %v1960_v38, %v8701_v16  ;;  %v3070_v27 = vmul.f32 %v7429_v33, %v5546_v58  ;;  %v8711_v48 = vld [vmem:[#allocation20_spill] sm:$0xff]  ;;  %v3085_v30 = vmul.f32 %v7429_v33, %v5550_v63 }
 0x2a6   : > { %v3938_v24 = vrot.slane %v3577_v35, %v7612_v3  ;;  %1517 = vadd.xlane.f32.xlu1 %v1516_v26  ;;  %v3472_v14 = vpop.xlane.xlu0 %3471  ;;  %v3212_v35 = vsel %vm1242_vm2, %v3054_v56, 0.0  ;;  %5561 = vtanh.f32 %v914_v50  ;;  %v929_v58 = vadd.f32 %v6163_v41, %v8691_v36 }
 0x2a7   : > { %v7656_v40 = vsel %vm1958_vm12, %v3859_v44, %v3855_v2  ;;  %v3517_v9 = vpop.xlane.xlu1 %3516  ;;  %v3652_v46 = vadd.f32 %v3472_v14, %v6459_v5  ;;  %v1606_v2 = vsel %vm1242_vm2, %v1235_v23, 0.0  ;;  %5563 = vtanh.f32 %v899_v60 }
 0x2a8   : > { %v7662_v29 = vsel %vm1958_vm12, %v3938_v24, %v3934_v37  ;;  %v3667_v20 = vadd.f32 %v3517_v9, %v6459_v5  ;;  %v8713_v24 = vld [vmem:[#allocation27_spill] sm:$0xff]  ;;  %v944_v56 = vadd.f32 %v6276_v57, %v6114_v28  ;;  %v3100_v60 = vmul.f32 %v7429_v33, %v5552_v25 }
 0x2a9   : > { %v4308_v13 = vrot.slane %v3652_v46, %v6717_v52  ;;  %1562 = vadd.xlane.f32.xlu0 %v1561_v51  ;;  %v5556_v50 = vpop.eup %5555  ;;  %v3260_v46 = vsel %vm1242_vm2, %v3070_v27, 0.0  ;;  %5565 = vtanh.f32 %v929_v58  ;;  %v959_v27 = vadd.f32 %v6313_v15, %v6080_v49 }
 0x2aa   : > { %v4382_v26 = vrot.slane %v3667_v20, %v8711_v48  ;;  %1607 = vadd.xlane.f32.xlu1 %v1606_v2  ;;  %v1278_v37 = vpop.xlane.xlu0 %1277  ;;  %v3115_v2 = vmul.f32 %v7429_v33, %v5554_v7  ;;  %5567 = vtanh.f32 %v944_v56 }
 0x2ab   : > { %v7677_v44 = vsel %vm1923_vm7, %v4308_v13, %v8712_v4  ;;  %v1326_v23 = vpop.xlane.xlu1 %1325  ;;  %v1639_v38 = vadd.f32 %v6459_v5, %v1278_v37  ;;  %v3305_v13 = vsel %vm1242_vm2, %v3085_v30, 0.0  ;;  %v5558_v48 = vpop.eup %5557  ;;  %v974_v30 = vadd.f32 %v6390_v6, %v6093_v54 }
 0x2ac   : > { %v7684_v14 = vsel %vm1916_vm6, %v4382_v26, %v8713_v24  ;;  %v1655_v63 = vadd.f32 %v6459_v5, %v1326_v23  ;;  %v3130_v23 = vmul.f32 %v7429_v33, %v5556_v50  ;;  %5569 = vtanh.f32 %v959_v27  ;;  %v8714_v27 = vld [vmem:[#allocation12_spill] sm:$0xff] }
 0x2ad   : > { %v1964_v9 = vrot.slane %v1639_v38, %v7669_v8  ;;  %3213 = vadd.xlane.f32.xlu0 %v3212_v35  ;;  %v5560_v38 = vpop.eup %5559  ;;  %v2830_v50 = vadd.f32 %v8710_v32, %v6074_v42  ;;  %5571 = vtanh.f32 %v974_v30  ;;  %vm2554_vm6 = vcmask 1044484  }
 0x2ae   : > { %v2052_v20 = vrot.slane %v1655_v63, %v7669_v8  ;;  %3261 = vadd.xlane.f32.xlu1 %v3260_v46  ;;  %v1371_v51 = vpop.xlane.xlu0 %1370  ;;  %v3145_v63 = vmul.f32 %v7429_v33, %v5558_v48  ;;  %v3160_v48 = vmul.f32 %v7429_v33, %v5560_v38 }
 0x2af   : > { %v7696_v26 = vsel %vm1965_vm13, %v1964_v9, %v1959_v17  ;;  %v1416_v37 = vpop.xlane.xlu1 %1415  ;;  %v1670_v4 = vadd.f32 %v6459_v5, %v1371_v51  ;;  %v3350_v17 = vsel %vm1242_vm2, %v3100_v60, 0.0  ;;  %v2845_v51 = vadd.f32 %v8708_v22, %v6224_v1 }
 0x2b0   : > { %v7702_v25 = vsel %vm1965_vm13, %v2052_v20, %v2048_v0  ;;  %v1685_v35 = vadd.f32 %v6459_v5, %v1416_v37  ;;  %v3395_v0 = vsel %vm1242_vm2, %v3115_v2, 0.0  ;;  %v5562_v46 = vpop.eup %5561  ;;  %v3440_v2 = vsel %vm1242_vm2, %v3130_v23, 0.0  ;;  %v8715_v23 = vld [vmem:[#allocation22_spill] sm:$0xff] }
 0x2b1   : > { %v2126_v7 = vrot.slane %v1670_v4, %v7612_v3  ;;  %3306 = vadd.xlane.f32.xlu0 %v3305_v13  ;;  %v2875_v4 = vadd.f32 %v6128_v53, %v6276_v57  ;;  %5573 = vtanh.f32 %v2830_v50  ;;  %v2890_v50 = vadd.f32 %v6098_v62, %v6313_v15 }
 0x2b2   : > { %v2200_v58 = vrot.slane %v1685_v35, %v7504_v12  ;;  %3351 = vadd.xlane.f32.xlu1 %v3350_v17  ;;  %v1461_v24 = vpop.xlane.xlu0 %1460  ;;  %v2860_v17 = vadd.f32 %v8695_v10, %v6163_v41  ;;  %5575 = vtanh.f32 %v2845_v51  ;;  %v2905_v51 = vadd.f32 %v6110_v21, %v6390_v6 }
 0x2b3   : > { %v7715_v56 = vsel %vm1958_vm12, %v2126_v7, %v7556_v11  ;;  %v1506_v54 = vpop.xlane.xlu1 %1505  ;;  %v1700_v9 = vadd.f32 %v6459_v5, %v1461_v24  ;;  %v5564_v11 = vpop.eup %5563  ;;  %5577 = vtanh.f32 %v2875_v4 }
 0x2b4   : > { %v7722_v60 = vsel %vm1951_vm11, %v2200_v58, %v7572_v45  ;;  %v1715_v20 = vadd.f32 %v6459_v5, %v1506_v54  ;;  %v3485_v45 = vsel %vm1242_vm2, %v3145_v63, 0.0  ;;  %v1161_v24 = vmul.f32 %v7429_v33, %v5564_v11  ;;  %v8716_v11 = vld [vmem:[#allocation26_spill] sm:$0xff] }
 0x2b5   : > { %v2274_v13 = vrot.slane %v1700_v9, %v7497_v59  ;;  %3396 = vadd.xlane.f32.xlu0 %v3395_v0  ;;  %v5566_v0 = vpop.eup %5565  ;;  %v3530_v54 = vsel %vm1242_vm2, %v3160_v48, 0.0  ;;  %v1176_v9 = vmul.f32 %v7429_v33, %v5562_v46  ;;  %5579 = vtanh.f32 %v2860_v17 }
 0x2b6   : > { %v2348_v42 = vrot.slane %v1715_v20, %v7301_v34  ;;  %3441 = vadd.xlane.f32.xlu1 %v3440_v2  ;;  %v1551_v37 = vpop.xlane.xlu0 %1550  ;;  %v5568_v20 = vpop.eup %5567  ;;  %v915_v46 = vadd.f32 %v6224_v1, %v8709_v55  ;;  %v1191_v21 = vmul.f32 %v7429_v33, %v5566_v0  ;;  %5581 = vtanh.f32 %v2890_v50 }
 0x2b7   : > { %v7736_v35 = vsel %vm1944_vm10, %v2274_v13, %v8714_v27  ;;  %v1596_v30 = vpop.xlane.xlu1 %1595  ;;  %v1730_v7 = vadd.f32 %v6459_v5, %v1551_v37  ;;  %v1206_v17 = vmul.f32 %v7429_v33, %v5568_v20  ;;  %5583 = vtanh.f32 %v2905_v51 }
 0x2b8   : > { %v7743_v38 = vsel %vm1937_vm9, %v2348_v42, %v8715_v23  ;;  %v1745_v58 = vadd.f32 %v6459_v5, %v1596_v30  ;;  %v1384_v30 = vsel %vm1242_vm2, %v1161_v24, 0.0  ;;  %5585 = vtanh.f32 %v915_v46 }
 0x2b9   : > { %v2422_v63 = vrot.slane %v1730_v7, %v7294_v31  ;;  %3486 = vadd.xlane.f32.xlu0 %v3485_v45  ;;  %v8717_v45 = vld [vmem:[#allocation11_spill] sm:$0xff]  ;;  %v5570_v7 = vpop.eup %5569 }
 0x2ba   : > { %v2496_v13 = vrot.slane %v1745_v58, %v6717_v52  ;;  %3531 = vadd.xlane.f32.xlu1 %v3530_v54  ;;  %v3202_v2 = vpop.xlane.xlu0 %3201  ;;  %v1429_v58 = vsel %vm1242_vm2, %v1176_v9, 0.0  ;;  %v945_v9 = vadd.f32 %v6276_v57, %v8691_v36 }
 0x2bb   : > { %v7757_v42 = vsel %vm1930_vm8, %v2422_v63, %v8716_v11  ;;  %v3250_v48 = vpop.xlane.xlu1 %3249  ;;  %v3562_v37 = vadd.f32 %v3202_v2, %v6459_v5  ;;  %v5572_v63 = vpop.eup %5571  ;;  %v930_v2 = vadd.f32 %v6163_v41, %v8702_v61 }
 0x2bc   : > { %v7764_v27 = vsel %vm1923_vm7, %v2496_v13, %v8717_v45  ;;  %v3578_v4 = vadd.f32 %v3250_v48, %v6459_v5  ;;  %v1474_v48 = vsel %vm1242_vm2, %v1191_v21, 0.0  ;;  %v5574_v45 = vpop.eup %5573  ;;  %v1236_v51 = vmul.f32 %v7429_v33, %v5572_v63 }
 0x2bd   : > { %v3864_v23 = vrot.slane %v3562_v37, %v7669_v8  ;;  %1385 = vadd.xlane.f32.xlu0 %v1384_v30  ;;  %v1221_v37 = vmul.f32 %v7429_v33, %v5570_v7  ;;  %v5576_v30 = vpop.eup %5575  ;;  %5587 = vtanh.f32 %v930_v2  ;;  %v3086_v2 = vmul.f32 %v7429_v33, %v5574_v45 }
 0x2be   : > { %v3943_v54 = vrot.slane %v3578_v4, %v7669_v8  ;;  %1430 = vadd.xlane.f32.xlu1 %v1429_v58  ;;  %v3295_v13 = vpop.xlane.xlu0 %3294  ;;  %v1519_v4 = vsel %vm1242_vm2, %v1206_v17, 0.0  ;;  %v960_v17 = vadd.f32 %v6313_v15, %v6114_v28  ;;  %5589 = vtanh.f32 %v945_v9 }
 0x2bf   : > { %v7777_v24 = vsel %vm1965_vm13, %v3864_v23, %v7656_v40  ;;  %v3340_v0 = vpop.xlane.xlu1 %3339  ;;  %v3593_v11 = vadd.f32 %v3295_v13, %v6459_v5  ;;  %v1564_v13 = vsel %vm1242_vm2, %v1221_v37, 0.0  ;;  %v1967_v9 = vadd.s32 4294967200, %v8698_v43 }
 0x2c0   : > { %v7784_v50 = vsel %vm1965_vm13, %v3943_v54, %v7662_v29  ;;  %v3608_v20 = vadd.f32 %v3340_v0, %v6459_v5  ;;  %v5578_v54 = vpop.eup %5577  ;;  %5591 = vtanh.f32 %v960_v17 }
 0x2c1   : > { %v4017_v40 = vrot.slane %v3593_v11, %v7612_v3  ;;  %1475 = vadd.xlane.f32.xlu0 %v1474_v48  ;;  %v1609_v11 = vsel %vm1242_vm2, %v1236_v51, 0.0  ;;  %v7831_v17 = vsub.s32 %v1967_v9, %v8701_v16 }
 0x2c2   : > { %v4091_v23 = vrot.slane %v3608_v20, %v7504_v12  ;;  %1520 = vadd.xlane.f32.xlu1 %v1519_v4  ;;  %v3385_v29 = vpop.xlane.xlu0 %3384  ;;  %v3101_v20 = vmul.f32 %v7429_v33, %v5576_v30  ;;  %v975_v30 = vadd.f32 %v6390_v6, %v6080_v49  ;;  %v3131_v49 = vmul.f32 %v7429_v33, %v5578_v54 }
 0x2c3   : > { %v7795_v21 = vsel %vm1958_vm12, %v4017_v40, %v7630_v19  ;;  %v3430_v7 = vpop.xlane.xlu1 %3429  ;;  %v3623_v58 = vadd.f32 %v3385_v29, %v6459_v5  ;;  %v5580_v19 = vpop.eup %5579  ;;  %v2846_v40 = vadd.f32 %v8710_v32, %v6224_v1  ;;  %v3308_v1 = vsel %vm1242_vm2, %v3086_v2, 0.0 }
 0x2c4   : > { %v7802_v46 = vsel %vm1951_vm11, %v4091_v23, %v7626_v39  ;;  %v3638_v63 = vadd.f32 %v3430_v7, %v6459_v5  ;;  %v5582_v37 = vpop.eup %5581  ;;  %v3116_v7 = vmul.f32 %v7429_v33, %v5580_v19  ;;  %v2876_v2 = vadd.f32 %v8695_v10, %v6276_v57 }
 0x2c5   : > { %v4165_v0 = vrot.slane %v3623_v58, %v7497_v59  ;;  %1565 = vadd.xlane.f32.xlu0 %v1564_v13  ;;  %v5584_v58 = vpop.eup %5583  ;;  %5593 = vtanh.f32 %v2846_v40 }
 0x2c6   : > { %v4239_v48 = vrot.slane %v3638_v63, %v7301_v34  ;;  %1610 = vadd.xlane.f32.xlu1 %v1609_v11  ;;  %v3475_v39 = vpop.xlane.xlu0 %3474  ;;  %v3353_v63 = vsel %vm1242_vm2, %v3101_v20, 0.0  ;;  %v5586_v19 = vpop.eup %5585  ;;  %5595 = vtanh.f32 %v975_v30  ;;  %v3398_v40 = vsel %vm1242_vm2, %v3116_v7, 0.0 }
 0x2c7   : > { %v7816_v45 = vsel %vm1944_vm10, %v4165_v0, %v7493_v47  ;;  %v3520_v4 = vpop.xlane.xlu1 %3519  ;;  %v3653_v51 = vadd.f32 %v3475_v39, %v6459_v5  ;;  %v3146_v0 = vmul.f32 %v7429_v33, %v5582_v37  ;;  %v5588_v54 = vpop.eup %5587 }
 0x2c8   : > { %v7823_v23 = vsel %vm1937_vm9, %v4239_v48, %v7531_v18  ;;  %v3668_v29 = vadd.f32 %v3520_v4, %v6459_v5  ;;  %v5590_v37 = vpop.eup %5589  ;;  %v3443_v4 = vsel %vm1242_vm2, %v3131_v49, 0.0  ;;  %v2891_v49 = vadd.f32 %v6128_v53, %v6313_v15 }
 0x2c9   : > { %v4313_v47 = vrot.slane %v3653_v51, %v7294_v31  ;;  %3309 = vadd.xlane.f32.xlu0 %v3308_v1  ;;  %v3161_v51 = vmul.f32 %v7429_v33, %v5584_v58  ;;  %v1177_v1 = vmul.f32 %v7429_v33, %v5586_v19 }
 0x2ca   : > { %v4387_v18 = vrot.slane %v3668_v29, %v6717_v52  ;;  %3354 = vadd.xlane.f32.xlu1 %v3353_v63  ;;  %v1281_v13 = vpop.xlane.xlu0 %1280  ;;  %v2861_v52 = vadd.f32 %v8708_v22, %v6163_v41 }
 0x2cb   : > { %v7840_v11 = vsel %vm1930_vm8, %v4313_v47, %v7677_v44  ;;  %v1329_v20 = vpop.xlane.xlu1 %1328  ;;  %v1640_v9 = vadd.f32 %v6459_v5, %v1281_v13  ;;  %v2906_v13 = vadd.f32 %v6098_v62, %v6390_v6  ;;  %v3533_v19 = vsel %vm1242_vm2, %v3161_v51, 0.0 }
 0x2cc   : > { %v7847_v48 = vsel %vm1923_vm7, %v4387_v18, %v7684_v14  ;;  %v1656_v39 = vadd.f32 %v6459_v5, %v1329_v20  ;;  %v3488_v14 = vsel %vm1242_vm2, %v3146_v0, 0.0  ;;  %5597 = vtanh.f32 %v2861_v52  ;;  %v5592_v0 = vpop.eup %5591 }
 0x2cd   : > { %v1971_v44 = vrot.slane %v1640_v9, %v7831_v17  ;;  %3399 = vadd.xlane.f32.xlu0 %v3398_v40  ;;  %5599 = vtanh.f32 %v2876_v2  ;;  %v1192_v20 = vmul.f32 %v7429_v33, %v5588_v54  ;;  %vm2556_vm7 = vcmask 1045509  }
 0x2ce   : > { %v2057_v30 = vrot.slane %v1656_v39, %v7831_v17  ;;  %3444 = vadd.xlane.f32.xlu1 %v3443_v4  ;;  %v1374_v29 = vpop.xlane.xlu0 %1373  ;;  %v1207_v39 = vmul.f32 %v7429_v33, %v5590_v37  ;;  %5601 = vtanh.f32 %v2891_v49  ;;  %v946_v37 = vadd.f32 %v6276_v57, %v8702_v61 }
 0x2cf   : > { %v7859_v47 = vsel %vm1972_vm14, %v1971_v44, %v7696_v26  ;;  %v1419_v7 = vpop.xlane.xlu1 %1418  ;;  %v1671_v63 = vadd.f32 %v6459_v5, %v1374_v29  ;;  %v931_v44 = vadd.f32 %v6163_v41, %v8709_v55  ;;  %v5594_v54 = vpop.eup %5593  ;;  %5603 = vtanh.f32 %v2906_v13 }
 0x2d0   : > { %v7866_v58 = vsel %vm1972_vm14, %v2057_v30, %v7702_v25  ;;  %v1686_v18 = vadd.f32 %v6459_v5, %v1419_v7  ;;  %v1432_v25 = vsel %vm1242_vm2, %v1177_v1, 0.0  ;;  %v1477_v29 = vsel %vm1242_vm2, %v1192_v20, 0.0 }
 0x2d1   : > { %v2131_v26 = vrot.slane %v1671_v63, %v7669_v8  ;;  %3489 = vadd.xlane.f32.xlu0 %v3488_v14  ;;  %v1222_v14 = vmul.f32 %v7429_v33, %v5592_v0  ;;  %v961_v63 = vadd.f32 %v6313_v15, %v8691_v36  ;;  %5605 = vtanh.f32 %v931_v44 }
 0x2d2   : > { %v2205_v9 = vrot.slane %v1686_v18, %v7612_v3  ;;  %3534 = vadd.xlane.f32.xlu1 %v3533_v19  ;;  %v1464_v52 = vpop.xlane.xlu0 %1463  ;;  %v976_v0 = vadd.f32 %v6390_v6, %v6114_v28  ;;  %5607 = vtanh.f32 %v946_v37  ;;  %v2877_v44 = vadd.f32 %v8708_v22, %v6276_v57  ;;  %v7935_v37 = vld [vmem:[%s8648_s7] ss:$0 sm:$0xff] }
 0x2d3   : > { %v7879_v2 = vsel %vm1965_vm13, %v2131_v26, %v7715_v56  ;;  %v1509_v62 = vpop.xlane.xlu1 %1508  ;;  %v1701_v40 = vadd.f32 %v6459_v5, %v1464_v52  ;;  %v5596_v56 = vpop.eup %5595  ;;  %v1567_v52 = vsel %vm1242_vm2, %v1222_v14, 0.0  ;;  %5609 = vtanh.f32 %v961_v63 }
 0x2d4   : > { %v7886_v4 = vsel %vm1958_vm12, %v2205_v9, %v7722_v60  ;;  %v1716_v51 = vadd.f32 %v6459_v5, %v1509_v62  ;;  %v1522_v60 = vsel %vm1242_vm2, %v1207_v39, 0.0  ;;  %v1237_v20 = vmul.f32 %v7429_v33, %v5596_v56 }
 0x2d5   : > { %v2279_v30 = vrot.slane %v1701_v40, %v7504_v12  ;;  %1433 = vadd.xlane.f32.xlu0 %v1432_v25  ;;  %v3102_v25 = vmul.f32 %v7429_v33, %v5594_v54  ;;  %5611 = vtanh.f32 %v976_v0  ;;  %v2907_v14 = vadd.f32 %v6128_v53, %v6390_v6 }
 0x2d6   : > { %v2353_v1 = vrot.slane %v1716_v51, %v7497_v59  ;;  %1478 = vadd.xlane.f32.xlu1 %v1477_v29  ;;  %v1554_v7 = vpop.xlane.xlu0 %1553  ;;  %v5598_v9 = vpop.eup %5597  ;;  %v2862_v51 = vadd.f32 %v8710_v32, %v6163_v41  ;;  %v1612_v54 = vsel %vm1242_vm2, %v1237_v20, 0.0 }
 0x2d7   : > { %v7900_v49 = vsel %vm1951_vm11, %v2279_v30, %v7736_v35  ;;  %v1599_v18 = vpop.xlane.xlu1 %1598  ;;  %v1731_v13 = vadd.f32 %v6459_v5, %v1554_v7  ;;  %v5600_v39 = vpop.eup %5599  ;;  %v3356_v30 = vsel %vm1242_vm2, %v3102_v25, 0.0  ;;  %v962_v25 = vadd.f32 %v6313_v15, %v8702_v61 }
 0x2d8   : > { %v7907_v26 = vsel %vm1944_vm10, %v2353_v1, %v7743_v38  ;;  %v1746_v19 = vadd.f32 %v6459_v5, %v1599_v18  ;;  %v5602_v56 = vpop.eup %5601  ;;  %v3132_v41 = vmul.f32 %v7935_v37, %v5600_v39  ;;  %5613 = vtanh.f32 %v2862_v51 }
 0x2d9   : > { %v2427_v35 = vrot.slane %v1731_v13, %v7301_v34  ;;  %1523 = vadd.xlane.f32.xlu0 %v1522_v60  ;;  %v5604_v29 = vpop.eup %5603  ;;  %v2892_v60 = vadd.f32 %v8695_v10, %v6313_v15  ;;  %v3147_v13 = vmul.f32 %v7935_v37, %v5602_v56  ;;  %5615 = vtanh.f32 %v2877_v44 }
 0x2da   : > { %v2501_v28 = vrot.slane %v1746_v19, %v7294_v31  ;;  %1568 = vadd.xlane.f32.xlu1 %v1567_v52  ;;  %v7915_v62 = vpop.xlane.xlu0 %3204  ;;  %v3446_v20 = vsel %vm1242_vm2, %v3132_v41, 0.0  ;;  %v3162_v53 = vmul.f32 %v7935_v37, %v5604_v29  ;;  %5617 = vtanh.f32 %v2907_v14 }
 0x2db   : > { %v7919_v38 = vsel %vm1937_vm9, %v2427_v35, %v7757_v42  ;;  %v7921_v40 = vpop.xlane.xlu1 %3252  ;;  %v3117_v42 = vmul.f32 %v7935_v37, %v5598_v9  ;;  %v5606_v0 = vpop.eup %5605  ;;  %v947_v39 = vadd.f32 %v6276_v57, %v8709_v55  ;;  %5619 = vtanh.f32 %v2892_v60 }
 0x2dc   : > { %v7929_v33 = vsel %vm1930_vm8, %v2501_v28, %v7764_v27  ;;  %v5608_v9 = vpop.eup %5607  ;;  %v3491_v41 = vsel %vm1242_vm2, %v3147_v13, 0.0  ;;  %v1193_v29 = vmul.f32 %v7935_v37, %v5606_v0  ;;  %5621 = vtanh.f32 %v962_v25 }
 0x2dd   : > { %1613 = vadd.xlane.f32.xlu0 %v1612_v54  ;;  %v3401_v18 = vsel %vm1242_vm2, %v3117_v42, 0.0  ;;  %v977_v54 = vadd.f32 %v6390_v6, %v8691_v36  ;;  %v5610_v42 = vpop.eup %5609  ;;  %v1208_v14 = vmul.f32 %v7935_v37, %v5608_v9  ;;  %v1974_v36 = vadd.s32 4294967192, %v8698_v43 }
 0x2de   : > { %3357 = vadd.xlane.f32.xlu1 %v3356_v30  ;;  %v3298_v27 = vpop.xlane.xlu0 %3297  ;;  %v2878_v60 = vadd.f32 %v8710_v32, %v6276_v57  ;;  %v1223_v0 = vmul.f32 %v7935_v37, %v5610_v42  ;;  %5623 = vtanh.f32 %v947_v39 }
 0x2df   : > { %v3343_v1 = vpop.xlane.xlu1 %3342  ;;  %v3594_v7 = vadd.f32 %v3298_v27, %v6459_v5  ;;  %v3536_v27 = vsel %vm1242_vm2, %v3162_v53, 0.0  ;;  %v1480_v53 = vsel %vm1242_vm2, %v1193_v29, 0.0  ;;  %5625 = vtanh.f32 %v977_v54 }
 0x2e0   : > { %v3609_v63 = vadd.f32 %v3343_v1, %v6459_v5  ;;  %v5612_v1 = vpop.eup %5611  ;;  %5627 = vtanh.f32 %v2878_v60 }
 0x2e1   : > { %v4022_v19 = vrot.slane %v3594_v7, %v7669_v8  ;;  %3402 = vadd.xlane.f32.xlu0 %v3401_v18 }
 0x2e2   : > { %v4096_v35 = vrot.slane %v3609_v63, %v7612_v3  ;;  %3447 = vadd.xlane.f32.xlu1 %v3446_v20  ;;  %v3388_v52 = vpop.xlane.xlu0 %3387  ;;  %v5614_v57 = vpop.eup %5613 }
 0x2e3   : > { %v7958_v28 = vsel %vm1965_vm13, %v4022_v19, %v7795_v21  ;;  %v3433_v44 = vpop.xlane.xlu1 %3432  ;;  %v3624_v51 = vadd.f32 %v3388_v52, %v6459_v5  ;;  %v1238_v52 = vmul.f32 %v7935_v37, %v5612_v1  ;;  %v5616_v25 = vpop.eup %5615 }
 0x2e4   : > { %v7965_v56 = vsel %vm1958_vm12, %v4096_v35, %v7802_v46  ;;  %v3639_v30 = vadd.f32 %v3433_v44, %v6459_v5  ;;  %v7992_v35 = vsub.s32 %v1974_v36, %v8701_v16  ;;  %v2908_v44 = vadd.f32 %v8695_v10, %v6390_v6  ;;  %v5618_v29 = vpop.eup %5617 }
 0x2e5   : > { %v4170_v21 = vrot.slane %v3624_v51, %v7504_v12  ;;  %3492 = vadd.xlane.f32.xlu0 %v3491_v41  ;;  %v2893_v41 = vadd.f32 %v8708_v22, %v6313_v15  ;;  %v3133_v36 = vmul.f32 %v7935_v37, %v5616_v25  ;;  %v2909_v25 = vadd.f32 %v8708_v22, %v6390_v6 }
 0x2e6   : > { %v4244_v7 = vrot.slane %v3639_v30, %v7497_v59  ;;  %3537 = vadd.xlane.f32.xlu1 %v3536_v27  ;;  %v3478_v46 = vpop.xlane.xlu0 %3477  ;;  %v1570_v30 = vsel %vm1242_vm2, %v1223_v0, 0.0  ;;  %5629 = vtanh.f32 %v2908_v44  ;;  %v2894_v44 = vadd.f32 %v8710_v32, %v6313_v15 }
 0x2e7   : > { %v7979_v63 = vsel %vm1951_vm11, %v4170_v21, %v7816_v45  ;;  %v3523_v18 = vpop.xlane.xlu1 %3522  ;;  %v3654_v13 = vadd.f32 %v3478_v46, %v6459_v5  ;;  %v1525_v45 = vsel %vm1242_vm2, %v1208_v14, 0.0  ;;  %v3118_v21 = vmul.f32 %v7935_v37, %v5614_v57 }
 0x2e8   : > { %v7985_v19 = vsel %vm1944_vm10, %v4244_v7, %v7823_v23  ;;  %v3669_v20 = vadd.f32 %v3523_v18, %v6459_v5  ;;  %v1615_v14 = vsel %vm1242_vm2, %v1238_v52, 0.0  ;;  %5631 = vtanh.f32 %v2893_v41 }
 0x2e9   : > { %v4318_v9 = vrot.slane %v3654_v13, %v7301_v34  ;;  %1481 = vadd.xlane.f32.xlu0 %v1480_v53  ;;  %v963_v13 = vadd.f32 %v6313_v15, %v8709_v55  ;;  %v3163_v52 = vmul.f32 %v7935_v37, %v5618_v29 }
 0x2ea   : > { %v4392_v23 = vrot.slane %v3669_v20, %v7294_v31  ;;  %1526 = vadd.xlane.f32.xlu1 %v1525_v45  ;;  %v1284_v39 = vpop.xlane.xlu0 %1283  ;;  %v3449_v45 = vsel %vm1242_vm2, %v3133_v36, 0.0 }
 0x2eb   : > { %v8000_v51 = vsel %vm1937_vm9, %v4318_v9, %v7840_v11  ;;  %v1332_v54 = vpop.xlane.xlu1 %1331  ;;  %v1641_v42 = vadd.f32 %v6459_v5, %v1284_v39  ;;  %v5620_v11 = vpop.eup %5619 }
 0x2ec   : > { %v8008_v31 = vsel %vm1930_vm8, %v4392_v23, %v7847_v48  ;;  %v1657_v10 = vadd.f32 %v6459_v5, %v1332_v54  ;;  %v978_v48 = vadd.f32 %v6390_v6, %v8702_v61  ;;  %v5622_v0 = vpop.eup %5621  ;;  %v3404_v61 = vsel %vm1242_vm2, %v3118_v21, 0.0 }
 0x2ed   : > { %v1978_v27 = vrot.slane %v1641_v42, %v7992_v35  ;;  %1571 = vadd.xlane.f32.xlu0 %v1570_v30  ;;  %v3148_v57 = vmul.f32 %v7935_v37, %v5620_v11  ;;  %v1224_v11 = vmul.f32 %v7935_v37, %v5622_v0 }
 0x2ee   : > { %v2062_v1 = vrot.slane %v1657_v10, %v7992_v35  ;;  %1616 = vadd.xlane.f32.xlu1 %v1615_v14  ;;  %v1377_v7 = vpop.xlane.xlu0 %1376  ;;  %5633 = vtanh.f32 %v978_v48 }
 0x2ef   : > { %v8020_v46 = vsel %vm1979_vm15, %v1978_v27, %v7859_v47  ;;  %v1422_v60 = vpop.xlane.xlu1 %1421  ;;  %v1672_v18 = vadd.f32 %v6459_v5, %v1377_v7  ;;  %v5624_v47 = vpop.eup %5623  ;;  %5635 = vtanh.f32 %v963_v13  ;;  %v3494_v10 = vsel %vm1242_vm2, %v3148_v57, 0.0 }
 0x2f0   : > { %v8027_v20 = vsel %vm1979_vm15, %v2062_v1, %v7866_v58  ;;  %v1687_v53 = vadd.f32 %v6459_v5, %v1422_v60  ;;  %v5626_v23 = vpop.eup %5625  ;;  %v1209_v21 = vmul.f32 %v7935_v37, %v5624_v47  ;;  %5637 = vtanh.f32 %v2909_v25 }
 0x2f1   : > { %v2136_v9 = vrot.slane %v1672_v18, %v7831_v17  ;;  %3405 = vadd.xlane.f32.xlu0 %v3404_v61  ;;  %v5628_v41 = vpop.eup %5627  ;;  %v3563_v27 = vadd.f32 %v7915_v62, %v6459_v5  ;;  %v1239_v36 = vmul.f32 %v7935_v37, %v5626_v23  ;;  %5639 = vtanh.f32 %v2894_v44 }
 0x2f2   : > { %v2210_v58 = vrot.slane %v1687_v53, %v7669_v8  ;;  %3450 = vadd.xlane.f32.xlu1 %v3449_v45  ;;  %v1467_v39 = vpop.xlane.xlu0 %1466  ;;  %v3579_v1 = vadd.f32 %v7921_v40, %v6459_v5  ;;  %v979_v62 = vadd.f32 %v6390_v6, %v8709_v55  ;;  %v5630_v18 = vpop.eup %5629  ;;  %v1528_v53 = vsel %vm1242_vm2, %v1209_v21, 0.0 }
 0x2f3   : > { %v8042_v54 = vsel %vm1972_vm14, %v2136_v9, %v7879_v2  ;;  %v1512_v42 = vpop.xlane.xlu1 %1511  ;;  %v1702_v30 = vadd.f32 %v6459_v5, %v1467_v39  ;;  %v3539_v2 = vsel %vm1242_vm2, %v3163_v52, 0.0  ;;  %v2910_v40 = vadd.f32 %v8710_v32, %v6390_v6 }
 0x2f4   : > { %v8047_v22 = vsel %vm1965_vm13, %v2210_v58, %v7886_v4  ;;  %v1717_v29 = vadd.f32 %v6459_v5, %v1512_v42  ;;  %v1573_v57 = vsel %vm1242_vm2, %v1224_v11, 0.0  ;;  %v3134_v55 = vmul.f32 %v7935_v37, %v5628_v41 }
 0x2f5   : > { %v2284_v15 = vrot.slane %v1702_v30, %v7612_v3  ;;  %3495 = vadd.xlane.f32.xlu0 %v3494_v10  ;;  %v3869_v47 = vrot.slane %v3563_v27, %v7831_v17  ;;  %v1618_v45 = vsel %vm1242_vm2, %v1239_v36, 0.0  ;;  %v3948_v52 = vrot.slane %v3579_v1, %v7831_v17 }
 0x2f6   : > { %v2358_v4 = vrot.slane %v1717_v29, %v7504_v12  ;;  %3540 = vadd.xlane.f32.xlu1 %v3539_v2  ;;  %v1557_v14 = vpop.xlane.xlu0 %1556  ;;  %5641 = vtanh.f32 %v979_v62  ;;  %v3164_v41 = vmul.f32 %v7935_v37, %v5630_v18 }
 0x2f7   : > { %v8063_v7 = vsel %vm1958_vm12, %v2284_v15, %v7900_v49  ;;  %v1602_v48 = vpop.xlane.xlu1 %1601  ;;  %v1732_v60 = vadd.f32 %v6459_v5, %v1557_v14  ;;  %v5632_v49 = vpop.eup %5631  ;;  %5643 = vtanh.f32 %v2910_v40  ;;  %v3870_v29 = vsel %vm1972_vm14, %v3869_v47, %v7777_v24 }
 0x2f8   : > { %v8070_v13 = vsel %vm1951_vm11, %v2358_v4, %v7907_v26  ;;  %v1747_v0 = vadd.f32 %v6459_v5, %v1602_v48  ;;  %v5634_v23 = vpop.eup %5633  ;;  %v3149_v44 = vmul.f32 %v7935_v37, %v5632_v49  ;;  %v3949_v15 = vsel %vm1972_vm14, %v3948_v52, %v7784_v50 }
 0x2f9   : > { %v2432_v61 = vrot.slane %v1732_v60, %v7497_v59  ;;  %1529 = vadd.xlane.f32.xlu0 %v1528_v53  ;;  %v5636_v42 = vpop.eup %5635  ;;  %v3542_v50 = vsel %vm1242_vm2, %v3164_v41, 0.0  ;;  %v1240_v60 = vmul.f32 %v7935_v37, %v5634_v23 }
 0x2fa   : > { %v2506_v26 = vrot.slane %v1747_v0, %v7301_v34  ;;  %1574 = vadd.xlane.f32.xlu1 %v1573_v57  ;;  %v3208_v9 = vpop.xlane.xlu0 %3207  ;;  %v5638_v21 = vpop.eup %5637  ;;  %v3497_v36 = vsel %vm1242_vm2, %v3149_v44, 0.0  ;;  %v1225_v1 = vmul.f32 %v7935_v37, %v5636_v42 }
 0x2fb   : > { %v8085_v6 = vsel %vm1944_vm10, %v2432_v61, %v7919_v38  ;;  %v3256_v32 = vpop.xlane.xlu1 %3255  ;;  %v3564_v25 = vadd.f32 %v3208_v9, %v6459_v5  ;;  %v3452_v38 = vsel %vm1242_vm2, %v3134_v55, 0.0  ;;  %v5640_v4 = vpop.eup %5639  ;;  %v1621_v9 = vsel %vm1242_vm2, %v1240_v60, 0.0 }
 0x2fc   : > { %v8090_v58 = vsel %vm1937_vm9, %v2506_v26, %v7929_v33  ;;  %v3580_v39 = vadd.f32 %v3256_v32, %v6459_v5  ;;  %v1576_v57 = vsel %vm1242_vm2, %v1225_v1, 0.0  ;;  %v3150_v55 = vmul.f32 %v7935_v37, %v5640_v4 }
 0x2fd   : > { %v3874_v30 = vrot.slane %v3564_v25, %v7992_v35  ;;  %1619 = vadd.xlane.f32.xlu0 %v1618_v45  ;;  %v1981_v45 = vadd.s32 4294967184, %v8698_v43 }
 0x2fe   : > { %v3953_v10 = vrot.slane %v3580_v39, %v7992_v35  ;;  %3453 = vadd.xlane.f32.xlu1 %v3452_v38  ;;  %v3301_v33 = vpop.xlane.xlu0 %3300 }
 0x2ff   : > { %v8103_v2 = vsel %vm1979_vm15, %v3874_v30, %v3870_v29  ;;  %v3346_v11 = vpop.xlane.xlu1 %3345  ;;  %v3595_v27 = vadd.f32 %v3301_v33, %v6459_v5  ;;  %v3500_v30 = vsel %vm1242_vm2, %v3150_v55, 0.0 }
 0x300   : > { %v8107_v14 = vsel %vm1979_vm15, %v3953_v10, %v3949_v15  ;;  %v3610_v24 = vadd.f32 %v3346_v11, %v6459_v5  ;;  %v5642_v47 = vpop.eup %5641 }
 0x301   : > { %v4027_v48 = vrot.slane %v3595_v27, %v7831_v17  ;;  %3498 = vadd.xlane.f32.xlu0 %v3497_v36  ;;  %v5644_v52 = vpop.eup %5643  ;;  %v1241_v38 = vmul.f32 %v7935_v37, %v5642_v47 }
 0x302   : > { %v4101_v62 = vrot.slane %v3610_v24, %v7669_v8  ;;  %3543 = vadd.xlane.f32.xlu1 %v3542_v50  ;;  %v3391_v18 = vpop.xlane.xlu0 %3390  ;;  %v3166_v10 = vmul.f32 %v7935_v37, %v5644_v52 }
 0x303   : > { %v8118_v0 = vsel %vm1972_vm14, %v4027_v48, %v7958_v28  ;;  %v3436_v53 = vpop.xlane.xlu1 %3435  ;;  %v3625_v40 = vadd.f32 %v3391_v18, %v6459_v5  ;;  %v3165_v28 = vmul.f32 %v7935_v37, %v5638_v21  ;;  %v1624_v37 = vsel %vm1242_vm2, %v1241_v38, 0.0 }
 0x304   : > { %v8123_v49 = vsel %vm1965_vm13, %v4101_v62, %v7965_v56  ;;  %v3640_v61 = vadd.f32 %v3436_v53, %v6459_v5  ;;  %v3548_v24 = vsel %vm1242_vm2, %v3166_v10, 0.0 }
 0x305   : > { %v4175_v26 = vrot.slane %v3625_v40, %v7612_v3  ;;  %1577 = vadd.xlane.f32.xlu0 %v1576_v57  ;;  %v3545_v29 = vsel %vm1242_vm2, %v3165_v28, 0.0  ;;  %vm1993_vm2 = vcmask 1048512  }
 0x306   : > { %v4249_v56 = vrot.slane %v3640_v61, %v7504_v12  ;;  %1622 = vadd.xlane.f32.xlu1 %v1621_v9  ;;  %v3481_v32 = vpop.xlane.xlu0 %3480 }
 0x307   : > { %v8135_v25 = vsel %vm1958_vm12, %v4175_v26, %v7979_v63  ;;  %v3526_v23 = vpop.xlane.xlu1 %3525  ;;  %v3655_v39 = vadd.f32 %v3481_v32, %v6459_v5  ;;  %v8148_v63 = vsub.s32 %v1981_v45, %v8701_v16 }
 0x308   : > { %v8140_v44 = vsel %vm1951_vm11, %v4249_v56, %v7985_v19  ;;  %v3670_v42 = vadd.f32 %v3526_v23, %v6459_v5 }
 0x309   : > { %v4323_v41 = vrot.slane %v3655_v39, %v7497_v59  ;;  %3501 = vadd.xlane.f32.xlu0 %v3500_v30 }
 0x30a   : > { %v4397_v33 = vrot.slane %v3670_v42, %v7301_v34  ;;  %3546 = vadd.xlane.f32.xlu1 %v3545_v29  ;;  %v1287_v19 = vpop.xlane.xlu0 %1286 }
 0x30b   : > { %v8154_v21 = vsel %vm1944_vm10, %v4323_v41, %v8000_v51  ;;  %v1335_v15 = vpop.xlane.xlu1 %1334  ;;  %v1642_v11 = vadd.f32 %v6459_v5, %v1287_v19 }
 0x30c   : > { %v8159_v27 = vsel %vm1937_vm9, %v4397_v33, %v8008_v31  ;;  %v1658_v4 = vadd.f32 %v6459_v5, %v1335_v15  ;;  %vm2558_vm9 = vcmask 1046534  }
 0x30d   : > { %v1985_v34 = vrot.slane %v1642_v11, %v8148_v63  ;;  %1625 = vadd.xlane.f32.xlu0 %v1624_v37 }
 0x30e   : > { %v2067_v51 = vrot.slane %v1658_v4, %v8148_v63  ;;  %3549 = vadd.xlane.f32.xlu1 %v3548_v24  ;;  %v1380_v36 = vpop.xlane.xlu0 %1379 }
 0x30f   : > { %v8168_v1 = vsel %vm1986_vm0, %v1985_v34, %v8020_v46  ;;  %v1425_v31 = vpop.xlane.xlu1 %1424  ;;  %v1673_v48 = vadd.f32 %v6459_v5, %v1380_v36 }
 0x310   : > { %v8173_v50 = vsel %vm1986_vm0, %v2067_v51, %v8027_v20  ;;  %v1688_v60 = vadd.f32 %v6459_v5, %v1425_v31  ;;  %v1988_v51 = vadd.s32 4294967176, %v8698_v43 }
 0x311   : > { %v2141_v62 = vrot.slane %v1673_v48, %v7992_v35 }
 0x312   : > { %v2215_v18 = vrot.slane %v1688_v60, %v7831_v17  ;;  %v1470_v53 = vpop.xlane.xlu0 %1469  ;;  %v8251_v43 = vsub.s32 %v1988_v51, %v8701_v16 }
 0x313   : > { %v8180_v40 = vsel %vm1979_vm15, %v2141_v62, %v8042_v54  ;;  %v1515_v46 = vpop.xlane.xlu1 %1514  ;;  %v1703_v61 = vadd.f32 %v6459_v5, %v1470_v53 }
 0x314   : > { %v8185_v57 = vsel %vm1972_vm14, %v2215_v18, %v8047_v22  ;;  %v1718_v20 = vadd.f32 %v6459_v5, %v1515_v46 }
 0x315   : > { %v2289_v55 = vrot.slane %v1703_v61, %v7669_v8 }
 0x316   : > { %v2363_v47 = vrot.slane %v1718_v20, %v7612_v3  ;;  %v1560_v26 = vpop.xlane.xlu0 %1559 }
 0x317   : > { %v8192_v9 = vsel %vm1965_vm13, %v2289_v55, %v8063_v7  ;;  %v1605_v54 = vpop.xlane.xlu1 %1604  ;;  %v1733_v28 = vadd.f32 %v6459_v5, %v1560_v26 }
 0x318   : > { %v8197_v45 = vsel %vm1958_vm12, %v2363_v47, %v8070_v13  ;;  %v1748_v22 = vadd.f32 %v6459_v5, %v1605_v54 }
 0x319   : > { %v2437_v52 = vrot.slane %v1733_v28, %v7504_v12 }
 0x31a   : > { %v2511_v56 = vrot.slane %v1748_v22, %v7497_v59  ;;  %v3211_v32 = vpop.xlane.xlu0 %3210 }
 0x31b   : > { %v8204_v23 = vsel %vm1951_vm11, %v2437_v52, %v8085_v6  ;;  %v3259_v7 = vpop.xlane.xlu1 %3258  ;;  %v3565_v39 = vadd.f32 %v3211_v32, %v6459_v5 }
 0x31c   : > { %v8209_v42 = vsel %vm1944_vm10, %v2511_v56, %v8090_v58  ;;  %v3581_v13 = vadd.f32 %v3259_v7, %v6459_v5 }
 0x31d   : > { %v3879_v30 = vrot.slane %v3565_v39, %v8148_v63 }
 0x31e   : > { %v3958_v38 = vrot.slane %v3581_v13, %v8148_v63  ;;  %v3304_v41 = vpop.xlane.xlu0 %3303 }
 0x31f   : > { %v8216_v29 = vsel %vm1986_vm0, %v3879_v30, %v8103_v2  ;;  %v3349_v6 = vpop.xlane.xlu1 %3348  ;;  %v3596_v10 = vadd.f32 %v3304_v41, %v6459_v5 }
 0x320   : > { %v8221_v33 = vsel %vm1986_vm0, %v3958_v38, %v8107_v14  ;;  %v3611_v58 = vadd.f32 %v3349_v6, %v6459_v5 }
 0x321   : > { %v4032_v19 = vrot.slane %v3596_v10, %v7992_v35 }
 0x322   : > { %v4106_v15 = vrot.slane %v3611_v58, %v7831_v17  ;;  %v3394_v11 = vpop.xlane.xlu0 %3393 }
 0x323   : > { %v8228_v4 = vsel %vm1979_vm15, %v4032_v19, %v8118_v0  ;;  %v3439_v2 = vpop.xlane.xlu1 %3438  ;;  %v3626_v37 = vadd.f32 %v3394_v11, %v6459_v5 }
 0x324   : > { %v8233_v34 = vsel %vm1972_vm14, %v4106_v15, %v8123_v49  ;;  %v3641_v14 = vadd.f32 %v3439_v2, %v6459_v5 }
 0x325   : > { %v4180_v24 = vrot.slane %v3626_v37, %v7669_v8 }
 0x326   : > { %v4254_v36 = vrot.slane %v3641_v14, %v7612_v3  ;;  %v3484_v31 = vpop.xlane.xlu0 %3483 }
 0x327   : > { %v8241_v0 = vsel %vm1965_vm13, %v4180_v24, %v8135_v25  ;;  %v3529_v48 = vpop.xlane.xlu1 %3528  ;;  %v3656_v60 = vadd.f32 %v3484_v31, %v6459_v5 }
 0x328   : > { %v8246_v49 = vsel %vm1958_vm12, %v4254_v36, %v8140_v44  ;;  %v3671_v62 = vadd.f32 %v3529_v48, %v6459_v5 }
 0x329   : > { %v4328_v18 = vrot.slane %v3656_v60, %v7504_v12 }
 0x32a   : > { %v4402_v53 = vrot.slane %v3671_v62, %v7497_v59  ;;  %v1290_v46 = vpop.xlane.xlu0 %1289 }
 0x32b   : > { %v8256_v25 = vsel %vm1951_vm11, %v4328_v18, %v8154_v21  ;;  %v1338_v61 = vpop.xlane.xlu1 %1337  ;;  %v1643_v20 = vadd.f32 %v6459_v5, %v1290_v46 }
 0x32c   : > { %v8261_v44 = vsel %vm1944_vm10, %v4402_v53, %v8159_v27  ;;  %v1659_v55 = vadd.f32 %v6459_v5, %v1338_v61  ;;  %vm2560_vm10 = vcmask 1047559  }
 0x32d   : > { %v1992_v47 = vrot.slane %v1643_v20, %v8251_v43 }
 0x32e   : > { %v2072_v26 = vrot.slane %v1659_v55, %v8251_v43  ;;  %v1383_v59 = vpop.xlane.xlu0 %1382 }
 0x32f   : > { %v1994_v21 = vsel %vm1993_vm2, %v1992_v47, %v8168_v1  ;;  %v1428_v54 = vpop.xlane.xlu1 %1427  ;;  %v1674_v28 = vadd.f32 %v6459_v5, %v1383_v59 }
 0x330   : > { %v2073_v22 = vsel %vm1993_vm2, %v2072_v26, %v8173_v50  ;;  %v1689_v27 = vadd.f32 %v6459_v5, %v1428_v54 }
 0x331   : > { %v8273_v52 = vsel %vm2548_vm3, %v2073_v22, %v1994_v21  ;;  %v2146_v56 = vrot.slane %v1674_v28, %v8148_v63 }
 0x332   : > { %v2220_v32 = vrot.slane %v1689_v27, %v7992_v35  ;;  %v1473_v7 = vpop.xlane.xlu0 %1472 }
 0x333   : > { %v2147_v39 = vsel %vm1986_vm0, %v2146_v56, %v8180_v40  ;;  %v1518_v1 = vpop.xlane.xlu1 %1517  ;;  %v1704_v13 = vadd.f32 %v6459_v5, %v1473_v7 }
 0x334   : > { %v2221_v30 = vsel %vm1979_vm15, %v2220_v32, %v8185_v57  ;;  %v1719_v50 = vadd.f32 %v6459_v5, %v1518_v1 }
 0x335   : > { %v2294_v38 = vrot.slane %v1704_v13, %v7831_v17 }
 0x336   : > { %v2368_v41 = vrot.slane %v1719_v50, %v7669_v8  ;;  %v1563_v6 = vpop.xlane.xlu0 %1562 }
 0x337   : > { %v2295_v10 = vsel %vm1972_vm14, %v2294_v38, %v8192_v9  ;;  %v1608_v58 = vpop.xlane.xlu1 %1607  ;;  %v1734_v19 = vadd.f32 %v6459_v5, %v1563_v6 }
 0x338   : > { %v2369_v40 = vsel %vm1965_vm13, %v2368_v41, %v8197_v45  ;;  %v1749_v15 = vadd.f32 %v6459_v5, %v1608_v58 }
 0x339   : > { %v2442_v57 = vrot.slane %v1734_v19, %v7612_v3 }
 0x33a   : > { %v2516_v11 = vrot.slane %v1749_v15, %v7504_v12  ;;  %v3214_v2 = vpop.xlane.xlu0 %3213 }
 0x33b   : > { %v2443_v37 = vsel %vm1958_vm12, %v2442_v57, %v8204_v23  ;;  %v3262_v14 = vpop.xlane.xlu1 %3261  ;;  %v3566_v24 = vadd.f32 %v3214_v2, %v6459_v5 }
 0x33c   : > { %v2517_v9 = vsel %vm1951_vm11, %v2516_v11, %v8209_v42  ;;  %v3582_v51 = vadd.f32 %v3262_v14, %v6459_v5 }
 0x33d   : > { %v3884_v45 = vrot.slane %v3566_v24, %v8251_v43 }
 0x33e   : > { %v3963_v36 = vrot.slane %v3582_v51, %v8251_v43  ;;  %v3307_v31 = vpop.xlane.xlu0 %3306 }
 0x33f   : > { %v3885_v48 = vsel %vm1993_vm2, %v3884_v45, %v8216_v29  ;;  %v3352_v60 = vpop.xlane.xlu1 %3351  ;;  %v3597_v62 = vadd.f32 %v3307_v31, %v6459_v5 }
 0x340   : > { %v3964_v23 = vsel %vm1993_vm2, %v3963_v36, %v8221_v33  ;;  %v3612_v18 = vadd.f32 %v3352_v60, %v6459_v5 }
 0x341   : > { %v4439_v42 = vsel %vm2548_vm3, %v3964_v23, %v3885_v48  ;;  %v4037_v53 = vrot.slane %v3597_v62, %v8148_v63 }
 0x342   : > { %v4111_v46 = vrot.slane %v3612_v18, %v7992_v35  ;;  %v3397_v61 = vpop.xlane.xlu0 %3396 }
 0x343   : > { %v4038_v20 = vsel %vm1986_vm0, %v4037_v53, %v8228_v4  ;;  %v3442_v55 = vpop.xlane.xlu1 %3441  ;;  %v3627_v29 = vadd.f32 %v3397_v61, %v6459_v5 }
 0x344   : > { %v8315_v47 = vsel %vm1979_vm15, %v4111_v46, %v8233_v34  ;;  %v3642_v33 = vadd.f32 %v3442_v55, %v6459_v5 }
 0x345   : > { %v4185_v26 = vrot.slane %v3627_v29, %v7831_v17 }
 0x346   : > { %v4259_v59 = vrot.slane %v3642_v33, %v7669_v8  ;;  %v3487_v21 = vpop.xlane.xlu0 %3486 }
 0x347   : > { %v8322_v54 = vsel %vm1972_vm14, %v4185_v26, %v8241_v0  ;;  %v3532_v28 = vpop.xlane.xlu1 %3531  ;;  %v3657_v4 = vadd.f32 %v3487_v21, %v6459_v5 }
 0x348   : > { %v8327_v22 = vsel %vm1965_vm13, %v4259_v59, %v8246_v49  ;;  %v3672_v34 = vadd.f32 %v3532_v28, %v6459_v5 }
 0x349   : > { %v4333_v27 = vrot.slane %v3657_v4, %v7612_v3 }
 0x34a   : > { %v4407_v56 = vrot.slane %v3672_v34, %v7504_v12  ;;  %v1386_v32 = vpop.xlane.xlu0 %1385 }
 0x34b   : > { %v8334_v7 = vsel %vm1958_vm12, %v4333_v27, %v8256_v25  ;;  %v1431_v0 = vpop.xlane.xlu1 %1430  ;;  %v1675_v1 = vadd.f32 %v6459_v5, %v1386_v32 }
 0x34c   : > { %v8339_v13 = vsel %vm1951_vm11, %v4407_v56, %v8261_v44  ;;  %v1690_v49 = vadd.f32 %v6459_v5, %v1431_v0 }
 0x34d   : > { %v2151_v50 = vrot.slane %v1675_v1, %v8251_v43 }
 0x34e   : > { %v2225_v38 = vrot.slane %v1690_v49, %v8148_v63  ;;  %v1476_v12 = vpop.xlane.xlu0 %1475 }
 0x34f   : > { %v2152_v41 = vsel %vm1993_vm2, %v2151_v50, %v2147_v39  ;;  %v1521_v6 = vpop.xlane.xlu1 %1520  ;;  %v1705_v25 = vadd.f32 %v6459_v5, %v1476_v12 }
 0x350   : > { %v2226_v58 = vsel %vm1986_vm0, %v2225_v38, %v2221_v30  ;;  %v2551_v19 = vsel %vm2550_vm4, %v2152_v41, %v8273_v52  ;;  %v1720_v44 = vadd.f32 %v6459_v5, %v1521_v6 }
 0x351   : > { %v2299_v15 = vrot.slane %v1705_v25, %v7992_v35 }
 0x352   : > { %v2373_v57 = vrot.slane %v1720_v44, %v7831_v17  ;;  %v1566_v11 = vpop.xlane.xlu0 %1565 }
 0x353   : > { %v2300_v2 = vsel %vm1979_vm15, %v2299_v15, %v2295_v10  ;;  %v1611_v14 = vpop.xlane.xlu1 %1610  ;;  %v1735_v39 = vadd.f32 %v6459_v5, %v1566_v11 }
 0x354   : > { %v8355_v24 = vsel %vm1972_vm14, %v2373_v57, %v2369_v40  ;;  %v1750_v30 = vadd.f32 %v6459_v5, %v1611_v14 }
 0x355   : > { %v2447_v51 = vrot.slane %v1735_v39, %v7669_v8 }
 0x356   : > { %v2521_v52 = vrot.slane %v1750_v30, %v7612_v3  ;;  %v3310_v45 = vpop.xlane.xlu0 %3309 }
 0x357   : > { %v8361_v36 = vsel %vm1965_vm13, %v2447_v51, %v2443_v37  ;;  %v3355_v31 = vpop.xlane.xlu1 %3354  ;;  %v3598_v48 = vadd.f32 %v3310_v45, %v6459_v5 }
 0x358   : > { %v8365_v10 = vsel %vm1958_vm12, %v2521_v52, %v2517_v9  ;;  %v3613_v33 = vadd.f32 %v3355_v31, %v6459_v5 }
 0x359   : > { %v4042_v60 = vrot.slane %v3598_v48, %v8251_v43 }
 0x35a   : > { %v3400_v40 = vpop.xlane.xlu0 %3399  ;;  %v4116_v21 = vrot.slane %v3613_v33, %v8148_v63 }
 0x35b   : > { %v4043_v62 = vsel %vm1993_vm2, %v4042_v60, %v4038_v20  ;;  %v3445_v23 = vpop.xlane.xlu1 %3444 }
 0x35c   : > { %v4440_v18 = vsel %vm2550_vm4, %v4043_v62, %v4439_v42  ;;  %v4117_v56 = vsel %vm1986_vm0, %v4116_v21, %v8315_v47 }
 0x35e   : > { %v8370_v53 = vpop.xlane.xlu0 %3489 }
 0x35f   : > { %v8372_v46 = vpop.xlane.xlu1 %3534 }
 0x362   : > { %v1434_v37 = vpop.xlane.xlu0 %1433 }
 0x363   : > { %v1479_v61 = vpop.xlane.xlu1 %1478  ;;  %v1691_v55 = vadd.f32 %v6459_v5, %v1434_v37 }
 0x364   : > { %v1706_v49 = vadd.f32 %v6459_v5, %v1479_v61 }
 0x365   : > { %v2230_v9 = vrot.slane %v1691_v55, %v8251_v43 }
 0x366   : > { %v1524_v29 = vpop.xlane.xlu0 %1523  ;;  %v2304_v12 = vrot.slane %v1706_v49, %v8148_v63 }
 0x367   : > { %v2231_v26 = vsel %vm1993_vm2, %v2230_v9, %v2226_v58  ;;  %v1569_v20 = vpop.xlane.xlu1 %1568  ;;  %v3628_v58 = vadd.f32 %v3400_v40, %v6459_v5  ;;  %v1721_v31 = vadd.f32 %v6459_v5, %v1524_v29 }
 0x368   : > { %v2553_v59 = vsel %vm2552_vm5, %v2231_v26, %v2551_v19  ;;  %v2305_v19 = vsel %vm1986_vm0, %v2304_v12, %v2300_v2 }
 0x369   : > { %v4190_v39 = vrot.slane %v3628_v58, %v7992_v35  ;;  %v2378_v55 = vrot.slane %v1721_v31, %v7992_v35  ;;  %v8719_v31 = vld [vmem:[#allocation10_spill] sm:$0xff] }
 0x36a   : > { %v8379_v42 = vpop.xlane.xlu0 %1613 }
 0x36b   : > { %v3358_v28 = vpop.xlane.xlu1 %3357  ;;  %v4191_v2 = vsel %vm1979_vm15, %v4190_v39, %v8322_v54  ;;  %v3643_v54 = vadd.f32 %v3445_v23, %v6459_v5 }
 0x36c   : > { %v3614_v4 = vadd.f32 %v3358_v28, %v6459_v5  ;;  %v4451_v28 = vld [vmem:[%s457_s16] sm:$0x3] }
 0x36d   : > { %vm4452_vm8 = vcmp.eq.f32.partialorder %v4451_v28, 0.0 }
 0x36e   : > { %v4121_v34 = vrot.slane %v3614_v4, %v8251_v43  ;;  %v3403_v27 = vpop.xlane.xlu0 %3402  ;;  %v4264_v4 = vrot.slane %v3643_v54, %v7831_v17 }
 0x36f   : > { %v3448_v32 = vpop.xlane.xlu1 %3447  ;;  %v3629_v44 = vadd.f32 %v3403_v27, %v6459_v5 }
 0x370   : > { %v4122_v0 = vsel %vm1993_vm2, %v4121_v34, %v4117_v56  ;;  %v3644_v9 = vadd.f32 %v3448_v32, %v6459_v5  ;;  %v2379_v34 = vsel %vm1979_vm15, %v2378_v55, %v8355_v24  ;;  %v4265_v58 = vsel %vm1972_vm14, %v4264_v4, %v8327_v22 }
 0x371   : > { %v4441_v1 = vsel %vm2552_vm5, %v4122_v0, %v4440_v18  ;;  %v4195_v30 = vrot.slane %v3629_v44, %v8148_v63  ;;  %v1736_v0 = vadd.f32 %v6459_v5, %v1569_v20  ;;  %v4460_v20 = vsub.s32 1, %v8701_v16 }
 0x372   : > { %v8389_v50 = vpop.xlane.xlu0 %3492  ;;  %v4269_v27 = vrot.slane %v3644_v9, %v7992_v35  ;;  %v3673_v44 = vadd.f32 %v8372_v46, %v6459_v5 }
 0x373   : > { %v8391_v38 = vpop.xlane.xlu1 %3537  ;;  %v4196_v60 = vsel %vm1986_vm0, %v4195_v30, %v4191_v2  ;;  %v2452_v39 = vrot.slane %v1736_v0, %v7831_v17  ;;  %v3659_v16 = vadd.f32 %v8389_v50, %v6459_v5 }
 0x375   : > { %v2453_v55 = vsel %vm1972_vm14, %v2452_v39, %v8361_v36 }
 0x376   : > { %v1482_v41 = vpop.xlane.xlu0 %1481 }
 0x377   : > { %v1527_v6 = vpop.xlane.xlu1 %1526  ;;  %v1707_v25 = vadd.f32 %v6459_v5, %v1482_v41  ;;  %v3658_v41 = vadd.f32 %v8370_v53, %v6459_v5 }
 0x378   : > { %v1722_v40 = vadd.f32 %v6459_v5, %v1527_v6 }
 0x379   : > { %v2309_v47 = vrot.slane %v1707_v25, %v8251_v43 }
 0x37a   : > { %v1572_v15 = vpop.xlane.xlu0 %1571  ;;  %v2383_v29 = vrot.slane %v1722_v40, %v8148_v63 }
 0x37b   : > { %v2310_v57 = vsel %vm1993_vm2, %v2309_v47, %v2305_v19  ;;  %v8400_v11 = vpop.xlane.xlu1 %1616  ;;  %v1737_v24 = vadd.f32 %v6459_v5, %v1572_v15  ;;  %v5755_v47 = vmov 0  }
 0x37c   : > { %v2555_v14 = vsel %vm2554_vm6, %v2310_v57, %v2553_v59  ;;  %v2384_v56 = vsel %vm1986_vm0, %v2383_v29, %v2379_v34  ;;  %v8442_v19 = vsel %vm4452_vm8, 1, %v5755_v47  ;;  %v4270_v57 = vsel %vm1979_vm15, %v4269_v27, %v4265_v58 }
 0x37d   : > { %v4461_v50 = vrot.slane %v8442_v19, %v4460_v20 }
 0x37e   : > { %v3406_v51 = vpop.xlane.xlu0 %3405 }
 0x37f   : > { %v3451_v52 = vpop.xlane.xlu1 %3450  ;;  %v3630_v45 = vadd.f32 %v3406_v51, %v6459_v5  ;;  %v4338_v51 = vrot.slane %v3658_v41, %v7669_v8 }
 0x380   : > { %v3645_v26 = vadd.f32 %v3451_v52, %v6459_v5  ;;  %v2457_v52 = vrot.slane %v1737_v24, %v7992_v35 }
 0x381   : > { %v4200_v48 = vrot.slane %v3630_v45, %v8251_v43 }
 0x382   : > { %v3496_v62 = vpop.xlane.xlu0 %3495 }
 0x383   : > { %v4201_v18 = vsel %vm1993_vm2, %v4200_v48, %v4196_v60  ;;  %v8414_v37 = vpop.xlane.xlu1 %3540  ;;  %v3660_v45 = vadd.f32 %v3496_v62, %v6459_v5  ;;  %v4457_v48 = vrot.slane %v8442_v19, %v8719_v31  ;;  %v4412_v60 = vrot.slane %v3673_v44, %v7612_v3 }
 0x384   : > { %v4442_v61 = vsel %vm2554_vm6, %v4201_v18, %v4441_v1  ;;  %v4274_v1 = vrot.slane %v3645_v26, %v8148_v63  ;;  %v1751_v62 = vadd.f32 %v6459_v5, %v8379_v42  ;;  %v4339_v3 = vsel %vm1965_vm13, %v4338_v51, %v8334_v7 }
 0x385   : > { %v1752_v26 = vadd.f32 %v6459_v5, %v8400_v11  ;;  %v3675_v36 = vadd.f32 %v8414_v37, %v6459_v5  ;;  %v4348_v42 = vrot.slane %v3660_v45, %v7992_v35  ;;  %v4413_v58 = vsel %vm1958_vm12, %v4412_v60, %v8339_v13 }
 0x386   : > { %v1530_v33 = vpop.xlane.xlu0 %1529  ;;  %v4275_v30 = vsel %vm1986_vm0, %v4274_v1, %v4270_v57  ;;  %vm4462_vm11 = vcmp.eq.s32.totalorder %v4457_v48, 1  ;;  %vm4463_vm12 = vcmp.eq.s32.totalorder %v4461_v50, 1  ;;  %v4497_v48 = vld [vmem:[%s5900_s22 + $0x80] sm:$0xff]  ;;  %v4499_v50 = vld [vmem:[%s5900_s22 + $0x90] sm:$0xff] }
 0x387   : > { %v1575_v59 = vpop.xlane.xlu1 %1574  ;;  %v1723_v21 = vadd.f32 %v6459_v5, %v1530_v33  ;;  %v4343_v33 = vrot.slane %v3659_v16, %v7831_v17  ;;  %v2531_v1 = vrot.slane %v1752_v26, %v7831_v17  ;;  %v4422_v41 = vrot.slane %v3675_v36, %v7831_v17  ;;  %v4502_v26 = vld [vmem:[%s5900_s22 + $0xa8] sm:$0xff] }
 0x388   : > { %v1738_v53 = vadd.f32 %v6459_v5, %v1575_v59  ;;  %v2458_v59 = vsel %vm1979_vm15, %v2457_v52, %v2453_v55  ;;  %v4482_v55 = vld [vmem:[%s5900_s22 + $0x8] sm:$0xff] }
 0x389   : > { %v2388_v23 = vrot.slane %v1723_v21, %v8251_v43  ;;  %v4344_v0 = vsel %vm1972_vm14, %v4343_v33, %v4339_v3  ;;  %v4484_v3 = vld [vmem:[%s5900_s22 + $0x18] sm:$0xff]  ;;  %v4501_v33 = vld [vmem:[%s5900_s22 + $0xa0] sm:$0xff] }
 0x38a   : > { %v1620_v32 = vpop.xlane.xlu0 %1619  ;;  %v2462_v40 = vrot.slane %v1738_v53, %v8148_v63  ;;  %v4349_v24 = vsel %vm1979_vm15, %v4348_v42, %v4344_v0  ;;  %v5057_v36 = vpack.c.bf16 %v4502_v26, %v4501_v33  ;;  %v4485_v42 = vld [vmem:[%s5900_s22 + $0x20] sm:$0xff]  ;;  %v4490_v0 = vld [vmem:[%s5900_s22 + $0x48] sm:$0xff] }
 0x38b   : > { %v2389_v49 = vsel %vm1993_vm2, %v2388_v23, %v2384_v56  ;;  %v3454_v12 = vpop.xlane.xlu1 %3453  ;;  %v2526_v23 = vrot.slane %v1751_v62, %v7669_v8  ;;  %v4500_v62 = vld [vmem:[%s5900_s22 + $0x98] sm:$0xff] }
 0x38c   : > { %v2557_v6 = vsel %vm2556_vm7, %v2389_v49, %v2555_v14  ;;  %v3646_v25 = vadd.f32 %v3454_v12, %v6459_v5  ;;  %v2463_v28 = vsel %vm1986_vm0, %v2462_v40, %v2458_v59  ;;  %v4498_v40 = vld [vmem:[%s5900_s22 + $0x88] sm:$0xff] }
 0x38d   : > { %v2527_v44 = vsel %vm1965_vm13, %v2526_v23, %v8365_v10  ;;  %v4505_v23 = vld [vmem:[%s5900_s22 + $0xc0] sm:$0xff] }
 0x38e   : > { %v4279_v15 = vrot.slane %v3646_v25, %v8251_v43  ;;  %v3499_v14 = vpop.xlane.xlu0 %3498  ;;  %v2532_v13 = vsel %vm1972_vm14, %v2531_v1, %v2527_v44 }
 0x38f   : > { %v3544_v22 = vpop.xlane.xlu1 %3543  ;;  %v3661_v18 = vadd.f32 %v3499_v14, %v6459_v5 }
 0x390   : > { %v4280_v46 = vsel %vm1993_vm2, %v4279_v15, %v4275_v30  ;;  %v3676_v7 = vadd.f32 %v3544_v22, %v6459_v5 }
 0x391   : > { %v4443_v2 = vsel %vm2556_vm7, %v4280_v46, %v4442_v61  ;;  %v3674_v61 = vadd.f32 %v8391_v38, %v6459_v5  ;;  %v1753_v38 = vadd.f32 %v6459_v5, %v1620_v32  ;;  %v4353_v4 = vrot.slane %v3661_v18, %v8148_v63  ;;  %v4481_v18 = vld [vmem:[%s5900_s22] sm:$0xff] }
 0x392   : > { %v1578_v54 = vpop.xlane.xlu0 %1577  ;;  %v4427_v47 = vrot.slane %v3676_v7, %v7992_v35 }
 0x393   : > { %v1623_v9 = vpop.xlane.xlu1 %1622  ;;  %v1739_v29 = vadd.f32 %v6459_v5, %v1578_v54  ;;  %v4417_v27 = vrot.slane %v3674_v61, %v7669_v8  ;;  %v2536_v25 = vrot.slane %v1753_v38, %v7992_v35  ;;  %v4354_v19 = vsel %vm1986_vm0, %v4353_v4, %v4349_v24  ;;  %v4486_v38 = vld [vmem:[%s5900_s22 + $0x28] sm:$0xff] }
 0x394   : > { %v1754_v34 = vadd.f32 %v6459_v5, %v1623_v9  ;;  %v5049_v54 = vpack.c.bf16 %v4498_v40, %v4497_v48  ;;  %v5051_v61 = vpack.c.bf16 %v4482_v55, %v4481_v18  ;;  %v5053_v9 = vpack.c.bf16 %v4500_v62, %v4499_v50 }
 0x395   : > { %v2467_v21 = vrot.slane %v1739_v29, %v8251_v43  ;;  %v4418_v14 = vsel %vm1965_vm13, %v4417_v27, %v4413_v58  ;;  %v2537_v22 = vsel %vm1979_vm15, %v2536_v25, %v2532_v13  ;;  %v4483_v29 = vld [vmem:[%s5900_s22 + $0x10] sm:$0xff]  ;;  %v5059_v7 = vpack.c.bf16 %v4486_v38, %v4485_v42  ;;  %v4506_v27 = vld [vmem:[%s5900_s22 + $0xc8] sm:$0xff]  ;;  %v4493_v13 = vld [vmem:[%s5900_s22 + $0x60] sm:$0xff] }
 0x396   : > { %v3502_v11 = vpop.xlane.xlu0 %3501  ;;  %v2541_v20 = vrot.slane %v1754_v34, %v8148_v63  ;;  %v4423_v30 = vsel %vm1972_vm14, %v4422_v41, %v4418_v14  ;;  %5050 = vmatprep.subr.bf16.mxu1 %v5049_v54  ;;  %v5055_v59 = vpack.c.bf16 %v4484_v3, %v4483_v29  ;;  %v4487_v34 = vld [vmem:[%s5900_s22 + $0x30] sm:$0xff] }
 0x397   : > { %v2468_v37 = vsel %vm1993_vm2, %v2467_v21, %v2463_v28  ;;  %v3547_v56 = vpop.xlane.xlu1 %3546  ;;  %v3662_v32 = vadd.f32 %v3502_v11, %v6459_v5  ;;  %v4428_v10 = vsel %vm1979_vm15, %v4427_v47, %v4423_v30  ;;  %5052 = vmatpush3.bf16.msra.mxu1 %v5051_v61  ;;  %v4503_v21 = vld [vmem:[%s5900_s22 + $0xb0] sm:$0xff]  ;;  %v4504_v28 = vld [vmem:[%s5900_s22 + $0xb8] sm:$0xff] }
 0x398   : > { %v2559_v49 = vsel %vm2558_vm9, %v2468_v37, %v2557_v6  ;;  %v3677_v12 = vadd.f32 %v3547_v56, %v6459_v5  ;;  %v2542_v51 = vsel %vm1986_vm0, %v2541_v20, %v2537_v22  ;;  %5054 = vmatprep.subr.bf16.mxu1 %v5053_v9  ;;  %v5061_v4 = vpack.c.bf16 %v4504_v28, %v4503_v21  ;;  %v4488_v11 = vld [vmem:[%s5900_s22 + $0x38] sm:$0xff] }
 0x399   : > { %v4358_v8 = vrot.slane %v3662_v32, %v8251_v43  ;;  %v5063_v37 = vpack.c.bf16 %v4488_v11, %v4487_v34  ;;  %v5065_v56 = vpack.c.bf16 %v4506_v27, %v4505_v23  ;;  %v4489_v32 = vld [vmem:[%s5900_s22 + $0x40] sm:$0xff]  ;;  %v4508_v20 = vld [vmem:[%s5900_s22 + $0xd8] sm:$0xff] }
 0x39a   : > { %v1626_v6 = vpop.xlane.xlu0 %1625  ;;  %v4432_v17 = vrot.slane %v3677_v12, %v8148_v63  ;;  %v5067_v1 = vpack.c.bf16 %v4490_v0, %v4489_v32  ;;  %v4512_v30 = vld [vmem:[%s5900_s22 + $0xf8] sm:$0xff] }
 0x39b   : > { %v4359_v57 = vsel %vm1993_vm2, %v4358_v8, %v4354_v19  ;;  %v3550_v53 = vpop.xlane.xlu1 %3549  ;;  %v1755_v15 = vadd.f32 %v6459_v5, %v1626_v6  ;;  %5056 = vmatpush3.bf16.msra.mxu1 %v5055_v59  ;;  %v4507_v19 = vld [vmem:[%s5900_s22 + $0xd0] sm:$0xff] }
 0x39c   : > { %v4444_v35 = vsel %vm2558_vm9, %v4359_v57, %v4443_v2  ;;  %v3678_v39 = vadd.f32 %v3550_v53, %v6459_v5  ;;  %v4433_v5 = vsel %vm1986_vm0, %v4432_v17, %v4428_v10  ;;  %5058 = vmatprep.subr.bf16.mxu1 %v5057_v36  ;;  %v4491_v6 = vld [vmem:[%s5900_s22 + $0x50] sm:$0xff]  ;;  %v5069_v44 = vpack.c.bf16 %v4508_v20, %v4507_v19  ;;  %v4492_v17 = vld [vmem:[%s5900_s22 + $0x58] sm:$0xff]  ;;  %v4509_v57 = vld [vmem:[%s5900_s22 + $0xe0] sm:$0xff] }
 0x39d   : > { %v2546_v63 = vrot.slane %v1755_v15, %v8251_v43  ;;  %v4510_v53 = vld [vmem:[%s5900_s22 + $0xe8] sm:$0xff]  ;;  %v5071_v15 = vpack.c.bf16 %v4492_v17, %v4491_v6 }
 0x39e   : > { %v4437_v16 = vrot.slane %v3678_v39, %v8251_v43  ;;  %v5073_v14 = vpack.c.bf16 %v4510_v53, %v4509_v57  ;;  %v4511_v39 = vld [vmem:[%s5900_s22 + $0xf0] sm:$0xff]  ;;  %v4584_v10 = vld [vmem:[%s8650_s9 + $0x8] sm:$0xff] }
 0x39f   : > { %v2547_v52 = vsel %vm1993_vm2, %v2546_v63, %v2542_v51  ;;  %5060 = vmatpush3.bf16.msra.mxu1 %v5059_v7  ;;  %v4583_v63 = vld [vmem:[%s8650_s9] sm:$0xff]  ;;  %v5077_v51 = vpack.c.bf16 %v4512_v30, %v4511_v39 }
 0x3a0   : > { %v4438_v46 = vsel %vm1993_vm2, %v4437_v16, %v4433_v5  ;;  %v2561_v45 = vsel %vm2560_vm10, %v2547_v52, %v2559_v49  ;;  %5062 = vmatprep.subr.bf16.mxu1 %v5061_v4  ;;  %v4495_v16 = vld [vmem:[%s5900_s22 + $0x70] sm:$0xff]  ;;  %v4496_v5 = vld [vmem:[%s5900_s22 + $0x78] sm:$0xff]  ;;  %v5082_v52 = vpack.c.bf16 %v4584_v10, %v4583_v63 }
 0x3a1   : > { %v4445_v2 = vsel %vm2560_vm10, %v4438_v46, %v4444_v35  ;;  %v4464_v31 = vsel %vm4462_vm11, -1e+10, %v2561_v45  ;;  %v4494_v35 = vld [vmem:[%s5900_s22 + $0x68] sm:$0xff]  ;;  %v5079_v46 = vpack.c.bf16 %v4496_v5, %v4495_v16  ;;  %s4890_s22 = sshll.u32 %s5847_s8, 8 }
 0x3a2   : > { %v4465_v60 = vsel %vm4463_vm12, -1e+10, %v4445_v2  ;;  %v5075_v22 = vpack.c.bf16 %v4494_v35, %v4493_v13  ;;  %5083 = vmatpush3.bf16.msra.mxu0 %v5082_v52  ;;  %s8569_s29 = scalar_lea.hbm %s8652_s11, %s4890_s22 }
 0x3a3   : > { %v4466_v43 = vmax.f32 %v4464_v31, %v4465_v60  ;;  %5064 = vmatpush3.bf16.msra.mxu1 %v5063_v37 }
 0x3a4   : > { %5066 = vmatprep.subr.bf16.mxu1 %v5065_v56 }
 0x3a5   : > { %4467 = vmax.xlane.f32.xlu0 %v4466_v43 }
 0x3a7   : > { %5068 = vmatpush3.bf16.msra.mxu1 %v5067_v1 }
 0x3a8   : > { %5070 = vmatprep.subr.bf16.mxu1 %v5069_v44 }
 0x3ab   : > { %5072 = vmatpush3.bf16.msra.mxu1 %v5071_v15 }
 0x3ac   : > { %5074 = vmatprep.subr.bf16.mxu1 %v5073_v14 }
 0x3af   : > { %5076 = vmatpush3.bf16.msra.mxu1 %v5075_v22 }
 0x3b0   : > { %5078 = vmatprep.subr.bf16.mxu1 %v5077_v51 }
 0x3b3   : > { %5080 = vmatpush3.bf16.msra.mxu1 %v5079_v46 }
 0x432   : > { %v4468_v49 = vpop.xlane.xlu0 %4467 }
 0x433   : > { %v4469_v12 = vsub.f32 %v4464_v31, %v4468_v49  ;;  %v4470_v41 = vsub.f32 %v4465_v60, %v4468_v49 }
 0x435   : > { %v4471_v24 = vmul.f32 1.442695, %v4469_v12  ;;  %v4473_v25 = vmul.f32 1.442695, %v4470_v41 }
 0x437   : > { %5645 = vpow2.f32 %v4471_v24 }
 0x438   : > { %5647 = vpow2.f32 %v4473_v25 }
 0x441   : > { %v5646_v8 = vpop.eup %5645 }
 0x442   : > { %v5648_v58 = vpop.eup %5647 }
 0x443   : > { %v4475_v47 = vadd.f32 %v5648_v58, %v5646_v8 }
 0x445   : > { %4476 = vadd.xlane.f32.xlu1 %v4475_v47 }
 0x4d2   : > { %v4477_v45 = vpop.xlane.xlu1 %4476 }
 0x4d3   : > { %5649 = vrcp.f32 %v4477_v45 }
 0x4dd   : > { %v5650_v2 = vpop.eup %5649 }
 0x4de   : > { %v4479_v31 = vmul.f32 %v5650_v2, %v5646_v8  ;;  %v4480_v60 = vmul.f32 %v5650_v2, %v5648_v58 }
 0x4e0   : > { %4665 = vst [vmem:[%s437_s27] sm:$0xff] %v4479_v31  ;;  %4577 = vmatprep.mubr.f32.mxu1 %v4480_v60  ;;  %4666 = vst [vmem:[%s437_s27 + $0x8] sm:$0xff] %v4480_v60 }
 0x4e1   : > { %4578 = vmatmul.mubr.f32.vlgmr.msra.gmra.mrb[16].mxu1 %v4479_v31 }
 0x5b4   : > { %v4962_v43 = vpop.f32.mrb[16].mxu1 }
 0x5b5   : > { %v4963_v48 = vpop.f32.mrb[17].mxu1 }
 0x5b6   : > { %v4964_v40 = vadd.f32 %v4963_v48, %v4962_v43 }
 0x5b8   : > { %5036 = vmatmul.mubr.msk.f32.vlgmr.msra.gmra.mrb[18].mxu0 %vm468_vm1, %v4964_v40 }
 0x5b9   : > { %5668 = shalt.err (!%p5665_p3)
}
 0x5ba   : > { %s5669_s27 = scalar_lea.hbm %s8569_s29, 256  ;;  %s5673_s16 = scalar_lea.hbm %s8652_s11, 512 }
 0x5bb   : > { %p5670_p4 = scmp.ne.s32.totalorder %s8569_s29, %s5669_s27  ;;  %p5674_p9 = scmp.lt.u32.totalorder %s8569_s29, %s8652_s11 }
 0x5bc   : > { %p5675_p10 = scmp.lt.u32.totalorder %s5673_s16, %s5669_s27  ;;  %p5677_p12 = scmp.lt.u32.totalorder %s5669_s27, %s8569_s29 }
 0x5bd   : > { %p5671_p7 = pnand %p5670_p4, %p5864_p5 }
 0x5be   : > { %p5676_p11 = por %p5675_p10, %p5674_p9 }
 0x5bf   : > { %p5672_p8 = pneg %p5671_p7 }
 0x5c0   : > { %p5678_p13 = por %p5677_p12, %p5676_p11 }
 0x5c2   : > { %p5679_p0 = pnand %p5678_p13, %p5672_p8 }
 0x5c4   : > { %5682 = shalt.err (!%p5679_p0)
}
 0x5c5   : > { %5084 = dma.vmem_to_hbm [thread:$0]  (%p5864_p5), %s4689_s17, 256, %s8569_s29, %s4669_s18   ;;  %v4880_v18 = vld [vmem:[%s8651_s10] ss:$0 sm:$0xff] }
 0x5c6   : > { %s4821_s1 = sshll.u32 %s8561_s20, 3  ;;  %s4886_s30 = sshll.u32 %s5847_s8, 7 }
 0x5c7   : > { %s444_s16 = scalar_lea.vmem [#allocation5], %s4821_s1  ;;  %s8597_s2 = scalar_lea.hbm %s8653_s12, %s4886_s30 }
 0x5c8   : > { %s4701_s21 = sshll.u32 %s444_s16, 4  ;;  %s4674_s29 = scalar_lea.sflag [#allocation6], %s8561_s20  ;;  %s8599_s21 = int_to_ptr.vmem [resolvable:$true] %s4701_s21 }
 0x5c9   : > { %s5683_s17 = scalar_lea.vmem %s8599_s21, 128  ;;  %s5757_s8 = smov [#allocation5]  }
 0x5ca   : > { %p5684_p1 = scmp.ne.s32.totalorder %s8599_s21, %s5683_s17  ;;  %s5687_s18 = sshll.u32 %s5757_s8, 4  ;;  %s5688_s18 = int_to_ptr.vmem [resolvable:$false] %s5687_s18 }
 0x5cb   : > { %s5689_s1 = scalar_lea.vmem %s5688_s18, 256  ;;  %p5690_p4 = scmp.lt.s32.totalorder %s8599_s21, %s5688_s18 }
 0x5cc   : > { %p5685_p2 = pnand %p5684_p1, %p5864_p5  ;;  %p5691_p7 = scmp.lt.s32.totalorder %s5689_s1, %s5683_s17 }
 0x5ce   : > { %p5686_p3 = pneg %p5685_p2  ;;  %p5692_p8 = por %p5691_p7, %p5690_p4 }
 0x5d0   : > { %p5693_p9 = pnand %p5692_p8, %p5686_p3 }
 0x68b   : > { %v4661_v54 = vpop.f32.mrb[18].mxu0 }
 0x68c   : > { %v4662_v55 = vadd.f32 %v4880_v18, %v4661_v54  ;;  %v5037_v50 = vpop.f32.mrb[19].mxu0 }
 0x68e   : > { %4667 = vst.msk [vmem:[%s444_s16] sm:$0xff] %vm468_vm1, %v4662_v55 }
 0x68f   : > { %5696 = shalt.err (!%p5693_p9)
}
 0x690   : > { %s5697_s20 = scalar_lea.hbm %s8597_s2, 128  ;;  %s5701_s30 = scalar_lea.hbm %s8653_s12, 256 }
 0x691   : > { %p5698_p10 = scmp.ne.s32.totalorder %s8597_s2, %s5697_s20  ;;  %p5702_p13 = scmp.lt.u32.totalorder %s8597_s2, %s8653_s12 }
 0x692   : > { %p5703_p0 = scmp.lt.u32.totalorder %s5701_s30, %s5697_s20  ;;  %p5705_p2 = scmp.lt.u32.totalorder %s5697_s20, %s8597_s2 }
 0x693   : > { %p5699_p11 = pnand %p5698_p10, %p5864_p5 }
 0x694   : > { %p5704_p1 = por %p5703_p0, %p5702_p13 }
 0x695   : > { %p5700_p12 = pneg %p5699_p11 }
 0x696   : > { %p5706_p3 = por %p5705_p2, %p5704_p1 }
 0x698   : > { %p5707_p4 = pnand %p5706_p3, %p5700_p12 }
 0x69a   : > { %5710 = shalt.err (!%p5707_p4)
}
 0x69b   : > { %5085 = dma.vmem_to_hbm [thread:$0]  (%p5864_p5), %s8599_s21, 128, %s8597_s2, %s4674_s29  }
 0x69c PF: > { %p5095_p7 = scmp.ge.s32.totalorder %s5749_s26, 2  ;;  %s4713_s0 = sand.u32 1, %s5737_s23  }
 0x69d   : > { %s4714_s17 = scalar_lea.sflag [#allocation4], %s4713_s0 }
 0x69e   : > { %p5089_p8 = pnand %p5095_p7, %p5868_p6 }
 0x6a0   : > { %5728 = dma.done.wait (!%p5089_p8), %s4714_s17, 256  }
 0x6a1   : > { %5730 = vsyncadd (!%p5089_p8), %s4714_s17, 4294967040  ;;  %s4723_s8 = scalar_lea.sflag [#allocation6], %s4713_s0 }
 0x6a2   : > { %5732 = dma.done.wait (!%p5089_p8), %s4723_s8, 128  }
 0x6a3   : > { %5734 = vsyncadd (!%p5089_p8), %s4723_s8, 4294967168  ;;  %p27_p5 = scmp.ge.s32.totalorder %s5851_s28, 4   ;;  %s8720_s23 = smov %s5741_s24 }
 0x6a4   : > { %s8721_s24 = smov %s5745_s25  ;;  %s8722_s25 = smov %s5862_s13 }
 0x6a5   : > { %s8723_s26 = smov %s5851_s28  ;;  %29 = sbr.rel (!%p27_p5) target bundleno = 10 (0xa), region = 124 }
 0x6ac   :  { %4728 = vsyncpa [#allocation4], 1 }
 0x6ad   :  { %4730 = vsyncpa [#allocation4 + $0x1], 1 }
 0x6ae   :  { %4731 = vsyncpa [#allocation6], 1 }
 0x6af   :  { %4733 = vsyncpa [#allocation6 + $0x1], 1 }

</bundles_post_ra>
